<compile_context>
chip_gen: v7x
topology: tpu7x:2x2x1
jax: 0.10.0
libtpu: 0.0.40
codegen_flags: <defaults>
</compile_context>

<pallas_src>
import functools
import math

import jax
import jax.numpy as jnp
from jax.experimental import pallas as pl
from jax.experimental.pallas import tpu as pltpu


# MXU input dtype (accumulation is always f32 via preferred_element_type).
_MXU_DTYPE = jnp.bfloat16


# ----------------------------------------------------------------------------
# In-kernel helpers
# ----------------------------------------------------------------------------

def _layer_norm(x, g, b, eps=1e-5):
    """x: (S, D) f32; g, b: (1, D). Residual is added by the caller."""
    mu = jnp.mean(x, axis=-1, keepdims=True)
    var = jnp.mean((x - mu) ** 2, axis=-1, keepdims=True)
    return (x - mu) * jax.lax.rsqrt(var + eps) * g + b


def _mha(q_in, k_in, v_in, w_ref, b_ref, mask_add, *, n_head, fuse_qk):
    """Multi-head attention for one batch element, entirely in VMEM.

    q_in: (Sq, D) f32; k_in, v_in: (Sk, D) f32.
    w_ref: Ref (1, D, 4D) bf16 with columns packed as [Wq|Wk|Wv|Wo].
    b_ref: Ref (1, 1, 4D) f32 packed as [bq|bk|bv|bo].
    mask_add: additive mask broadcastable to (Sq, Sk).
    Heads are isolated via column masks (no lane slicing / concat).
    Returns (Sq, D) f32.
    """
    Sq, D = q_in.shape
    Dh = D // n_head
    scale = 1.0 / math.sqrt(Dh)
    cd = _MXU_DTYPE

    def mm(x, w):
        # Weight refs are indexed per-matmul (bf16 in HBM/VMEM, f32 acc).
        return jnp.dot(x.astype(cd), w, preferred_element_type=jnp.float32)

    if fuse_qk:
        # q_in is k_in: one (Sq, 2D) projection, lane-aligned 128-wide split.
        qk = mm(q_in, w_ref[0, :, 0:2 * D]) + b_ref[0, :, 0:2 * D]
        q = qk[:, :D]
        k = qk[:, D:]
    else:
        q = mm(q_in, w_ref[0, :, 0:D]) + b_ref[0, :, 0:D]
        k = mm(k_in, w_ref[0, :, D:2 * D]) + b_ref[0, :, D:2 * D]
    v = mm(v_in, w_ref[0, :, 2 * D:3 * D]) + b_ref[0, :, 2 * D:3 * D]

    kt = k.astype(cd)
    vt = v.astype(cd)
    col = jax.lax.broadcasted_iota(jnp.int32, (1, D), 1)

    o = jnp.zeros((Sq, D), jnp.float32)
    for h in range(n_head):       # static unroll; no lane slicing, no concat
        m_h = jnp.where((col >= h * Dh) & (col < (h + 1) * Dh),
                        1.0, 0.0).astype(jnp.float32)          # (1, D)
        # Full-width contraction; zeroed columns contribute nothing.
        s = jax.lax.dot_general((q * m_h).astype(cd), kt,
                                (((1,), (1,)), ((), ())),
                                preferred_element_type=jnp.float32)  # (Sq, Sk)
        s = s * scale + mask_add
        s = s - jnp.max(s, axis=-1, keepdims=True)
        p = jnp.exp(s)
        p = p * pl.reciprocal(jnp.sum(p, axis=-1, keepdims=True), approx=True)
        # p @ V gives all columns; keep only this head's columns.
        o = o + m_h * jnp.dot(p.astype(cd), vt,
                              preferred_element_type=jnp.float32)

    return mm(o, w_ref[0, :, 3 * D:4 * D]) + b_ref[0, :, 3 * D:4 * D]


# ----------------------------------------------------------------------------
# Fused whole-stack kernel: grid = (batch, layer)
# ----------------------------------------------------------------------------

def _make_stack_kernel(*, n_head, causal, return_intermediate):
    def kernel(tgt_ref, mem_ref, qpos_ref, mpos_ref, tpad_ref, mpad_ref,
               wself_ref, bself_ref, wcross_ref, bcross_ref,
               w1_ref, b1_ref, w2_ref, b2_ref, lng_ref, lnb_ref,
               ng_ref, nb_ref, *rest):
        if return_intermediate:
            out_ref, inter_ref, act_ref = rest
        else:
            out_ref, act_ref = rest
            inter_ref = None

        l = pl.program_id(1)
        S = tgt_ref.shape[1]
        cd = _MXU_DTYPE

        # Initialize the persistent activation carry at the first layer.
        @pl.when(l == 0)
        def _():
            act_ref[...] = tgt_ref[0].astype(jnp.float32)

        x = act_ref[...]                           # (S, D) f32 carry
        mem = mem_ref[0].astype(jnp.float32)       # (P, D)
        qp = qpos_ref[0].astype(jnp.float32)       # (S, D)
        mp = mpos_ref[0].astype(jnp.float32)       # (P, D)

        # ---- masks built in-kernel (nothing (S,S)-sized DMA'd from HBM) ----
        tpad = tpad_ref[0]                         # (1, S) additive 0 / -1e9
        if causal:
            row = jax.lax.broadcasted_iota(jnp.int32, (S, S), 0)
            cc = jax.lax.broadcasted_iota(jnp.int32, (S, S), 1)
            self_mask = jnp.where(cc > row, -1e9, 0.0).astype(jnp.float32) + tpad
        else:
            self_mask = tpad                       # broadcasts over query rows
        cross_mask = mpad_ref[0]                   # (1, P) additive

        # ---- self-attention (q = k = x + query_pos, v = x), post-norm ----
        q_in = x + qp
        sa = _mha(q_in, q_in, x, wself_ref, bself_ref, self_mask,
                  n_head=n_head, fuse_qk=True)
        x = _layer_norm(x + sa, lng_ref[0, 0:1], lnb_ref[0, 0:1])

        # ---- cross-attention (q = x + query_pos, k = mem + pos, v = mem) ---
        ca = _mha(x + qp, mem + mp, mem, wcross_ref, bcross_ref, cross_mask,
                  n_head=n_head, fuse_qk=False)
        x = _layer_norm(x + ca, lng_ref[0, 1:2], lnb_ref[0, 1:2])

        # ---- FFN (relu) ----
        h = jnp.dot(x.astype(cd), w1_ref[0],
                    preferred_element_type=jnp.float32) + b1_ref[0]
        h = jnp.maximum(h, 0.0)
        ff = jnp.dot(h.astype(cd), w2_ref[0],
                     preferred_element_type=jnp.float32) + b2_ref[0]
        x = _layer_norm(x + ff, lng_ref[0, 2:3], lnb_ref[0, 2:3])

        act_ref[...] = x

        if return_intermediate:
            inter_ref[0, 0] = _layer_norm(x, ng_ref[...], nb_ref[...]
                                          ).astype(inter_ref.dtype)

        # Only the last layer applies the final norm and writes HBM output.
        @pl.when(l == pl.num_programs(1) - 1)
        def _():
            out_ref[0] = _layer_norm(x, ng_ref[...], nb_ref[...]
                                     ).astype(out_ref.dtype)

    return kernel


# ----------------------------------------------------------------------------
# TransformerDecoder forward (mirrors the PyTorch module)
# ----------------------------------------------------------------------------

def transformer_decoder_forward(params, tgt, memory,
                                tgt_key_padding_mask=None,
                                memory_key_padding_mask=None,
                                pos=None, query_pos=None,
                                *, n_head, causal=True,
                                return_intermediate=False):
    """tgt: (B, S, D), memory: (B, P, D). Returns (B, S, D) or stacked
    normed intermediates (L, B, S, D) if return_intermediate."""
    B, S, D = tgt.shape
    P = memory.shape[1]
    L = params["w_self"].shape[0]
    FF = params["w1"].shape[2]

    if query_pos is None:
        query_pos = jnp.zeros_like(tgt)
    if pos is None:
        pos = jnp.zeros_like(memory)

    if tgt_key_padding_mask is None:
        tpad_add = jnp.zeros((B, 1, S), jnp.float32)
    else:
        tpad_add = jnp.where(tgt_key_padding_mask, -1e9, 0.0
                             ).astype(jnp.float32).reshape(B, 1, S)
    if memory_key_padding_mask is None:
        mpad_add = jnp.zeros((B, 1, P), jnp.float32)
    else:
        mpad_add = jnp.where(memory_key_padding_mask, -1e9, 0.0
                             ).astype(jnp.float32).reshape(B, 1, P)

    kernel = _make_stack_kernel(n_head=n_head, causal=causal,
                                return_intermediate=return_intermediate)

    out_shapes = [jax.ShapeDtypeStruct((B, S, D), tgt.dtype)]
    out_specs = [pl.BlockSpec((1, S, D), lambda b, l: (b, 0, 0))]
    if return_intermediate:
        out_shapes.append(jax.ShapeDtypeStruct((L, B, S, D), tgt.dtype))
        out_specs.append(pl.BlockSpec((1, 1, S, D), lambda b, l: (l, b, 0, 0)))

    grid_spec = pltpu.PrefetchScalarGridSpec(
        num_scalar_prefetch=0,
        grid=(B, L),
        in_specs=[
            pl.BlockSpec((1, S, D), lambda b, l: (b, 0, 0)),      # tgt
            pl.BlockSpec((1, P, D), lambda b, l: (b, 0, 0)),      # memory
            pl.BlockSpec((1, S, D), lambda b, l: (b, 0, 0)),      # query_pos
            pl.BlockSpec((1, P, D), lambda b, l: (b, 0, 0)),      # pos
            pl.BlockSpec((1, 1, S), lambda b, l: (b, 0, 0)),      # tgt pad add
            pl.BlockSpec((1, 1, P), lambda b, l: (b, 0, 0)),      # mem pad add
            pl.BlockSpec((1, D, 4 * D), lambda b, l: (l, 0, 0)),  # w_self packed
            pl.BlockSpec((1, 1, 4 * D), lambda b, l: (l, 0, 0)),  # b_self packed
            pl.BlockSpec((1, D, 4 * D), lambda b, l: (l, 0, 0)),  # w_cross packed
            pl.BlockSpec((1, 1, 4 * D), lambda b, l: (l, 0, 0)),  # b_cross packed
            pl.BlockSpec((1, D, FF), lambda b, l: (l, 0, 0)),     # w1
            pl.BlockSpec((1, 1, FF), lambda b, l: (l, 0, 0)),     # b1
            pl.BlockSpec((1, FF, D), lambda b, l: (l, 0, 0)),     # w2
            pl.BlockSpec((1, 1, D), lambda b, l: (l, 0, 0)),      # b2
            pl.BlockSpec((1, 3, D), lambda b, l: (l, 0, 0)),      # ln gammas
            pl.BlockSpec((1, 3, D), lambda b, l: (l, 0, 0)),      # ln betas
            pl.BlockSpec((1, D), lambda b, l: (0, 0)),            # final norm g
            pl.BlockSpec((1, D), lambda b, l: (0, 0)),            # final norm b
        ],
        out_specs=tuple(out_specs) if return_intermediate else out_specs[0],
        scratch_shapes=[pltpu.VMEM((S, D), jnp.float32)],         # activation
    )

    outs = pl.pallas_call(
        kernel,
        out_shape=tuple(out_shapes) if return_intermediate else out_shapes[0],
        grid_spec=grid_spec,
        compiler_params=pltpu.CompilerParams(
            dimension_semantics=("parallel", "arbitrary")),
    )(tgt, memory, query_pos, pos, tpad_add, mpad_add,
      params["w_self"], params["b_self"], params["w_cross"], params["b_cross"],
      params["w1"], params["b1"], params["w2"], params["b2"],
      params["ln_g"], params["ln_b"], params["norm_g"], params["norm_b"])

    if return_intermediate:
        return outs[1]
    return outs


def init_params(key, *, num_layers, d_model, d_ff, weight_dtype=jnp.bfloat16):
    """Weights stored bf16 (MXU-native); biases / LN params f32.
    Attention weights packed along columns as [Wq|Wk|Wv|Wo]."""
    L, D, FF = num_layers, d_model, d_ff
    ks = jax.random.split(key, 4)

    def w(k, shape, fan_in):
        return (jax.random.normal(k, shape, jnp.float32)
                / math.sqrt(fan_in)).astype(weight_dtype)

    return {
        "w_self": w(ks[0], (L, D, 4 * D), D),
        "b_self": jnp.zeros((L, 1, 4 * D), jnp.float32),
        "w_cross": w(ks[1], (L, D, 4 * D), D),
        "b_cross": jnp.zeros((L, 1, 4 * D), jnp.float32),
        "w1": w(ks[2], (L, D, FF), D),
        "b1": jnp.zeros((L, 1, FF), jnp.float32),
        "w2": w(ks[3], (L, FF, D), FF),
        "b2": jnp.zeros((L, 1, D), jnp.float32),
        "ln_g": jnp.ones((L, 3, D), jnp.float32),
        "ln_b": jnp.zeros((L, 3, D), jnp.float32),
        "norm_g": jnp.ones((1, D), jnp.float32),
        "norm_b": jnp.zeros((1, D), jnp.float32),
    }


# ----------------------------------------------------------------------------
# Main
# ----------------------------------------------------------------------------

if __name__ == "__main__":
    # Small shapes; d_model = 128 keeps every matmul lane-dense.
    B, S, P = 2, 8, 16            # batch, tgt length, memory length
    D, H, FF = 128, 4, 256        # d_model, n_head, ffn hidden
    NUM_LAYERS = 2

    key = jax.random.PRNGKey(0)
    kp, kt, km, kq, kpos = jax.random.split(key, 5)

    params = init_params(kp, num_layers=NUM_LAYERS, d_model=D, d_ff=FF)

    tgt = jax.random.normal(kt, (B, S, D), jnp.float32)
    memory = jax.random.normal(km, (B, P, D), jnp.float32)
    query_pos = 0.02 * jax.random.normal(kq, (B, S, D), jnp.float32)
    pos = 0.02 * jax.random.normal(kpos, (B, P, D), jnp.float32)
    # padding masks: True = padded (last two tgt tokens of batch 1 padded)
    tgt_key_padding_mask = jnp.zeros((B, S), jnp.bool_).at[1, -2:].set(True)
    memory_key_padding_mask = jnp.zeros((B, P), jnp.bool_)

    fwd = jax.jit(functools.partial(transformer_decoder_forward,
                                    n_head=H, causal=True,
                                    return_intermediate=False))
    out = fwd(params, tgt, memory,
              tgt_key_padding_mask=tgt_key_padding_mask,
              memory_key_padding_mask=memory_key_padding_mask,
              pos=pos, query_pos=query_pos)
    out = jax.block_until_ready(out)

    assert out.shape == (B, S, D)
    assert bool(jnp.all(jnp.isfinite(out)))
    print("KERNEL_OK")
</pallas_src>

<mosaic_0001>
module attributes {stable_mosaic.version = 11 : i64} {
  func.func @kernel(%arg0: i32, %arg1: i32, %arg2: memref<1x8x128xf32, #tpu.memory_space<vmem>>, %arg3: memref<1x16x128xf32, #tpu.memory_space<vmem>>, %arg4: memref<1x8x128xf32, #tpu.memory_space<vmem>>, %arg5: memref<1x16x128xf32, #tpu.memory_space<vmem>>, %arg6: memref<1x1x8xf32, #tpu.memory_space<vmem>>, %arg7: memref<1x1x16xf32, #tpu.memory_space<vmem>>, %arg8: memref<1x128x512xbf16, #tpu.memory_space<vmem>>, %arg9: memref<1x1x512xf32, #tpu.memory_space<vmem>>, %arg10: memref<1x128x512xbf16, #tpu.memory_space<vmem>>, %arg11: memref<1x1x512xf32, #tpu.memory_space<vmem>>, %arg12: memref<1x128x256xbf16, #tpu.memory_space<vmem>>, %arg13: memref<1x1x256xf32, #tpu.memory_space<vmem>>, %arg14: memref<1x256x128xbf16, #tpu.memory_space<vmem>>, %arg15: memref<1x1x128xf32, #tpu.memory_space<vmem>>, %arg16: memref<1x3x128xf32, #tpu.memory_space<vmem>>, %arg17: memref<1x3x128xf32, #tpu.memory_space<vmem>>, %arg18: memref<1x128xf32, #tpu.memory_space<vmem>>, %arg19: memref<1x128xf32, #tpu.memory_space<vmem>>, %arg20: memref<1x8x128xf32, #tpu.memory_space<vmem>>, %arg21: memref<8x128xf32, #tpu.memory_space<vmem>>) attributes {dimension_semantics = [#tpu.dimension_semantics<parallel>, #tpu.dimension_semantics<arbitrary>], iteration_bounds = array<i64: 2, 2>, scalar_prefetch = 0 : i64, scratch_operands = 1 : i64, tpu.core_type = #tpu.core_type<tc>, window_params = [{transform_indices = @transform_0, window_bounds = array<i64: 1, 8, 128>}, {transform_indices = @transform_1, window_bounds = array<i64: 1, 16, 128>}, {transform_indices = @transform_2, window_bounds = array<i64: 1, 8, 128>}, {transform_indices = @transform_3, window_bounds = array<i64: 1, 16, 128>}, {transform_indices = @transform_4, window_bounds = array<i64: 1, 1, 8>}, {transform_indices = @transform_5, window_bounds = array<i64: 1, 1, 16>}, {transform_indices = @transform_6, window_bounds = array<i64: 1, 128, 512>}, {transform_indices = @transform_7, window_bounds = array<i64: 1, 1, 512>}, {transform_indices = @transform_8, window_bounds = array<i64: 1, 128, 512>}, {transform_indices = @transform_9, window_bounds = array<i64: 1, 1, 512>}, {transform_indices = @transform_10, window_bounds = array<i64: 1, 128, 256>}, {transform_indices = @transform_11, window_bounds = array<i64: 1, 1, 256>}, {transform_indices = @transform_12, window_bounds = array<i64: 1, 256, 128>}, {transform_indices = @transform_13, window_bounds = array<i64: 1, 1, 128>}, {transform_indices = @transform_14, window_bounds = array<i64: 1, 3, 128>}, {transform_indices = @transform_15, window_bounds = array<i64: 1, 3, 128>}, {pipeline_mode = #tpu.pipeline_mode<synchronous>, transform_indices = @transform_16, window_bounds = array<i64: 1, 128>}, {pipeline_mode = #tpu.pipeline_mode<synchronous>, transform_indices = @transform_17, window_bounds = array<i64: 1, 128>}, {transform_indices = @transform_18, window_bounds = array<i64: 1, 8, 128>}]} {
    %c0_i32 = arith.constant 0 : i32
    %0 = arith.cmpi eq, %arg1, %c0_i32 : i32
    %1 = arith.extui %0 : i1 to i32
    %c0_i32_0 = arith.constant 0 : i32
    %2 = arith.cmpi ne, %1, %c0_i32_0 : i32
    scf.if %2 {
      %c0_183 = arith.constant 0 : index
      %c0_184 = arith.constant 0 : index
      %c0_185 = arith.constant 0 : index
      %438 = vector.load %arg2[%c0_183, %c0_184, %c0_185] : memref<1x8x128xf32, #tpu.memory_space<vmem>>, vector<1x8x128xf32>
      %439 = vector.shape_cast %438 : vector<1x8x128xf32> to vector<8x128xf32>
      %c0_186 = arith.constant 0 : index
      %c0_187 = arith.constant 0 : index
      %440 = vector.load %arg21[%c0_186, %c0_187] : memref<8x128xf32, #tpu.memory_space<vmem>>, vector<8x128xf32>
      tpu.vector_store %arg21[%c0_186, %c0_187], %439 {strides = array<i32>} : memref<8x128xf32, #tpu.memory_space<vmem>>, vector<8x128xf32>,
    } else {
    }
    %c0 = arith.constant 0 : index
    %c0_1 = arith.constant 0 : index
    %3 = vector.load %arg21[%c0, %c0_1] : memref<8x128xf32, #tpu.memory_space<vmem>>, vector<8x128xf32>
    %c0_2 = arith.constant 0 : index
    %c0_3 = arith.constant 0 : index
    %c0_4 = arith.constant 0 : index
    %4 = vector.load %arg3[%c0_2, %c0_3, %c0_4] : memref<1x16x128xf32, #tpu.memory_space<vmem>>, vector<1x16x128xf32>
    %5 = vector.shape_cast %4 : vector<1x16x128xf32> to vector<16x128xf32>
    %c0_5 = arith.constant 0 : index
    %c0_6 = arith.constant 0 : index
    %c0_7 = arith.constant 0 : index
    %6 = vector.load %arg4[%c0_5, %c0_6, %c0_7] : memref<1x8x128xf32, #tpu.memory_space<vmem>>, vector<1x8x128xf32>
    %7 = vector.shape_cast %6 : vector<1x8x128xf32> to vector<8x128xf32>
    %c0_8 = arith.constant 0 : index
    %c0_9 = arith.constant 0 : index
    %c0_10 = arith.constant 0 : index
    %8 = vector.load %arg5[%c0_8, %c0_9, %c0_10] : memref<1x16x128xf32, #tpu.memory_space<vmem>>, vector<1x16x128xf32>
    %9 = vector.shape_cast %8 : vector<1x16x128xf32> to vector<16x128xf32>
    %c0_11 = arith.constant 0 : index
    %c0_12 = arith.constant 0 : index
    %c0_13 = arith.constant 0 : index
    %10 = vector.load %arg6[%c0_11, %c0_12, %c0_13] : memref<1x1x8xf32, #tpu.memory_space<vmem>>, vector<1x1x8xf32>
    %11 = vector.shape_cast %10 : vector<1x1x8xf32> to vector<1x8xf32>
    %12 = tpu.iota {dimensions = array<i32: 0>} : vector<8x8xi32>
    %13 = tpu.iota {dimensions = array<i32: 1>} : vector<8x8xi32>
    %14 = arith.cmpi sgt, %13, %12 : vector<8x8xi32>
    %cst = arith.constant -1.000000e+09 : f32
    %cst_14 = arith.constant 0.000000e+00 : f32
    %15 = vector.broadcast %cst : f32 to vector<8x8xf32>
    %16 = vector.broadcast %cst_14 : f32 to vector<8x8xf32>
    %17 = arith.select %14, %15, %16 : vector<8x8xi1>, vector<8x8xf32>
    %18 = vector.broadcast %11 : vector<1x8xf32> to vector<8x8xf32>
    %19 = arith.addf %17, %18 : vector<8x8xf32>
    %c0_15 = arith.constant 0 : index
    %c0_16 = arith.constant 0 : index
    %c0_17 = arith.constant 0 : index
    %20 = vector.load %arg7[%c0_15, %c0_16, %c0_17] : memref<1x1x16xf32, #tpu.memory_space<vmem>>, vector<1x1x16xf32>
    %21 = vector.shape_cast %20 : vector<1x1x16xf32> to vector<1x16xf32>
    %22 = arith.addf %3, %7 : vector<8x128xf32>
    %c0_18 = arith.constant 0 : index
    %c0_19 = arith.constant 0 : index
    %c0_20 = arith.constant 0 : index
    %23 = vector.load %arg8[%c0_18, %c0_19, %c0_20] : memref<1x128x512xbf16, #tpu.memory_space<vmem>>, vector<1x128x256xbf16>
    %24 = vector.shape_cast %23 : vector<1x128x256xbf16> to vector<128x256xbf16>
    %25 = arith.truncf %22 : vector<8x128xf32> to vector<8x128xbf16>
    %cst_21 = arith.constant dense<0.000000e+00> : vector<8x256xf32>
    %26 = tpu.matmul %25, %24, %cst_21 {dimension_numbers = #tpu.dot_dimension_numbers<[1], [0], [0], [1], [0, 0, 1, 1], [], []>} : vector<8x128xbf16>, vector<128x256xbf16>, vector<8x256xf32> -> vector<8x256xf32>
    %c0_22 = arith.constant 0 : index
    %c0_23 = arith.constant 0 : index
    %c0_24 = arith.constant 0 : index
    %27 = vector.load %arg9[%c0_22, %c0_23, %c0_24] : memref<1x1x512xf32, #tpu.memory_space<vmem>>, vector<1x1x256xf32>
    %28 = vector.shape_cast %27 : vector<1x1x256xf32> to vector<1x256xf32>
    %29 = vector.broadcast %28 : vector<1x256xf32> to vector<8x256xf32>
    %30 = arith.addf %26, %29 : vector<8x256xf32>
    %31 = vector.extract_strided_slice %30 {offsets = [0, 0], sizes = [8, 128], strides = [1, 1]} : vector<8x256xf32> to vector<8x128xf32>
    %32 = vector.extract_strided_slice %30 {offsets = [0, 128], sizes = [8, 128], strides = [1, 1]} : vector<8x256xf32> to vector<8x128xf32>
    %c0_25 = arith.constant 0 : index
    %c0_26 = arith.constant 0 : index
    %c256 = arith.constant 256 : index
    %33 = vector.load %arg8[%c0_25, %c0_26, %c256] : memref<1x128x512xbf16, #tpu.memory_space<vmem>>, vector<1x128x128xbf16>
    %34 = vector.shape_cast %33 : vector<1x128x128xbf16> to vector<128x128xbf16>
    %35 = arith.truncf %3 : vector<8x128xf32> to vector<8x128xbf16>
    %cst_27 = arith.constant dense<0.000000e+00> : vector<8x128xf32>
    %36 = tpu.matmul %35, %34, %cst_27 {dimension_numbers = #tpu.dot_dimension_numbers<[1], [0], [0], [1], [0, 0, 1, 1], [], []>} : vector<8x128xbf16>, vector<128x128xbf16>, vector<8x128xf32> -> vector<8x128xf32>
    %c0_28 = arith.constant 0 : index
    %c0_29 = arith.constant 0 : index
    %c256_30 = arith.constant 256 : index
    %37 = vector.load %arg9[%c0_28, %c0_29, %c256_30] : memref<1x1x512xf32, #tpu.memory_space<vmem>>, vector<1x1x128xf32>
    %38 = vector.shape_cast %37 : vector<1x1x128xf32> to vector<1x128xf32>
    %39 = vector.broadcast %38 : vector<1x128xf32> to vector<8x128xf32>
    %40 = arith.addf %36, %39 : vector<8x128xf32>
    %41 = arith.truncf %32 : vector<8x128xf32> to vector<8x128xbf16>
    %42 = arith.truncf %40 : vector<8x128xf32> to vector<8x128xbf16>
    %43 = tpu.iota {dimensions = array<i32: 1>} : vector<1x128xi32>
    %cst_31 = arith.constant 0.000000e+00 : f32
    %44 = vector.broadcast %cst_31 : f32 to vector<8x128xf32>
    %c0_i32_32 = arith.constant 0 : i32
    %45 = vector.broadcast %c0_i32_32 : i32 to vector<1x128xi32>
    %46 = arith.cmpi sge, %43, %45 : vector<1x128xi32>
    %c32_i32 = arith.constant 32 : i32
    %47 = vector.broadcast %c32_i32 : i32 to vector<1x128xi32>
    %48 = arith.cmpi slt, %43, %47 : vector<1x128xi32>
    %49 = arith.andi %46, %48 : vector<1x128xi1>
    %cst_33 = arith.constant 1.000000e+00 : f32
    %cst_34 = arith.constant 0.000000e+00 : f32
    %50 = vector.broadcast %cst_33 : f32 to vector<1x128xf32>
    %51 = vector.broadcast %cst_34 : f32 to vector<1x128xf32>
    %52 = arith.select %49, %50, %51 : vector<1x128xi1>, vector<1x128xf32>
    %53 = vector.broadcast %52 : vector<1x128xf32> to vector<8x128xf32>
    %54 = arith.mulf %31, %53 : vector<8x128xf32>
    %55 = arith.truncf %54 : vector<8x128xf32> to vector<8x128xbf16>
    %cst_35 = arith.constant dense<0.000000e+00> : vector<8x8xf32>
    %56 = tpu.matmul %55, %41, %cst_35 {dimension_numbers = #tpu.dot_dimension_numbers<[1], [1], [0], [0], [0, 0, 1, 0], [], []>} : vector<8x128xbf16>, vector<8x128xbf16>, vector<8x8xf32> -> vector<8x8xf32>
    %cst_36 = arith.constant 0.176776692 : f32
    %57 = vector.broadcast %cst_36 : f32 to vector<8x8xf32>
    %58 = arith.mulf %56, %57 : vector<8x8xf32>
    %59 = arith.addf %58, %19 : vector<8x8xf32>
    %cst_37 = arith.constant dense<0xFF800000> : vector<8xf32>
    %60 = vector.multi_reduction <maximumf>, %59, %cst_37 [1] : vector<8x8xf32> to vector<8xf32>
    %61 = vector.shape_cast %60 : vector<8xf32> to vector<8x1xf32>
    %62 = vector.broadcast %61 : vector<8x1xf32> to vector<8x8xf32>
    %63 = arith.subf %59, %62 : vector<8x8xf32>
    %64 = math.exp %63 : vector<8x8xf32>
    %cst_38 = arith.constant dense<0.000000e+00> : vector<8xf32>
    %65 = vector.multi_reduction <add>, %64, %cst_38 [1] : vector<8x8xf32> to vector<8xf32>
    %66 = vector.shape_cast %65 : vector<8xf32> to vector<8x1xf32>
    %67 = tpu.reciprocal %66 {approx = true} : vector<8x1xf32> -> vector<8x1xf32>
    %68 = vector.broadcast %67 : vector<8x1xf32> to vector<8x8xf32>
    %69 = arith.mulf %64, %68 : vector<8x8xf32>
    %70 = arith.truncf %69 : vector<8x8xf32> to vector<8x8xbf16>
    %cst_39 = arith.constant dense<0.000000e+00> : vector<8x128xf32>
    %71 = tpu.matmul %70, %42, %cst_39 {dimension_numbers = #tpu.dot_dimension_numbers<[1], [0], [0], [1], [0, 0, 1, 1], [], []>} : vector<8x8xbf16>, vector<8x128xbf16>, vector<8x128xf32> -> vector<8x128xf32>
    %72 = vector.broadcast %52 : vector<1x128xf32> to vector<8x128xf32>
    %73 = arith.mulf %72, %71 : vector<8x128xf32>
    %74 = arith.addf %44, %73 : vector<8x128xf32>
    %c32_i32_40 = arith.constant 32 : i32
    %75 = vector.broadcast %c32_i32_40 : i32 to vector<1x128xi32>
    %76 = arith.cmpi sge, %43, %75 : vector<1x128xi32>
    %c64_i32 = arith.constant 64 : i32
    %77 = vector.broadcast %c64_i32 : i32 to vector<1x128xi32>
    %78 = arith.cmpi slt, %43, %77 : vector<1x128xi32>
    %79 = arith.andi %76, %78 : vector<1x128xi1>
    %cst_41 = arith.constant 1.000000e+00 : f32
    %cst_42 = arith.constant 0.000000e+00 : f32
    %80 = vector.broadcast %cst_41 : f32 to vector<1x128xf32>
    %81 = vector.broadcast %cst_42 : f32 to vector<1x128xf32>
    %82 = arith.select %79, %80, %81 : vector<1x128xi1>, vector<1x128xf32>
    %83 = vector.broadcast %82 : vector<1x128xf32> to vector<8x128xf32>
    %84 = arith.mulf %31, %83 : vector<8x128xf32>
    %85 = arith.truncf %84 : vector<8x128xf32> to vector<8x128xbf16>
    %cst_43 = arith.constant dense<0.000000e+00> : vector<8x8xf32>
    %86 = tpu.matmul %85, %41, %cst_43 {dimension_numbers = #tpu.dot_dimension_numbers<[1], [1], [0], [0], [0, 0, 1, 0], [], []>} : vector<8x128xbf16>, vector<8x128xbf16>, vector<8x8xf32> -> vector<8x8xf32>
    %cst_44 = arith.constant 0.176776692 : f32
    %87 = vector.broadcast %cst_44 : f32 to vector<8x8xf32>
    %88 = arith.mulf %86, %87 : vector<8x8xf32>
    %89 = arith.addf %88, %19 : vector<8x8xf32>
    %cst_45 = arith.constant dense<0xFF800000> : vector<8xf32>
    %90 = vector.multi_reduction <maximumf>, %89, %cst_45 [1] : vector<8x8xf32> to vector<8xf32>
    %91 = vector.shape_cast %90 : vector<8xf32> to vector<8x1xf32>
    %92 = vector.broadcast %91 : vector<8x1xf32> to vector<8x8xf32>
    %93 = arith.subf %89, %92 : vector<8x8xf32>
    %94 = math.exp %93 : vector<8x8xf32>
    %cst_46 = arith.constant dense<0.000000e+00> : vector<8xf32>
    %95 = vector.multi_reduction <add>, %94, %cst_46 [1] : vector<8x8xf32> to vector<8xf32>
    %96 = vector.shape_cast %95 : vector<8xf32> to vector<8x1xf32>
    %97 = tpu.reciprocal %96 {approx = true} : vector<8x1xf32> -> vector<8x1xf32>
    %98 = vector.broadcast %97 : vector<8x1xf32> to vector<8x8xf32>
    %99 = arith.mulf %94, %98 : vector<8x8xf32>
    %100 = arith.truncf %99 : vector<8x8xf32> to vector<8x8xbf16>
    %cst_47 = arith.constant dense<0.000000e+00> : vector<8x128xf32>
    %101 = tpu.matmul %100, %42, %cst_47 {dimension_numbers = #tpu.dot_dimension_numbers<[1], [0], [0], [1], [0, 0, 1, 1], [], []>} : vector<8x8xbf16>, vector<8x128xbf16>, vector<8x128xf32> -> vector<8x128xf32>
    %102 = vector.broadcast %82 : vector<1x128xf32> to vector<8x128xf32>
    %103 = arith.mulf %102, %101 : vector<8x128xf32>
    %104 = arith.addf %74, %103 : vector<8x128xf32>
    %c64_i32_48 = arith.constant 64 : i32
    %105 = vector.broadcast %c64_i32_48 : i32 to vector<1x128xi32>
    %106 = arith.cmpi sge, %43, %105 : vector<1x128xi32>
    %c96_i32 = arith.constant 96 : i32
    %107 = vector.broadcast %c96_i32 : i32 to vector<1x128xi32>
    %108 = arith.cmpi slt, %43, %107 : vector<1x128xi32>
    %109 = arith.andi %106, %108 : vector<1x128xi1>
    %cst_49 = arith.constant 1.000000e+00 : f32
    %cst_50 = arith.constant 0.000000e+00 : f32
    %110 = vector.broadcast %cst_49 : f32 to vector<1x128xf32>
    %111 = vector.broadcast %cst_50 : f32 to vector<1x128xf32>
    %112 = arith.select %109, %110, %111 : vector<1x128xi1>, vector<1x128xf32>
    %113 = vector.broadcast %112 : vector<1x128xf32> to vector<8x128xf32>
    %114 = arith.mulf %31, %113 : vector<8x128xf32>
    %115 = arith.truncf %114 : vector<8x128xf32> to vector<8x128xbf16>
    %cst_51 = arith.constant dense<0.000000e+00> : vector<8x8xf32>
    %116 = tpu.matmul %115, %41, %cst_51 {dimension_numbers = #tpu.dot_dimension_numbers<[1], [1], [0], [0], [0, 0, 1, 0], [], []>} : vector<8x128xbf16>, vector<8x128xbf16>, vector<8x8xf32> -> vector<8x8xf32>
    %cst_52 = arith.constant 0.176776692 : f32
    %117 = vector.broadcast %cst_52 : f32 to vector<8x8xf32>
    %118 = arith.mulf %116, %117 : vector<8x8xf32>
    %119 = arith.addf %118, %19 : vector<8x8xf32>
    %cst_53 = arith.constant dense<0xFF800000> : vector<8xf32>
    %120 = vector.multi_reduction <maximumf>, %119, %cst_53 [1] : vector<8x8xf32> to vector<8xf32>
    %121 = vector.shape_cast %120 : vector<8xf32> to vector<8x1xf32>
    %122 = vector.broadcast %121 : vector<8x1xf32> to vector<8x8xf32>
    %123 = arith.subf %119, %122 : vector<8x8xf32>
    %124 = math.exp %123 : vector<8x8xf32>
    %cst_54 = arith.constant dense<0.000000e+00> : vector<8xf32>
    %125 = vector.multi_reduction <add>, %124, %cst_54 [1] : vector<8x8xf32> to vector<8xf32>
    %126 = vector.shape_cast %125 : vector<8xf32> to vector<8x1xf32>
    %127 = tpu.reciprocal %126 {approx = true} : vector<8x1xf32> -> vector<8x1xf32>
    %128 = vector.broadcast %127 : vector<8x1xf32> to vector<8x8xf32>
    %129 = arith.mulf %124, %128 : vector<8x8xf32>
    %130 = arith.truncf %129 : vector<8x8xf32> to vector<8x8xbf16>
    %cst_55 = arith.constant dense<0.000000e+00> : vector<8x128xf32>
    %131 = tpu.matmul %130, %42, %cst_55 {dimension_numbers = #tpu.dot_dimension_numbers<[1], [0], [0], [1], [0, 0, 1, 1], [], []>} : vector<8x8xbf16>, vector<8x128xbf16>, vector<8x128xf32> -> vector<8x128xf32>
    %132 = vector.broadcast %112 : vector<1x128xf32> to vector<8x128xf32>
    %133 = arith.mulf %132, %131 : vector<8x128xf32>
    %134 = arith.addf %104, %133 : vector<8x128xf32>
    %c96_i32_56 = arith.constant 96 : i32
    %135 = vector.broadcast %c96_i32_56 : i32 to vector<1x128xi32>
    %136 = arith.cmpi sge, %43, %135 : vector<1x128xi32>
    %c128_i32 = arith.constant 128 : i32
    %137 = vector.broadcast %c128_i32 : i32 to vector<1x128xi32>
    %138 = arith.cmpi slt, %43, %137 : vector<1x128xi32>
    %139 = arith.andi %136, %138 : vector<1x128xi1>
    %cst_57 = arith.constant 1.000000e+00 : f32
    %cst_58 = arith.constant 0.000000e+00 : f32
    %140 = vector.broadcast %cst_57 : f32 to vector<1x128xf32>
    %141 = vector.broadcast %cst_58 : f32 to vector<1x128xf32>
    %142 = arith.select %139, %140, %141 : vector<1x128xi1>, vector<1x128xf32>
    %143 = vector.broadcast %142 : vector<1x128xf32> to vector<8x128xf32>
    %144 = arith.mulf %31, %143 : vector<8x128xf32>
    %145 = arith.truncf %144 : vector<8x128xf32> to vector<8x128xbf16>
    %cst_59 = arith.constant dense<0.000000e+00> : vector<8x8xf32>
    %146 = tpu.matmul %145, %41, %cst_59 {dimension_numbers = #tpu.dot_dimension_numbers<[1], [1], [0], [0], [0, 0, 1, 0], [], []>} : vector<8x128xbf16>, vector<8x128xbf16>, vector<8x8xf32> -> vector<8x8xf32>
    %cst_60 = arith.constant 0.176776692 : f32
    %147 = vector.broadcast %cst_60 : f32 to vector<8x8xf32>
    %148 = arith.mulf %146, %147 : vector<8x8xf32>
    %149 = arith.addf %148, %19 : vector<8x8xf32>
    %cst_61 = arith.constant dense<0xFF800000> : vector<8xf32>
    %150 = vector.multi_reduction <maximumf>, %149, %cst_61 [1] : vector<8x8xf32> to vector<8xf32>
    %151 = vector.shape_cast %150 : vector<8xf32> to vector<8x1xf32>
    %152 = vector.broadcast %151 : vector<8x1xf32> to vector<8x8xf32>
    %153 = arith.subf %149, %152 : vector<8x8xf32>
    %154 = math.exp %153 : vector<8x8xf32>
    %cst_62 = arith.constant dense<0.000000e+00> : vector<8xf32>
    %155 = vector.multi_reduction <add>, %154, %cst_62 [1] : vector<8x8xf32> to vector<8xf32>
    %156 = vector.shape_cast %155 : vector<8xf32> to vector<8x1xf32>
    %157 = tpu.reciprocal %156 {approx = true} : vector<8x1xf32> -> vector<8x1xf32>
    %158 = vector.broadcast %157 : vector<8x1xf32> to vector<8x8xf32>
    %159 = arith.mulf %154, %158 : vector<8x8xf32>
    %160 = arith.truncf %159 : vector<8x8xf32> to vector<8x8xbf16>
    %cst_63 = arith.constant dense<0.000000e+00> : vector<8x128xf32>
    %161 = tpu.matmul %160, %42, %cst_63 {dimension_numbers = #tpu.dot_dimension_numbers<[1], [0], [0], [1], [0, 0, 1, 1], [], []>} : vector<8x8xbf16>, vector<8x128xbf16>, vector<8x128xf32> -> vector<8x128xf32>
    %162 = vector.broadcast %142 : vector<1x128xf32> to vector<8x128xf32>
    %163 = arith.mulf %162, %161 : vector<8x128xf32>
    %164 = arith.addf %134, %163 : vector<8x128xf32>
    %c0_64 = arith.constant 0 : index
    %c0_65 = arith.constant 0 : index
    %c384 = arith.constant 384 : index
    %165 = vector.load %arg8[%c0_64, %c0_65, %c384] : memref<1x128x512xbf16, #tpu.memory_space<vmem>>, vector<1x128x128xbf16>
    %166 = vector.shape_cast %165 : vector<1x128x128xbf16> to vector<128x128xbf16>
    %167 = arith.truncf %164 : vector<8x128xf32> to vector<8x128xbf16>
    %cst_66 = arith.constant dense<0.000000e+00> : vector<8x128xf32>
    %168 = tpu.matmul %167, %166, %cst_66 {dimension_numbers = #tpu.dot_dimension_numbers<[1], [0], [0], [1], [0, 0, 1, 1], [], []>} : vector<8x128xbf16>, vector<128x128xbf16>, vector<8x128xf32> -> vector<8x128xf32>
    %c0_67 = arith.constant 0 : index
    %c0_68 = arith.constant 0 : index
    %c384_69 = arith.constant 384 : index
    %169 = vector.load %arg9[%c0_67, %c0_68, %c384_69] : memref<1x1x512xf32, #tpu.memory_space<vmem>>, vector<1x1x128xf32>
    %170 = vector.shape_cast %169 : vector<1x1x128xf32> to vector<1x128xf32>
    %171 = vector.broadcast %170 : vector<1x128xf32> to vector<8x128xf32>
    %172 = arith.addf %168, %171 : vector<8x128xf32>
    %173 = arith.addf %3, %172 : vector<8x128xf32>
    %c0_70 = arith.constant 0 : index
    %c0_71 = arith.constant 0 : index
    %c0_72 = arith.constant 0 : index
    %174 = vector.load %arg16[%c0_70, %c0_71, %c0_72] : memref<1x3x128xf32, #tpu.memory_space<vmem>>, vector<1x1x128xf32>
    %175 = vector.shape_cast %174 : vector<1x1x128xf32> to vector<1x128xf32>
    %c0_73 = arith.constant 0 : index
    %c0_74 = arith.constant 0 : index
    %c0_75 = arith.constant 0 : index
    %176 = vector.load %arg17[%c0_73, %c0_74, %c0_75] : memref<1x3x128xf32, #tpu.memory_space<vmem>>, vector<1x1x128xf32>
    %177 = vector.shape_cast %176 : vector<1x1x128xf32> to vector<1x128xf32>
    %cst_76 = arith.constant dense<0.000000e+00> : vector<8xf32>
    %178 = vector.multi_reduction <add>, %173, %cst_76 [1] : vector<8x128xf32> to vector<8xf32>
    %179 = vector.shape_cast %178 : vector<8xf32> to vector<8x1xf32>
    %cst_77 = arith.constant 1.280000e+02 : f32
    %180 = vector.broadcast %cst_77 : f32 to vector<8x1xf32>
    %181 = arith.divf %179, %180 : vector<8x1xf32>
    %182 = vector.broadcast %181 : vector<8x1xf32> to vector<8x128xf32>
    %183 = arith.subf %173, %182 : vector<8x128xf32>
    %184 = arith.mulf %183, %183 : vector<8x128xf32>
    %cst_78 = arith.constant dense<0.000000e+00> : vector<8xf32>
    %185 = vector.multi_reduction <add>, %184, %cst_78 [1] : vector<8x128xf32> to vector<8xf32>
    %186 = vector.shape_cast %185 : vector<8xf32> to vector<8x1xf32>
    %cst_79 = arith.constant 1.280000e+02 : f32
    %187 = vector.broadcast %cst_79 : f32 to vector<8x1xf32>
    %188 = arith.divf %186, %187 : vector<8x1xf32>
    %189 = vector.broadcast %181 : vector<8x1xf32> to vector<8x128xf32>
    %190 = arith.subf %173, %189 : vector<8x128xf32>
    %cst_80 = arith.constant 9.99999974E-6 : f32
    %191 = vector.broadcast %cst_80 : f32 to vector<8x1xf32>
    %192 = arith.addf %188, %191 : vector<8x1xf32>
    %193 = math.rsqrt %192 : vector<8x1xf32>
    %194 = vector.broadcast %193 : vector<8x1xf32> to vector<8x128xf32>
    %195 = arith.mulf %190, %194 : vector<8x128xf32>
    %196 = vector.broadcast %175 : vector<1x128xf32> to vector<8x128xf32>
    %197 = arith.mulf %195, %196 : vector<8x128xf32>
    %198 = vector.broadcast %177 : vector<1x128xf32> to vector<8x128xf32>
    %199 = arith.addf %197, %198 : vector<8x128xf32>
    %200 = arith.addf %199, %7 : vector<8x128xf32>
    %201 = arith.addf %5, %9 : vector<16x128xf32>
    %c0_81 = arith.constant 0 : index
    %c0_82 = arith.constant 0 : index
    %c0_83 = arith.constant 0 : index
    %202 = vector.load %arg10[%c0_81, %c0_82, %c0_83] : memref<1x128x512xbf16, #tpu.memory_space<vmem>>, vector<1x128x128xbf16>
    %203 = vector.shape_cast %202 : vector<1x128x128xbf16> to vector<128x128xbf16>
    %204 = arith.truncf %200 : vector<8x128xf32> to vector<8x128xbf16>
    %cst_84 = arith.constant dense<0.000000e+00> : vector<8x128xf32>
    %205 = tpu.matmul %204, %203, %cst_84 {dimension_numbers = #tpu.dot_dimension_numbers<[1], [0], [0], [1], [0, 0, 1, 1], [], []>} : vector<8x128xbf16>, vector<128x128xbf16>, vector<8x128xf32> -> vector<8x128xf32>
    %c0_85 = arith.constant 0 : index
    %c0_86 = arith.constant 0 : index
    %c0_87 = arith.constant 0 : index
    %206 = vector.load %arg11[%c0_85, %c0_86, %c0_87] : memref<1x1x512xf32, #tpu.memory_space<vmem>>, vector<1x1x128xf32>
    %207 = vector.shape_cast %206 : vector<1x1x128xf32> to vector<1x128xf32>
    %208 = vector.broadcast %207 : vector<1x128xf32> to vector<8x128xf32>
    %209 = arith.addf %205, %208 : vector<8x128xf32>
    %c0_88 = arith.constant 0 : index
    %c0_89 = arith.constant 0 : index
    %c128 = arith.constant 128 : index
    %210 = vector.load %arg10[%c0_88, %c0_89, %c128] : memref<1x128x512xbf16, #tpu.memory_space<vmem>>, vector<1x128x128xbf16>
    %211 = vector.shape_cast %210 : vector<1x128x128xbf16> to vector<128x128xbf16>
    %212 = arith.truncf %201 : vector<16x128xf32> to vector<16x128xbf16>
    %cst_90 = arith.constant dense<0.000000e+00> : vector<16x128xf32>
    %213 = tpu.matmul %212, %211, %cst_90 {dimension_numbers = #tpu.dot_dimension_numbers<[1], [0], [0], [1], [0, 0, 1, 1], [], []>} : vector<16x128xbf16>, vector<128x128xbf16>, vector<16x128xf32> -> vector<16x128xf32>
    %c0_91 = arith.constant 0 : index
    %c0_92 = arith.constant 0 : index
    %c128_93 = arith.constant 128 : index
    %214 = vector.load %arg11[%c0_91, %c0_92, %c128_93] : memref<1x1x512xf32, #tpu.memory_space<vmem>>, vector<1x1x128xf32>
    %215 = vector.shape_cast %214 : vector<1x1x128xf32> to vector<1x128xf32>
    %216 = vector.broadcast %215 : vector<1x128xf32> to vector<16x128xf32>
    %217 = arith.addf %213, %216 : vector<16x128xf32>
    %c0_94 = arith.constant 0 : index
    %c0_95 = arith.constant 0 : index
    %c256_96 = arith.constant 256 : index
    %218 = vector.load %arg10[%c0_94, %c0_95, %c256_96] : memref<1x128x512xbf16, #tpu.memory_space<vmem>>, vector<1x128x128xbf16>
    %219 = vector.shape_cast %218 : vector<1x128x128xbf16> to vector<128x128xbf16>
    %220 = arith.truncf %5 : vector<16x128xf32> to vector<16x128xbf16>
    %cst_97 = arith.constant dense<0.000000e+00> : vector<16x128xf32>
    %221 = tpu.matmul %220, %219, %cst_97 {dimension_numbers = #tpu.dot_dimension_numbers<[1], [0], [0], [1], [0, 0, 1, 1], [], []>} : vector<16x128xbf16>, vector<128x128xbf16>, vector<16x128xf32> -> vector<16x128xf32>
    %c0_98 = arith.constant 0 : index
    %c0_99 = arith.constant 0 : index
    %c256_100 = arith.constant 256 : index
    %222 = vector.load %arg11[%c0_98, %c0_99, %c256_100] : memref<1x1x512xf32, #tpu.memory_space<vmem>>, vector<1x1x128xf32>
    %223 = vector.shape_cast %222 : vector<1x1x128xf32> to vector<1x128xf32>
    %224 = vector.broadcast %223 : vector<1x128xf32> to vector<16x128xf32>
    %225 = arith.addf %221, %224 : vector<16x128xf32>
    %226 = arith.truncf %217 : vector<16x128xf32> to vector<16x128xbf16>
    %227 = arith.truncf %225 : vector<16x128xf32> to vector<16x128xbf16>
    %228 = tpu.iota {dimensions = array<i32: 1>} : vector<1x128xi32>
    %cst_101 = arith.constant 0.000000e+00 : f32
    %229 = vector.broadcast %cst_101 : f32 to vector<8x128xf32>
    %c0_i32_102 = arith.constant 0 : i32
    %230 = vector.broadcast %c0_i32_102 : i32 to vector<1x128xi32>
    %231 = arith.cmpi sge, %228, %230 : vector<1x128xi32>
    %c32_i32_103 = arith.constant 32 : i32
    %232 = vector.broadcast %c32_i32_103 : i32 to vector<1x128xi32>
    %233 = arith.cmpi slt, %228, %232 : vector<1x128xi32>
    %234 = arith.andi %231, %233 : vector<1x128xi1>
    %cst_104 = arith.constant 1.000000e+00 : f32
    %cst_105 = arith.constant 0.000000e+00 : f32
    %235 = vector.broadcast %cst_104 : f32 to vector<1x128xf32>
    %236 = vector.broadcast %cst_105 : f32 to vector<1x128xf32>
    %237 = arith.select %234, %235, %236 : vector<1x128xi1>, vector<1x128xf32>
    %238 = vector.broadcast %237 : vector<1x128xf32> to vector<8x128xf32>
    %239 = arith.mulf %209, %238 : vector<8x128xf32>
    %240 = arith.truncf %239 : vector<8x128xf32> to vector<8x128xbf16>
    %cst_106 = arith.constant dense<0.000000e+00> : vector<8x16xf32>
    %241 = tpu.matmul %240, %226, %cst_106 {dimension_numbers = #tpu.dot_dimension_numbers<[1], [1], [0], [0], [0, 0, 1, 0], [], []>} : vector<8x128xbf16>, vector<16x128xbf16>, vector<8x16xf32> -> vector<8x16xf32>
    %cst_107 = arith.constant 0.176776692 : f32
    %242 = vector.broadcast %cst_107 : f32 to vector<8x16xf32>
    %243 = arith.mulf %241, %242 : vector<8x16xf32>
    %244 = vector.broadcast %21 : vector<1x16xf32> to vector<8x16xf32>
    %245 = arith.addf %243, %244 : vector<8x16xf32>
    %cst_108 = arith.constant dense<0xFF800000> : vector<8xf32>
    %246 = vector.multi_reduction <maximumf>, %245, %cst_108 [1] : vector<8x16xf32> to vector<8xf32>
    %247 = vector.shape_cast %246 : vector<8xf32> to vector<8x1xf32>
    %248 = vector.broadcast %247 : vector<8x1xf32> to vector<8x16xf32>
    %249 = arith.subf %245, %248 : vector<8x16xf32>
    %250 = math.exp %249 : vector<8x16xf32>
    %cst_109 = arith.constant dense<0.000000e+00> : vector<8xf32>
    %251 = vector.multi_reduction <add>, %250, %cst_109 [1] : vector<8x16xf32> to vector<8xf32>
    %252 = vector.shape_cast %251 : vector<8xf32> to vector<8x1xf32>
    %253 = tpu.reciprocal %252 {approx = true} : vector<8x1xf32> -> vector<8x1xf32>
    %254 = vector.broadcast %253 : vector<8x1xf32> to vector<8x16xf32>
    %255 = arith.mulf %250, %254 : vector<8x16xf32>
    %256 = arith.truncf %255 : vector<8x16xf32> to vector<8x16xbf16>
    %cst_110 = arith.constant dense<0.000000e+00> : vector<8x128xf32>
    %257 = tpu.matmul %256, %227, %cst_110 {dimension_numbers = #tpu.dot_dimension_numbers<[1], [0], [0], [1], [0, 0, 1, 1], [], []>} : vector<8x16xbf16>, vector<16x128xbf16>, vector<8x128xf32> -> vector<8x128xf32>
    %258 = vector.broadcast %237 : vector<1x128xf32> to vector<8x128xf32>
    %259 = arith.mulf %258, %257 : vector<8x128xf32>
    %260 = arith.addf %229, %259 : vector<8x128xf32>
    %c32_i32_111 = arith.constant 32 : i32
    %261 = vector.broadcast %c32_i32_111 : i32 to vector<1x128xi32>
    %262 = arith.cmpi sge, %228, %261 : vector<1x128xi32>
    %c64_i32_112 = arith.constant 64 : i32
    %263 = vector.broadcast %c64_i32_112 : i32 to vector<1x128xi32>
    %264 = arith.cmpi slt, %228, %263 : vector<1x128xi32>
    %265 = arith.andi %262, %264 : vector<1x128xi1>
    %cst_113 = arith.constant 1.000000e+00 : f32
    %cst_114 = arith.constant 0.000000e+00 : f32
    %266 = vector.broadcast %cst_113 : f32 to vector<1x128xf32>
    %267 = vector.broadcast %cst_114 : f32 to vector<1x128xf32>
    %268 = arith.select %265, %266, %267 : vector<1x128xi1>, vector<1x128xf32>
    %269 = vector.broadcast %268 : vector<1x128xf32> to vector<8x128xf32>
    %270 = arith.mulf %209, %269 : vector<8x128xf32>
    %271 = arith.truncf %270 : vector<8x128xf32> to vector<8x128xbf16>
    %cst_115 = arith.constant dense<0.000000e+00> : vector<8x16xf32>
    %272 = tpu.matmul %271, %226, %cst_115 {dimension_numbers = #tpu.dot_dimension_numbers<[1], [1], [0], [0], [0, 0, 1, 0], [], []>} : vector<8x128xbf16>, vector<16x128xbf16>, vector<8x16xf32> -> vector<8x16xf32>
    %cst_116 = arith.constant 0.176776692 : f32
    %273 = vector.broadcast %cst_116 : f32 to vector<8x16xf32>
    %274 = arith.mulf %272, %273 : vector<8x16xf32>
    %275 = vector.broadcast %21 : vector<1x16xf32> to vector<8x16xf32>
    %276 = arith.addf %274, %275 : vector<8x16xf32>
    %cst_117 = arith.constant dense<0xFF800000> : vector<8xf32>
    %277 = vector.multi_reduction <maximumf>, %276, %cst_117 [1] : vector<8x16xf32> to vector<8xf32>
    %278 = vector.shape_cast %277 : vector<8xf32> to vector<8x1xf32>
    %279 = vector.broadcast %278 : vector<8x1xf32> to vector<8x16xf32>
    %280 = arith.subf %276, %279 : vector<8x16xf32>
    %281 = math.exp %280 : vector<8x16xf32>
    %cst_118 = arith.constant dense<0.000000e+00> : vector<8xf32>
    %282 = vector.multi_reduction <add>, %281, %cst_118 [1] : vector<8x16xf32> to vector<8xf32>
    %283 = vector.shape_cast %282 : vector<8xf32> to vector<8x1xf32>
    %284 = tpu.reciprocal %283 {approx = true} : vector<8x1xf32> -> vector<8x1xf32>
    %285 = vector.broadcast %284 : vector<8x1xf32> to vector<8x16xf32>
    %286 = arith.mulf %281, %285 : vector<8x16xf32>
    %287 = arith.truncf %286 : vector<8x16xf32> to vector<8x16xbf16>
    %cst_119 = arith.constant dense<0.000000e+00> : vector<8x128xf32>
    %288 = tpu.matmul %287, %227, %cst_119 {dimension_numbers = #tpu.dot_dimension_numbers<[1], [0], [0], [1], [0, 0, 1, 1], [], []>} : vector<8x16xbf16>, vector<16x128xbf16>, vector<8x128xf32> -> vector<8x128xf32>
    %289 = vector.broadcast %268 : vector<1x128xf32> to vector<8x128xf32>
    %290 = arith.mulf %289, %288 : vector<8x128xf32>
    %291 = arith.addf %260, %290 : vector<8x128xf32>
    %c64_i32_120 = arith.constant 64 : i32
    %292 = vector.broadcast %c64_i32_120 : i32 to vector<1x128xi32>
    %293 = arith.cmpi sge, %228, %292 : vector<1x128xi32>
    %c96_i32_121 = arith.constant 96 : i32
    %294 = vector.broadcast %c96_i32_121 : i32 to vector<1x128xi32>
    %295 = arith.cmpi slt, %228, %294 : vector<1x128xi32>
    %296 = arith.andi %293, %295 : vector<1x128xi1>
    %cst_122 = arith.constant 1.000000e+00 : f32
    %cst_123 = arith.constant 0.000000e+00 : f32
    %297 = vector.broadcast %cst_122 : f32 to vector<1x128xf32>
    %298 = vector.broadcast %cst_123 : f32 to vector<1x128xf32>
    %299 = arith.select %296, %297, %298 : vector<1x128xi1>, vector<1x128xf32>
    %300 = vector.broadcast %299 : vector<1x128xf32> to vector<8x128xf32>
    %301 = arith.mulf %209, %300 : vector<8x128xf32>
    %302 = arith.truncf %301 : vector<8x128xf32> to vector<8x128xbf16>
    %cst_124 = arith.constant dense<0.000000e+00> : vector<8x16xf32>
    %303 = tpu.matmul %302, %226, %cst_124 {dimension_numbers = #tpu.dot_dimension_numbers<[1], [1], [0], [0], [0, 0, 1, 0], [], []>} : vector<8x128xbf16>, vector<16x128xbf16>, vector<8x16xf32> -> vector<8x16xf32>
    %cst_125 = arith.constant 0.176776692 : f32
    %304 = vector.broadcast %cst_125 : f32 to vector<8x16xf32>
    %305 = arith.mulf %303, %304 : vector<8x16xf32>
    %306 = vector.broadcast %21 : vector<1x16xf32> to vector<8x16xf32>
    %307 = arith.addf %305, %306 : vector<8x16xf32>
    %cst_126 = arith.constant dense<0xFF800000> : vector<8xf32>
    %308 = vector.multi_reduction <maximumf>, %307, %cst_126 [1] : vector<8x16xf32> to vector<8xf32>
    %309 = vector.shape_cast %308 : vector<8xf32> to vector<8x1xf32>
    %310 = vector.broadcast %309 : vector<8x1xf32> to vector<8x16xf32>
    %311 = arith.subf %307, %310 : vector<8x16xf32>
    %312 = math.exp %311 : vector<8x16xf32>
    %cst_127 = arith.constant dense<0.000000e+00> : vector<8xf32>
    %313 = vector.multi_reduction <add>, %312, %cst_127 [1] : vector<8x16xf32> to vector<8xf32>
    %314 = vector.shape_cast %313 : vector<8xf32> to vector<8x1xf32>
    %315 = tpu.reciprocal %314 {approx = true} : vector<8x1xf32> -> vector<8x1xf32>
    %316 = vector.broadcast %315 : vector<8x1xf32> to vector<8x16xf32>
    %317 = arith.mulf %312, %316 : vector<8x16xf32>
    %318 = arith.truncf %317 : vector<8x16xf32> to vector<8x16xbf16>
    %cst_128 = arith.constant dense<0.000000e+00> : vector<8x128xf32>
    %319 = tpu.matmul %318, %227, %cst_128 {dimension_numbers = #tpu.dot_dimension_numbers<[1], [0], [0], [1], [0, 0, 1, 1], [], []>} : vector<8x16xbf16>, vector<16x128xbf16>, vector<8x128xf32> -> vector<8x128xf32>
    %320 = vector.broadcast %299 : vector<1x128xf32> to vector<8x128xf32>
    %321 = arith.mulf %320, %319 : vector<8x128xf32>
    %322 = arith.addf %291, %321 : vector<8x128xf32>
    %c96_i32_129 = arith.constant 96 : i32
    %323 = vector.broadcast %c96_i32_129 : i32 to vector<1x128xi32>
    %324 = arith.cmpi sge, %228, %323 : vector<1x128xi32>
    %c128_i32_130 = arith.constant 128 : i32
    %325 = vector.broadcast %c128_i32_130 : i32 to vector<1x128xi32>
    %326 = arith.cmpi slt, %228, %325 : vector<1x128xi32>
    %327 = arith.andi %324, %326 : vector<1x128xi1>
    %cst_131 = arith.constant 1.000000e+00 : f32
    %cst_132 = arith.constant 0.000000e+00 : f32
    %328 = vector.broadcast %cst_131 : f32 to vector<1x128xf32>
    %329 = vector.broadcast %cst_132 : f32 to vector<1x128xf32>
    %330 = arith.select %327, %328, %329 : vector<1x128xi1>, vector<1x128xf32>
    %331 = vector.broadcast %330 : vector<1x128xf32> to vector<8x128xf32>
    %332 = arith.mulf %209, %331 : vector<8x128xf32>
    %333 = arith.truncf %332 : vector<8x128xf32> to vector<8x128xbf16>
    %cst_133 = arith.constant dense<0.000000e+00> : vector<8x16xf32>
    %334 = tpu.matmul %333, %226, %cst_133 {dimension_numbers = #tpu.dot_dimension_numbers<[1], [1], [0], [0], [0, 0, 1, 0], [], []>} : vector<8x128xbf16>, vector<16x128xbf16>, vector<8x16xf32> -> vector<8x16xf32>
    %cst_134 = arith.constant 0.176776692 : f32
    %335 = vector.broadcast %cst_134 : f32 to vector<8x16xf32>
    %336 = arith.mulf %334, %335 : vector<8x16xf32>
    %337 = vector.broadcast %21 : vector<1x16xf32> to vector<8x16xf32>
    %338 = arith.addf %336, %337 : vector<8x16xf32>
    %cst_135 = arith.constant dense<0xFF800000> : vector<8xf32>
    %339 = vector.multi_reduction <maximumf>, %338, %cst_135 [1] : vector<8x16xf32> to vector<8xf32>
    %340 = vector.shape_cast %339 : vector<8xf32> to vector<8x1xf32>
    %341 = vector.broadcast %340 : vector<8x1xf32> to vector<8x16xf32>
    %342 = arith.subf %338, %341 : vector<8x16xf32>
    %343 = math.exp %342 : vector<8x16xf32>
    %cst_136 = arith.constant dense<0.000000e+00> : vector<8xf32>
    %344 = vector.multi_reduction <add>, %343, %cst_136 [1] : vector<8x16xf32> to vector<8xf32>
    %345 = vector.shape_cast %344 : vector<8xf32> to vector<8x1xf32>
    %346 = tpu.reciprocal %345 {approx = true} : vector<8x1xf32> -> vector<8x1xf32>
    %347 = vector.broadcast %346 : vector<8x1xf32> to vector<8x16xf32>
    %348 = arith.mulf %343, %347 : vector<8x16xf32>
    %349 = arith.truncf %348 : vector<8x16xf32> to vector<8x16xbf16>
    %cst_137 = arith.constant dense<0.000000e+00> : vector<8x128xf32>
    %350 = tpu.matmul %349, %227, %cst_137 {dimension_numbers = #tpu.dot_dimension_numbers<[1], [0], [0], [1], [0, 0, 1, 1], [], []>} : vector<8x16xbf16>, vector<16x128xbf16>, vector<8x128xf32> -> vector<8x128xf32>
    %351 = vector.broadcast %330 : vector<1x128xf32> to vector<8x128xf32>
    %352 = arith.mulf %351, %350 : vector<8x128xf32>
    %353 = arith.addf %322, %352 : vector<8x128xf32>
    %c0_138 = arith.constant 0 : index
    %c0_139 = arith.constant 0 : index
    %c384_140 = arith.constant 384 : index
    %354 = vector.load %arg10[%c0_138, %c0_139, %c384_140] : memref<1x128x512xbf16, #tpu.memory_space<vmem>>, vector<1x128x128xbf16>
    %355 = vector.shape_cast %354 : vector<1x128x128xbf16> to vector<128x128xbf16>
    %356 = arith.truncf %353 : vector<8x128xf32> to vector<8x128xbf16>
    %cst_141 = arith.constant dense<0.000000e+00> : vector<8x128xf32>
    %357 = tpu.matmul %356, %355, %cst_141 {dimension_numbers = #tpu.dot_dimension_numbers<[1], [0], [0], [1], [0, 0, 1, 1], [], []>} : vector<8x128xbf16>, vector<128x128xbf16>, vector<8x128xf32> -> vector<8x128xf32>
    %c0_142 = arith.constant 0 : index
    %c0_143 = arith.constant 0 : index
    %c384_144 = arith.constant 384 : index
    %358 = vector.load %arg11[%c0_142, %c0_143, %c384_144] : memref<1x1x512xf32, #tpu.memory_space<vmem>>, vector<1x1x128xf32>
    %359 = vector.shape_cast %358 : vector<1x1x128xf32> to vector<1x128xf32>
    %360 = vector.broadcast %359 : vector<1x128xf32> to vector<8x128xf32>
    %361 = arith.addf %357, %360 : vector<8x128xf32>
    %362 = arith.addf %199, %361 : vector<8x128xf32>
    %c0_145 = arith.constant 0 : index
    %c1 = arith.constant 1 : index
    %c0_146 = arith.constant 0 : index
    %363 = vector.load %arg16[%c0_145, %c1, %c0_146] : memref<1x3x128xf32, #tpu.memory_space<vmem>>, vector<1x1x128xf32>
    %364 = vector.shape_cast %363 : vector<1x1x128xf32> to vector<1x128xf32>
    %c0_147 = arith.constant 0 : index
    %c1_148 = arith.constant 1 : index
    %c0_149 = arith.constant 0 : index
    %365 = vector.load %arg17[%c0_147, %c1_148, %c0_149] : memref<1x3x128xf32, #tpu.memory_space<vmem>>, vector<1x1x128xf32>
    %366 = vector.shape_cast %365 : vector<1x1x128xf32> to vector<1x128xf32>
    %cst_150 = arith.constant dense<0.000000e+00> : vector<8xf32>
    %367 = vector.multi_reduction <add>, %362, %cst_150 [1] : vector<8x128xf32> to vector<8xf32>
    %368 = vector.shape_cast %367 : vector<8xf32> to vector<8x1xf32>
    %cst_151 = arith.constant 1.280000e+02 : f32
    %369 = vector.broadcast %cst_151 : f32 to vector<8x1xf32>
    %370 = arith.divf %368, %369 : vector<8x1xf32>
    %371 = vector.broadcast %370 : vector<8x1xf32> to vector<8x128xf32>
    %372 = arith.subf %362, %371 : vector<8x128xf32>
    %373 = arith.mulf %372, %372 : vector<8x128xf32>
    %cst_152 = arith.constant dense<0.000000e+00> : vector<8xf32>
    %374 = vector.multi_reduction <add>, %373, %cst_152 [1] : vector<8x128xf32> to vector<8xf32>
    %375 = vector.shape_cast %374 : vector<8xf32> to vector<8x1xf32>
    %cst_153 = arith.constant 1.280000e+02 : f32
    %376 = vector.broadcast %cst_153 : f32 to vector<8x1xf32>
    %377 = arith.divf %375, %376 : vector<8x1xf32>
    %378 = vector.broadcast %370 : vector<8x1xf32> to vector<8x128xf32>
    %379 = arith.subf %362, %378 : vector<8x128xf32>
    %cst_154 = arith.constant 9.99999974E-6 : f32
    %380 = vector.broadcast %cst_154 : f32 to vector<8x1xf32>
    %381 = arith.addf %377, %380 : vector<8x1xf32>
    %382 = math.rsqrt %381 : vector<8x1xf32>
    %383 = vector.broadcast %382 : vector<8x1xf32> to vector<8x128xf32>
    %384 = arith.mulf %379, %383 : vector<8x128xf32>
    %385 = vector.broadcast %364 : vector<1x128xf32> to vector<8x128xf32>
    %386 = arith.mulf %384, %385 : vector<8x128xf32>
    %387 = vector.broadcast %366 : vector<1x128xf32> to vector<8x128xf32>
    %388 = arith.addf %386, %387 : vector<8x128xf32>
    %389 = arith.truncf %388 : vector<8x128xf32> to vector<8x128xbf16>
    %c0_155 = arith.constant 0 : index
    %c0_156 = arith.constant 0 : index
    %c0_157 = arith.constant 0 : index
    %390 = vector.load %arg12[%c0_155, %c0_156, %c0_157] : memref<1x128x256xbf16, #tpu.memory_space<vmem>>, vector<1x128x256xbf16>
    %391 = vector.shape_cast %390 : vector<1x128x256xbf16> to vector<128x256xbf16>
    %cst_158 = arith.constant dense<0.000000e+00> : vector<8x256xf32>
    %392 = tpu.matmul %389, %391, %cst_158 {dimension_numbers = #tpu.dot_dimension_numbers<[1], [0], [0], [1], [0, 0, 1, 1], [], []>} : vector<8x128xbf16>, vector<128x256xbf16>, vector<8x256xf32> -> vector<8x256xf32>
    %c0_159 = arith.constant 0 : index
    %c0_160 = arith.constant 0 : index
    %c0_161 = arith.constant 0 : index
    %393 = vector.load %arg13[%c0_159, %c0_160, %c0_161] : memref<1x1x256xf32, #tpu.memory_space<vmem>>, vector<1x1x256xf32>
    %394 = vector.shape_cast %393 : vector<1x1x256xf32> to vector<1x256xf32>
    %395 = vector.broadcast %394 : vector<1x256xf32> to vector<8x256xf32>
    %396 = arith.addf %392, %395 : vector<8x256xf32>
    %cst_162 = arith.constant 0.000000e+00 : f32
    %397 = vector.broadcast %cst_162 : f32 to vector<8x256xf32>
    %398 = arith.maximumf %396, %397 : vector<8x256xf32>
    %399 = arith.truncf %398 : vector<8x256xf32> to vector<8x256xbf16>
    %c0_163 = arith.constant 0 : index
    %c0_164 = arith.constant 0 : index
    %c0_165 = arith.constant 0 : index
    %400 = vector.load %arg14[%c0_163, %c0_164, %c0_165] : memref<1x256x128xbf16, #tpu.memory_space<vmem>>, vector<1x256x128xbf16>
    %401 = vector.shape_cast %400 : vector<1x256x128xbf16> to vector<256x128xbf16>
    %cst_166 = arith.constant dense<0.000000e+00> : vector<8x128xf32>
    %402 = tpu.matmul %399, %401, %cst_166 {dimension_numbers = #tpu.dot_dimension_numbers<[1], [0], [0], [1], [0, 0, 1, 1], [], []>} : vector<8x256xbf16>, vector<256x128xbf16>, vector<8x128xf32> -> vector<8x128xf32>
    %c0_167 = arith.constant 0 : index
    %c0_168 = arith.constant 0 : index
    %c0_169 = arith.constant 0 : index
    %403 = vector.load %arg15[%c0_167, %c0_168, %c0_169] : memref<1x1x128xf32, #tpu.memory_space<vmem>>, vector<1x1x128xf32>
    %404 = vector.shape_cast %403 : vector<1x1x128xf32> to vector<1x128xf32>
    %405 = vector.broadcast %404 : vector<1x128xf32> to vector<8x128xf32>
    %406 = arith.addf %402, %405 : vector<8x128xf32>
    %407 = arith.addf %388, %406 : vector<8x128xf32>
    %c0_170 = arith.constant 0 : index
    %c2 = arith.constant 2 : index
    %c0_171 = arith.constant 0 : index
    %408 = vector.load %arg16[%c0_170, %c2, %c0_171] : memref<1x3x128xf32, #tpu.memory_space<vmem>>, vector<1x1x128xf32>
    %409 = vector.shape_cast %408 : vector<1x1x128xf32> to vector<1x128xf32>
    %c0_172 = arith.constant 0 : index
    %c2_173 = arith.constant 2 : index
    %c0_174 = arith.constant 0 : index
    %410 = vector.load %arg17[%c0_172, %c2_173, %c0_174] : memref<1x3x128xf32, #tpu.memory_space<vmem>>, vector<1x1x128xf32>
    %411 = vector.shape_cast %410 : vector<1x1x128xf32> to vector<1x128xf32>
    %cst_175 = arith.constant dense<0.000000e+00> : vector<8xf32>
    %412 = vector.multi_reduction <add>, %407, %cst_175 [1] : vector<8x128xf32> to vector<8xf32>
    %413 = vector.shape_cast %412 : vector<8xf32> to vector<8x1xf32>
    %cst_176 = arith.constant 1.280000e+02 : f32
    %414 = vector.broadcast %cst_176 : f32 to vector<8x1xf32>
    %415 = arith.divf %413, %414 : vector<8x1xf32>
    %416 = vector.broadcast %415 : vector<8x1xf32> to vector<8x128xf32>
    %417 = arith.subf %407, %416 : vector<8x128xf32>
    %418 = arith.mulf %417, %417 : vector<8x128xf32>
    %cst_177 = arith.constant dense<0.000000e+00> : vector<8xf32>
    %419 = vector.multi_reduction <add>, %418, %cst_177 [1] : vector<8x128xf32> to vector<8xf32>
    %420 = vector.shape_cast %419 : vector<8xf32> to vector<8x1xf32>
    %cst_178 = arith.constant 1.280000e+02 : f32
    %421 = vector.broadcast %cst_178 : f32 to vector<8x1xf32>
    %422 = arith.divf %420, %421 : vector<8x1xf32>
    %423 = vector.broadcast %415 : vector<8x1xf32> to vector<8x128xf32>
    %424 = arith.subf %407, %423 : vector<8x128xf32>
    %cst_179 = arith.constant 9.99999974E-6 : f32
    %425 = vector.broadcast %cst_179 : f32 to vector<8x1xf32>
    %426 = arith.addf %422, %425 : vector<8x1xf32>
    %427 = math.rsqrt %426 : vector<8x1xf32>
    %428 = vector.broadcast %427 : vector<8x1xf32> to vector<8x128xf32>
    %429 = arith.mulf %424, %428 : vector<8x128xf32>
    %430 = vector.broadcast %409 : vector<1x128xf32> to vector<8x128xf32>
    %431 = arith.mulf %429, %430 : vector<8x128xf32>
    %432 = vector.broadcast %411 : vector<1x128xf32> to vector<8x128xf32>
    %433 = arith.addf %431, %432 : vector<8x128xf32>
    %c0_180 = arith.constant 0 : index
    %c0_181 = arith.constant 0 : index
    %434 = vector.load %arg21[%c0_180, %c0_181] : memref<8x128xf32, #tpu.memory_space<vmem>>, vector<8x128xf32>
    tpu.vector_store %arg21[%c0_180, %c0_181], %433 {strides = array<i32>} : memref<8x128xf32, #tpu.memory_space<vmem>>, vector<8x128xf32>,
    %c1_i32 = arith.constant 1 : i32
    %435 = arith.cmpi eq, %arg1, %c1_i32 : i32
    %436 = arith.extui %435 : i1 to i32
    %c0_i32_182 = arith.constant 0 : i32
    %437 = arith.cmpi ne, %436, %c0_i32_182 : i32
    scf.if %437 {
      %c0_183 = arith.constant 0 : index
      %c0_184 = arith.constant 0 : index
      %438 = vector.load %arg18[%c0_183, %c0_184] : memref<1x128xf32, #tpu.memory_space<vmem>>, vector<1x128xf32>
      %c0_185 = arith.constant 0 : index
      %c0_186 = arith.constant 0 : index
      %439 = vector.load %arg19[%c0_185, %c0_186] : memref<1x128xf32, #tpu.memory_space<vmem>>, vector<1x128xf32>
      %cst_187 = arith.constant dense<0.000000e+00> : vector<8xf32>
      %440 = vector.multi_reduction <add>, %433, %cst_187 [1] : vector<8x128xf32> to vector<8xf32>
      %441 = vector.shape_cast %440 : vector<8xf32> to vector<8x1xf32>
      %cst_188 = arith.constant 1.280000e+02 : f32
      %442 = vector.broadcast %cst_188 : f32 to vector<8x1xf32>
      %443 = arith.divf %441, %442 : vector<8x1xf32>
      %444 = vector.broadcast %443 : vector<8x1xf32> to vector<8x128xf32>
      %445 = arith.subf %433, %444 : vector<8x128xf32>
      %446 = arith.mulf %445, %445 : vector<8x128xf32>
      %cst_189 = arith.constant dense<0.000000e+00> : vector<8xf32>
      %447 = vector.multi_reduction <add>, %446, %cst_189 [1] : vector<8x128xf32> to vector<8xf32>
      %448 = vector.shape_cast %447 : vector<8xf32> to vector<8x1xf32>
      %cst_190 = arith.constant 1.280000e+02 : f32
      %449 = vector.broadcast %cst_190 : f32 to vector<8x1xf32>
      %450 = arith.divf %448, %449 : vector<8x1xf32>
      %451 = vector.broadcast %443 : vector<8x1xf32> to vector<8x128xf32>
      %452 = arith.subf %433, %451 : vector<8x128xf32>
      %cst_191 = arith.constant 9.99999974E-6 : f32
      %453 = vector.broadcast %cst_191 : f32 to vector<8x1xf32>
      %454 = arith.addf %450, %453 : vector<8x1xf32>
      %455 = math.rsqrt %454 : vector<8x1xf32>
      %456 = vector.broadcast %455 : vector<8x1xf32> to vector<8x128xf32>
      %457 = arith.mulf %452, %456 : vector<8x128xf32>
      %458 = vector.broadcast %438 : vector<1x128xf32> to vector<8x128xf32>
      %459 = arith.mulf %457, %458 : vector<8x128xf32>
      %460 = vector.broadcast %439 : vector<1x128xf32> to vector<8x128xf32>
      %461 = arith.addf %459, %460 : vector<8x128xf32>
      %c0_192 = arith.constant 0 : index
      %c0_193 = arith.constant 0 : index
      %c0_194 = arith.constant 0 : index
      %462 = vector.load %arg20[%c0_192, %c0_193, %c0_194] : memref<1x8x128xf32, #tpu.memory_space<vmem>>, vector<1x8x128xf32>
      %463 = vector.shape_cast %462 : vector<1x8x128xf32> to vector<8x128xf32>
      %464 = vector.shape_cast %461 : vector<8x128xf32> to vector<1x8x128xf32>
      tpu.vector_store %arg20[%c0_192, %c0_193, %c0_194], %464 {strides = array<i32>} : memref<1x8x128xf32, #tpu.memory_space<vmem>>, vector<1x8x128xf32>,
    } else {
    }
    return
  }
  func.func @transform_0(%arg0: i32, %arg1: i32) -> (i32, i32, i32) {
    %c0_i32 = arith.constant 0 : i32
    %c0_i32_0 = arith.constant 0 : i32
    %c0_i32_1 = arith.constant 0 : i32
    return %arg0, %c0_i32, %c0_i32_0 : i32, i32, i32
  }
  func.func @transform_1(%arg0: i32, %arg1: i32) -> (i32, i32, i32) {
    %c0_i32 = arith.constant 0 : i32
    %c0_i32_0 = arith.constant 0 : i32
    %c0_i32_1 = arith.constant 0 : i32
    return %arg0, %c0_i32, %c0_i32_0 : i32, i32, i32
  }
  func.func @transform_2(%arg0: i32, %arg1: i32) -> (i32, i32, i32) {
    %c0_i32 = arith.constant 0 : i32
    %c0_i32_0 = arith.constant 0 : i32
    %c0_i32_1 = arith.constant 0 : i32
    return %arg0, %c0_i32, %c0_i32_0 : i32, i32, i32
  }
  func.func @transform_3(%arg0: i32, %arg1: i32) -> (i32, i32, i32) {
    %c0_i32 = arith.constant 0 : i32
    %c0_i32_0 = arith.constant 0 : i32
    %c0_i32_1 = arith.constant 0 : i32
    return %arg0, %c0_i32, %c0_i32_0 : i32, i32, i32
  }
  func.func @transform_4(%arg0: i32, %arg1: i32) -> (i32, i32, i32) {
    %c0_i32 = arith.constant 0 : i32
    %c0_i32_0 = arith.constant 0 : i32
    %c0_i32_1 = arith.constant 0 : i32
    return %arg0, %c0_i32, %c0_i32_0 : i32, i32, i32
  }
  func.func @transform_5(%arg0: i32, %arg1: i32) -> (i32, i32, i32) {
    %c0_i32 = arith.constant 0 : i32
    %c0_i32_0 = arith.constant 0 : i32
    %c0_i32_1 = arith.constant 0 : i32
    return %arg0, %c0_i32, %c0_i32_0 : i32, i32, i32
  }
  func.func @transform_6(%arg0: i32, %arg1: i32) -> (i32, i32, i32) {
    %c0_i32 = arith.constant 0 : i32
    %c0_i32_0 = arith.constant 0 : i32
    %c0_i32_1 = arith.constant 0 : i32
    return %arg1, %c0_i32, %c0_i32_0 : i32, i32, i32
  }
  func.func @transform_7(%arg0: i32, %arg1: i32) -> (i32, i32, i32) {
    %c0_i32 = arith.constant 0 : i32
    %c0_i32_0 = arith.constant 0 : i32
    %c0_i32_1 = arith.constant 0 : i32
    return %arg1, %c0_i32, %c0_i32_0 : i32, i32, i32
  }
  func.func @transform_8(%arg0: i32, %arg1: i32) -> (i32, i32, i32) {
    %c0_i32 = arith.constant 0 : i32
    %c0_i32_0 = arith.constant 0 : i32
    %c0_i32_1 = arith.constant 0 : i32
    return %arg1, %c0_i32, %c0_i32_0 : i32, i32, i32
  }
  func.func @transform_9(%arg0: i32, %arg1: i32) -> (i32, i32, i32) {
    %c0_i32 = arith.constant 0 : i32
    %c0_i32_0 = arith.constant 0 : i32
    %c0_i32_1 = arith.constant 0 : i32
    return %arg1, %c0_i32, %c0_i32_0 : i32, i32, i32
  }
  func.func @transform_10(%arg0: i32, %arg1: i32) -> (i32, i32, i32) {
    %c0_i32 = arith.constant 0 : i32
    %c0_i32_0 = arith.constant 0 : i32
    %c0_i32_1 = arith.constant 0 : i32
    return %arg1, %c0_i32, %c0_i32_0 : i32, i32, i32
  }
  func.func @transform_11(%arg0: i32, %arg1: i32) -> (i32, i32, i32) {
    %c0_i32 = arith.constant 0 : i32
    %c0_i32_0 = arith.constant 0 : i32
    %c0_i32_1 = arith.constant 0 : i32
    return %arg1, %c0_i32, %c0_i32_0 : i32, i32, i32
  }
  func.func @transform_12(%arg0: i32, %arg1: i32) -> (i32, i32, i32) {
    %c0_i32 = arith.constant 0 : i32
    %c0_i32_0 = arith.constant 0 : i32
    %c0_i32_1 = arith.constant 0 : i32
    return %arg1, %c0_i32, %c0_i32_0 : i32, i32, i32
  }
  func.func @transform_13(%arg0: i32, %arg1: i32) -> (i32, i32, i32) {
    %c0_i32 = arith.constant 0 : i32
    %c0_i32_0 = arith.constant 0 : i32
    %c0_i32_1 = arith.constant 0 : i32
    return %arg1, %c0_i32, %c0_i32_0 : i32, i32, i32
  }
  func.func @transform_14(%arg0: i32, %arg1: i32) -> (i32, i32, i32) {
    %c0_i32 = arith.constant 0 : i32
    %c0_i32_0 = arith.constant 0 : i32
    %c0_i32_1 = arith.constant 0 : i32
    return %arg1, %c0_i32, %c0_i32_0 : i32, i32, i32
  }
  func.func @transform_15(%arg0: i32, %arg1: i32) -> (i32, i32, i32) {
    %c0_i32 = arith.constant 0 : i32
    %c0_i32_0 = arith.constant 0 : i32
    %c0_i32_1 = arith.constant 0 : i32
    return %arg1, %c0_i32, %c0_i32_0 : i32, i32, i32
  }
  func.func @transform_16(%arg0: i32, %arg1: i32) -> (i32, i32) {
    %c0_i32 = arith.constant 0 : i32
    %c0_i32_0 = arith.constant 0 : i32
    %c0_i32_1 = arith.constant 0 : i32
    return %c0_i32, %c0_i32_0 : i32, i32
  }
  func.func @transform_17(%arg0: i32, %arg1: i32) -> (i32, i32) {
    %c0_i32 = arith.constant 0 : i32
    %c0_i32_0 = arith.constant 0 : i32
    %c0_i32_1 = arith.constant 0 : i32
    return %c0_i32, %c0_i32_0 : i32, i32
  }
  func.func @transform_18(%arg0: i32, %arg1: i32) -> (i32, i32, i32) {
    %c0_i32 = arith.constant 0 : i32
    %c0_i32_0 = arith.constant 0 : i32
    %c0_i32_1 = arith.constant 0 : i32
    return %arg0, %c0_i32, %c0_i32_0 : i32, i32, i32
  }
}

</mosaic_0001>

<bundles_post_ra>
// kernel: transformer_decoder_forward.1
= control target key start
LH: loop header
LB: loop body
LE: loop exit
PB: predicated region body
PF: predicated region fallthrough
CT: control target
= control target key end

     0   :  { %s5878_s0 = inlined_call_operand.vmem [shape: f32[2,8,128], index: 0, kind: input, shape index: {}]   ;;  %s5879_s1 = inlined_call_operand.vmem [shape: f32[2,16,128], index: 1, kind: input, shape index: {}]   ;;  %s5880_s2 = inlined_call_operand.vmem [shape: f32[2,8,128], index: 2, kind: input, shape index: {}]   ;;  %s5881_s3 = inlined_call_operand.vmem [shape: f32[2,16,128], index: 3, kind: input, shape index: {}]   ;;  %s5882_s4 = inlined_call_operand.vmem [shape: f32[2,1,8], index: 4, kind: input, shape index: {}]   ;;  %s5883_s5 = inlined_call_operand.vmem [shape: f32[2,1,16], index: 5, kind: input, shape index: {}]   ;;  %s5884_s6 = inlined_call_operand.hbm [shape: bf16[2,128,512], index: 6, kind: input, shape index: {}]   ;;  %s5885_s7 = inlined_call_operand.hbm [shape: f32[2,1,512], index: 7, kind: input, shape index: {}]   ;;  %s5886_s8 = inlined_call_operand.hbm [shape: bf16[2,128,512], index: 8, kind: input, shape index: {}]   ;;  %s5887_s9 = inlined_call_operand.hbm [shape: f32[2,1,512], index: 9, kind: input, shape index: {}]   ;;  %s5888_s10 = inlined_call_operand.hbm [shape: bf16[2,128,256], index: 10, kind: input, shape index: {}]   ;;  %s5889_s11 = inlined_call_operand.hbm [shape: f32[2,1,256], index: 11, kind: input, shape index: {}]   ;;  %s5890_s12 = inlined_call_operand.hbm [shape: bf16[2,256,128], index: 12, kind: input, shape index: {}]   ;;  %s5891_s13 = inlined_call_operand.hbm [shape: f32[2,1,128], index: 13, kind: input, shape index: {}]   ;;  %s5892_s14 = inlined_call_operand.vmem [shape: f32[2,3,128], index: 14, kind: input, shape index: {}]   ;;  %s5893_s15 = inlined_call_operand.vmem [shape: f32[2,3,128], index: 15, kind: input, shape index: {}]   ;;  %s5894_s16 = inlined_call_operand.hbm [shape: f32[1,128], index: 16, kind: input, shape index: {}]   ;;  %s5895_s17 = inlined_call_operand.hbm [shape: f32[1,128], index: 17, kind: input, shape index: {}]   ;;  %s5896_s18 = inlined_call_operand.hbm [shape: f32[2,8,128], index: 18, kind: output, shape index: {}]  }
   0x1   :  { %5940 = sst [smem:[#allocation52_spill]] %s5878_s0 }
   0x2   :  { %5941 = sst [smem:[#allocation53_spill]] %s5879_s1 }
   0x3   :  { %5942 = sst [smem:[#allocation54_spill]] %s5880_s2 }
   0x4   :  { %5943 = sst [smem:[#allocation55_spill]] %s5881_s3 }
   0x5   :  { %5944 = sst [smem:[#allocation56_spill]] %s5882_s4 }
   0x6   :  { %5945 = sst [smem:[#allocation57_spill]] %s5883_s5 }
   0x7   :  { %5946 = sst [smem:[#allocation58_spill]] %s5884_s6 }
   0x8   :  { %5947 = sst [smem:[#allocation59_spill]] %s5885_s7 }
   0x9   :  { %5948 = sst [smem:[#allocation60_spill]] %s5886_s8 }
   0xa   :  { %5949 = sst [smem:[#allocation61_spill]] %s5887_s9 }
   0xb   :  { %5950 = sst [smem:[#allocation62_spill]] %s5888_s10 }
   0xc   :  { %5951 = sst [smem:[#allocation63_spill]] %s5889_s11 }
   0xd   :  { %5952 = sst [smem:[#allocation64_spill]] %s5890_s12 }
   0xe   :  { %5953 = sst [smem:[#allocation65_spill]] %s5891_s13 }
   0xf   :  { %5954 = sst [smem:[#allocation66_spill]] %s5892_s14 }
  0x10   :  { %5955 = sst [smem:[#allocation67_spill]] %s5893_s15 }
  0x11   :  { %5956 = sst [smem:[#allocation68_spill]] %s5894_s16 }
  0x12   :  { %5957 = sst [smem:[#allocation69_spill]] %s5895_s17 }
  0x13   :  { %5958 = sst [smem:[#allocation70_spill]] %s5896_s18 }
  0x14   :  { %23 = vsyncpa [#allocation4], 0 }
  0x15   :  { %25 = vsyncpa [#allocation4 + $0x1], 0 }
  0x16   :  { %26 = vsyncpa [#allocation7], 0 }
  0x17   :  { %28 = vsyncpa [#allocation7 + $0x1], 0 }
  0x18   :  { %29 = vsyncpa [#allocation10], 0 }
  0x19   :  { %31 = vsyncpa [#allocation10 + $0x1], 0 }
  0x1a   :  { %32 = vsyncpa [#allocation13], 0 }
  0x1b   :  { %34 = vsyncpa [#allocation13 + $0x1], 0 }
  0x1c   :  { %35 = vsyncpa [#allocation16], 0 }
  0x1d   :  { %37 = vsyncpa [#allocation16 + $0x1], 0 }
  0x1e   :  { %38 = vsyncpa [#allocation19], 0 }
  0x1f   :  { %39 = vsyncpa [#allocation5], 0 }
  0x20   :  { %41 = vsyncpa [#allocation5 + $0x1], 0  ;;  %s4895_s27 = smov 0   ;;  %s4897_s28 = smov 0  }
  0x21   :  { %s4899_s29 = smov 0   ;;  %s4901_s30 = smov 0  }
  0x22   :  { %s4903_s0 = smov 0   ;;  %s4905_s19 = smov 0  }
  0x23   :  { %s4907_s1 = smov 0   ;;  %s4909_s20 = smov 0  }
  0x24   :  { %s4911_s21 = smov 0   ;;  %s4913_s22 = smov 0  }
  0x25   :  { %s4915_s2 = smov 0  }
  0x26 LB: > { %5959 = sst [smem:[#allocation29_spill]] %s4738_s27  ;;  %s4949_s23 = sadd.s32 4294967295, %s4778_s2   ;;  %s4778_s2 = sphi %s4915_s2, %s47_s2   ;;  %s4774_s22 = sphi %s4913_s22, %s6063_s22   ;;  %s4770_s21 = sphi %s4911_s21, %s6062_s21   ;;  %s4766_s20 = sphi %s4909_s20, %s6061_s20   ;;  %s4762_s1 = sphi %s4907_s1, %s6060_s1   ;;  %s4758_s19 = sphi %s4905_s19, %s6059_s19   ;;  %s4754_s0 = sphi %s4903_s0, %s6058_s0   ;;  %s4750_s30 = sphi %s4901_s30, %s6057_s30   ;;  %s4746_s29 = sphi %s4899_s29, %s6056_s29   ;;  %s4742_s28 = sphi %s4897_s28, %s6055_s28   ;;  %s4738_s27 = sphi %s4895_s27, %s6054_s27  }
  0x27   : > { %5960 = sst [smem:[#allocation30_spill]] %s4742_s28  ;;  %s3511_s24 = sadd.s32 4294967294, %s4778_s2  }
  0x28   : > { %5961 = sst [smem:[#allocation31_spill]] %s4746_s29  ;;  %p229_p0 = scmp.ne.s32.totalorder %s4758_s19, %s4754_s0 }
  0x29   : > { %5962 = sst [smem:[#allocation32_spill]] %s4754_s0  ;;  %p230_p1 = scmp.eq.s32.totalorder %s4778_s2, 0 }
  0x2a   : > { %5963 = sst [smem:[#allocation33_spill]] %s4758_s19  ;;  %p235_p2 = scmp.ne.s32.totalorder %s4754_s0, %s4750_s30 }
  0x2b   : > { %5964 = sst [smem:[#allocation34_spill]] %s4762_s1  ;;  %p5904_p3 = scmp.eq.s32.totalorder %s4949_s23, 0 }
  0x2c   : > { %5965 = sst [smem:[#allocation35_spill]] %s4766_s20  ;;  %p4959_p4 = por %p230_p1, %p229_p0 }
  0x2d   : > { %5966 = sst [smem:[#allocation36_spill]] %s4770_s21  ;;  %p534_p5 = scmp.ne.s32.totalorder %s4746_s29, %s4742_s28 }
  0x2e   : > { %5967 = sst [smem:[#allocation37_spill]] %s4774_s22  ;;  %p4967_p6 = por %p5904_p3, %p235_p2 }
  0x2f   : > { %5968 = sst [smem:[#allocation38_spill]] %s4778_s2  ;;  %p535_p7 = scmp.eq.s32.totalorder %s4949_s23, 3 }
  0x30   : > { %5969 = sst [smem:[#allocation39_spill]] %s4949_s23  ;;  %p540_p8 = scmp.ne.s32.totalorder %s4742_s28, %s4738_s27 }
  0x31   : > { %s5971_s15 = scalar_select %p4967_p6, 1, 0 }
  0x32   : > { %p541_p9 = scmp.eq.s32.totalorder %s3511_s24, 3  ;;  %p4974_p10 = por %p535_p7, %p534_p5 }
  0x33   : > { %5972 = sst [smem:[#allocation40_spill]] %s5971_s15  ;;  %p3512_p11 = scmp.ge.s32.totalorder %s4778_s2, 1 }
  0x34   : > { %s5973_s30 = scalar_select %p4974_p10, 1, 0 }
  0x35   : > { %p4979_p12 = por %p541_p9, %p540_p8  ;;  %p548_p13 = scmp.lt.s32.totalorder %s4778_s2, 5 }
  0x36   : > { %5974 = sst [smem:[#allocation41_spill]] %s5973_s30  ;;  %s4780_s14 = smov [#allocation17]  }
  0x37   : > { %s5975_s26 = scalar_select %p4979_p12, 1, 0 }
  0x38   : > { %p4984_p0 = pnand %p3512_p11, %p548_p13  ;;  %s561_s5 = sshll.u32 %s4780_s14, 4  ;;  %s562_s5 = int_to_ptr.vmem [resolvable:$true] %s561_s5 }
  0x39   : > { %5976 = sst [smem:[#allocation42_spill]] %s5975_s26  ;;  %p4081_p2 = scmp.lt.s32.totalorder %s4778_s2, 4 }
  0x3a   : > { %s5977_s25 = scalar_select %p4984_p0, 1, 0 }
  0x3b   : > { %p4043_p1 = pneg %p4984_p0  ;;  %p4999_p7 = pnand %p4081_p2, %p4959_p4 }
  0x3c   : > { %s5980_s16 = sld [smem:[#allocation68_spill]] }
  0x3d   : > { %p4993_p5 = pnand %p4043_p1, %p5904_p3 }
  0x3e   : > { %s5979_s26 = scalar_select %p4999_p7, 1, 0 }
  0x3f   : > { %s5978_s24 = scalar_select %p4993_p5, 1, 0 }
  0x40   : > { %p5921_p9 = pneg %p4993_p5 }
  0x42   : > { %s4336_s14 = scalar_lea.hbm %s5980_s16, 16 }
  0x43   : > { %p4337_p8 = scmp.ne.s32.totalorder %s5980_s16, %s4336_s14  ;;  %p4343_p4 = scmp.lt.u32.totalorder %s4336_s14, %s5980_s16 }
  0x45   : > { %p4339_p11 = pnand %p5921_p9, %p4337_p8 }
  0x47   : > { %p4340_p13 = pneg %p4339_p11 }
  0x49   : > { %p4345_p1 = pnand %p4343_p4, %p4340_p13 }
  0x4b   : > { %4348 = shalt.err (!%p4345_p1)
}
  0x4c   : > { %s4349_s20 = scalar_lea.vmem %s562_s5, 16  ;;  %s4356_s3 = scalar_lea.vmem %s562_s5, 32 }
  0x4d   : > { %p4350_p2 = scmp.ne.s32.totalorder %s562_s5, %s4349_s20  ;;  %p4357_p10 = scmp.lt.s32.totalorder %s562_s5, %s562_s5 }
  0x4e   : > { %p4358_p6 = scmp.lt.s32.totalorder %s4356_s3, %s4349_s20 }
  0x4f   : > { %p4352_p3 = pnand %p4350_p2, %p5921_p9 }
  0x50   : > { %p4359_p0 = por %p4358_p6, %p4357_p10 }
  0x51   : > { %p4353_p12 = pneg %p4352_p3 }
  0x53   : > { %p4360_p7 = pnand %p4359_p0, %p4353_p12 }
  0x55   : > { %4363 = shalt.err (!%p4360_p7)
}
  0x56   : > { %4046 = dma.hbm_to_vmem [thread:$0]  (!%p4993_p5), %s5980_s16, 16, %s562_s5, [#allocation16]  }
  0x57   : > { %s56_s1 = sadd.s32 1, %s4770_s21  ;;  %s59_s20 = sadd.s32 1, %s4774_s22 }
  0x58   : > { %p57_p3 = scmp.ge.s32.totalorder %s56_s1, 2  ;;  %s5028_s30 = sand.u32 1, %s4758_s19  }
  0x59   : > { %s5031_s14 = sand.u32 1, %s4778_s2   ;;  %s5920_s5 = sshll.u32 %s4770_s21, 6 }
  0x5a   : > { %s6065_s1 = smov (%p57_p3, %s56_s1), 0  ;;  %s6067_s20 = smov (!%p57_p3, %s59_s20), %s4774_s22 }
  0x5b   : > { %5981 = sst [smem:[#allocation43_spill]] %s6065_s1  ;;  %s219_s3 = ssub.s32 %s4770_s21, %s6065_s1 }
  0x5c   : > { %p61_p6 = scmp.ge.s32.totalorder %s6067_s20, 2  ;;  %p220_p10 = scmp.eq.s32.totalorder %s219_s3, 0 }
  0x5d   : > { %s5983_s4 = sadd.s32 1, %s4758_s19  ;;  %s5985_s7 = sld [smem:[#allocation59_spill]] }
  0x5e   : > { %s6069_s20 = smov (%p61_p6, %s6067_s20), 0  ;;  %s5986_s3 = sshll.u32 %s5028_s30, 2 }
  0x5f   : > { %5982 = sst [smem:[#allocation44_spill]] %s6069_s20  ;;  %s521_s16 = ssub.s32 %s4774_s22, %s6069_s20 }
  0x60   : > { %s5045_s27 = scalar_select %p220_p10, %s4758_s19, %s5983_s4  }
  0x61   : > { %p522_p12 = scmp.eq.s32.totalorder %s521_s16, 0  ;;  %s650_s1 = scalar_lea.vmem [#allocation6], %s5986_s3 }
  0x62   : > { %5984 = sst [smem:[#allocation45_spill]] %s5045_s27  ;;  %s658_s23 = sshll.u32 %s650_s1, 4  ;;  %s5058_s23 = int_to_ptr.vmem [resolvable:$true] %s658_s23 }
  0x63   : > { %s5054_s28 = scalar_lea.hbm %s5985_s7, %s5920_s5  ;;  %s5987_s15 = sadd.s32 1, %s4746_s29 }
  0x64   : > { %s5063_s4 = scalar_select %p522_p12, %s4746_s29, %s5987_s15  }
  0x65   : > { %s5927_s20 = scalar_lea.sflag [#allocation7], %s5031_s14  ;;  %s4364_s22 = scalar_lea.hbm %s5054_s28, 64 }
  0x66   : > { %5988 = sst [smem:[#allocation46_spill]] %s5063_s4  ;;  %p4365_p0 = scmp.ne.s32.totalorder %s5054_s28, %s4364_s22 }
  0x67   : > { %p5989_p7 = scmp.ne.s32.totalorder %s5979_s26, 0  ;;  %s4369_s1 = scalar_lea.hbm %s5985_s7, 128 }
  0x68   : > { %p4370_p4 = scmp.lt.u32.totalorder %s5054_s28, %s5985_s7  ;;  %p4371_p1 = scmp.lt.u32.totalorder %s4369_s1, %s4364_s22 }
  0x69   : > { %p5070_p8 = pneg %p5989_p7  ;;  %p4373_p3 = scmp.lt.u32.totalorder %s4364_s22, %s5054_s28 }
  0x6a   : > { %p4372_p2 = por %p4371_p1, %p4370_p4 }
  0x6b   : > { %s5990_s2 = scalar_select %p5070_p8, 1, 0 }
  0x6c   : > { %p4367_p11 = pnand %p5070_p8, %p4365_p0  ;;  %p4374_p6 = por %p4373_p3, %p4372_p2 }
  0x6e   : > { %p4368_p13 = pneg %p4367_p11 }
  0x70   : > { %p4375_p10 = pnand %p4374_p6, %p4368_p13 }
  0x72   : > { %4378 = shalt.err (!%p4375_p10)
}
  0x73   : > { %s4379_s15 = scalar_lea.vmem %s5058_s23, 64  ;;  %s4781_s16 = smov [#allocation6]  }
  0x74   : > { %p4380_p12 = scmp.ne.s32.totalorder %s5058_s23, %s4379_s15  ;;  %s4384_s18 = sshll.u32 %s4781_s16, 4  ;;  %s4385_s18 = int_to_ptr.vmem [resolvable:$false] %s4384_s18 }
  0x75   : > { %s4386_s5 = scalar_lea.vmem %s4385_s18, 128  ;;  %p4387_p9 = scmp.lt.s32.totalorder %s5058_s23, %s4385_s18 }
  0x76   : > { %p4382_p0 = pnand %p4380_p12, %p5070_p8  ;;  %p4388_p5 = scmp.lt.s32.totalorder %s4386_s5, %s4379_s15 }
  0x78   : > { %p4383_p11 = pneg %p4382_p0  ;;  %p4389_p4 = por %p4388_p5, %p4387_p9 }
  0x7a   : > { %p4390_p1 = pnand %p4389_p4, %p4383_p11 }
  0x7c   : > { %4393 = shalt.err (!%p4390_p1)
}
  0x7d   : > { %4056 = dma.hbm_to_vmem [thread:$0]  (!%p5989_p7), %s5054_s28, 64, %s5058_s23, %s5927_s20  }
  0x7e   : > { %s5991_s22 = sshll.u32 %s4770_s21, 6  ;;  %s5992_s9 = sld [smem:[#allocation61_spill]] }
  0x7f   : > { %s5993_s16 = sshll.u32 %s5028_s30, 2  ;;  %s3531_s7 = sshll.u32 %s5028_s30, 1 }
  0x80   : > { %s690_s18 = scalar_lea.vmem [#allocation9], %s5993_s16  ;;  %s5925_s27 = scalar_lea.sflag [#allocation10], %s5031_s14 }
  0x81   : > { %s698_s5 = sshll.u32 %s690_s18, 4  ;;  %s5104_s5 = int_to_ptr.vmem [resolvable:$true] %s698_s5 }
  0x84   : > { %s5100_s15 = scalar_lea.hbm %s5992_s9, %s5991_s22  ;;  %s4399_s22 = scalar_lea.hbm %s5992_s9, 128 }
  0x85   : > { %s4394_s19 = scalar_lea.hbm %s5100_s15, 64  ;;  %p4400_p2 = scmp.lt.u32.totalorder %s5100_s15, %s5992_s9 }
  0x86   : > { %p4395_p5 = scmp.ne.s32.totalorder %s5100_s15, %s4394_s19  ;;  %p4401_p3 = scmp.lt.u32.totalorder %s4399_s22, %s4394_s19 }
  0x87   : > { %p4403_p10 = scmp.lt.u32.totalorder %s4394_s19, %s5100_s15 }
  0x88   : > { %p4397_p9 = pnand %p4395_p5, %p5070_p8  ;;  %p4402_p6 = por %p4401_p3, %p4400_p2 }
  0x8a   : > { %p4398_p13 = pneg %p4397_p9  ;;  %p4404_p12 = por %p4403_p10, %p4402_p6 }
  0x8c   : > { %p4405_p0 = pnand %p4404_p12, %p4398_p13 }
  0x8e   : > { %4408 = shalt.err (!%p4405_p0)
}
  0x8f   : > { %s4409_s16 = scalar_lea.vmem %s5104_s5, 64  ;;  %s4782_s18 = smov [#allocation9]  }
  0x90   : > { %p4410_p11 = scmp.ne.s32.totalorder %s5104_s5, %s4409_s16  ;;  %s4414_s28 = sshll.u32 %s4782_s18, 4  ;;  %s4415_s28 = int_to_ptr.vmem [resolvable:$false] %s4414_s28 }
  0x91   : > { %s4416_s23 = scalar_lea.vmem %s4415_s28, 128  ;;  %p4417_p5 = scmp.lt.s32.totalorder %s5104_s5, %s4415_s28 }
  0x92   : > { %p4412_p4 = pnand %p4410_p11, %p5070_p8  ;;  %p4418_p9 = scmp.lt.s32.totalorder %s4416_s23, %s4409_s16 }
  0x94   : > { %p4413_p1 = pneg %p4412_p4  ;;  %p4419_p2 = por %p4418_p9, %p4417_p5 }
  0x96   : > { %p4420_p3 = pnand %p4419_p2, %p4413_p1 }
  0x98   : > { %4423 = shalt.err (!%p4420_p3)
}
  0x99   : > { %4062 = dma.hbm_to_vmem [thread:$0]  (!%p5989_p7), %s5100_s15, 64, %s5104_s5, %s5925_s27  }
  0x9a   : > { %s3689_s19 = sshll.u32 %s4770_s21, 5  ;;  %s5994_s11 = sld [smem:[#allocation63_spill]] }
  0x9b   : > { %s730_s16 = scalar_lea.vmem [#allocation12], %s3531_s7  ;;  %s5930_s28 = scalar_lea.sflag [#allocation13], %s5031_s14 }
  0x9c   : > { %s738_s18 = sshll.u32 %s730_s16, 4  ;;  %s739_s18 = int_to_ptr.vmem [resolvable:$true] %s738_s18 }
  0xa0   : > { %s5135_s3 = scalar_lea.hbm %s5994_s11, %s3689_s19  ;;  %s4429_s22 = scalar_lea.hbm %s5994_s11, 64 }
  0xa1   : > { %s4424_s23 = scalar_lea.hbm %s5135_s3, 32  ;;  %p4430_p12 = scmp.lt.u32.totalorder %s5135_s3, %s5994_s11 }
  0xa2   : > { %p4425_p13 = scmp.ne.s32.totalorder %s5135_s3, %s4424_s23  ;;  %p4431_p0 = scmp.lt.u32.totalorder %s4429_s22, %s4424_s23 }
  0xa3   : > { %p4433_p4 = scmp.lt.u32.totalorder %s4424_s23, %s5135_s3 }
  0xa4   : > { %p4427_p6 = pnand %p4425_p13, %p5070_p8  ;;  %p4432_p11 = por %p4431_p0, %p4430_p12 }
  0xa6   : > { %p4428_p10 = pneg %p4427_p6  ;;  %p4434_p1 = por %p4433_p4, %p4432_p11 }
  0xa8   : > { %p4435_p5 = pnand %p4434_p1, %p4428_p10 }
  0xaa   : > { %4438 = shalt.err (!%p4435_p5)
}
  0xab   : > { %s4439_s7 = scalar_lea.vmem %s739_s18, 32  ;;  %s4783_s16 = smov [#allocation12]  }
  0xac   : > { %p4440_p9 = scmp.ne.s32.totalorder %s739_s18, %s4439_s7  ;;  %s4444_s27 = sshll.u32 %s4783_s16, 4  ;;  %s4445_s27 = int_to_ptr.vmem [resolvable:$false] %s4444_s27 }
  0xad   : > { %s4446_s15 = scalar_lea.vmem %s4445_s27, 64  ;;  %p4447_p13 = scmp.lt.s32.totalorder %s739_s18, %s4445_s27 }
  0xae   : > { %p4442_p2 = pnand %p4440_p9, %p5070_p8  ;;  %p4448_p6 = scmp.lt.s32.totalorder %s4446_s15, %s4439_s7 }
  0xb0   : > { %p4443_p3 = pneg %p4442_p2  ;;  %p4449_p7 = por %p4448_p6, %p4447_p13 }
  0xb2   : > { %p4450_p0 = pnand %p4449_p7, %p4443_p3 }
  0xb4   : > { %4453 = shalt.err (!%p4450_p0)
}
  0xb5   : > { %p5995_p12 = scmp.ne.s32.totalorder %s5979_s26, 0  ;;  %s4784_s23 = smov [#allocation18]  }
  0xb6   : > { %s572_s5 = sshll.u32 %s4784_s23, 4  ;;  %s3516_s22 = sshll.u32 %s5028_s30, 8  ;;  %s573_s5 = int_to_ptr.vmem [resolvable:$true] %s572_s5 }
  0xb7   : > { %4068 = dma.hbm_to_vmem [thread:$0]  (!%p5995_p12), %s5135_s3, 32, %s739_s18, %s5930_s28  }
  0xb8   : > { %s5996_s17 = sld [smem:[#allocation69_spill]]  ;;  %p5997_p10 = scmp.ne.s32.totalorder %s5978_s24, 0 }
  0xba   : > { %p5998_p11 = pneg %p5997_p10 }
  0xbe   : > { %s4454_s27 = scalar_lea.hbm %s5996_s17, 16 }
  0xbf   : > { %p4455_p7 = scmp.ne.s32.totalorder %s5996_s17, %s4454_s27  ;;  %p4461_p5 = scmp.lt.u32.totalorder %s4454_s27, %s5996_s17 }
  0xc1   : > { %p4457_p4 = pnand %p4455_p7, %p5998_p11 }
  0xc3   : > { %p4458_p1 = pneg %p4457_p4 }
  0xc5   : > { %p4463_p9 = pnand %p4461_p5, %p4458_p1 }
  0xc7   : > { %4466 = shalt.err (!%p4463_p9)
}
  0xc8   : > { %s4467_s3 = scalar_lea.vmem %s573_s5, 16  ;;  %p5999_p3 = pmov %p5998_p11 }
  0xc9   : > { %p4468_p2 = scmp.ne.s32.totalorder %s573_s5, %s4467_s3  ;;  %s4474_s18 = scalar_lea.vmem %s573_s5, 32 }
  0xca   : > { %p4475_p0 = scmp.lt.s32.totalorder %s573_s5, %s573_s5  ;;  %p4476_p12 = scmp.lt.s32.totalorder %s4474_s18, %s4467_s3 }
  0xcb   : > { %p4470_p13 = pnand %p4468_p2, %p5999_p3 }
  0xcc   : > { %p4477_p8 = por %p4476_p12, %p4475_p0 }
  0xcd   : > { %p4471_p6 = pneg %p4470_p13 }
  0xcf   : > { %p4478_p7 = pnand %p4477_p8, %p4471_p6 }
  0xd1   : > { %4481 = shalt.err (!%p4478_p7)
}
  0xd2   : > { %4049 = dma.hbm_to_vmem [thread:$0]  (!%p5997_p10), %s5996_s17, 16, %s573_s5, [#allocation19]  }
  0xd3   : > { %s3684_s19 = sshll.u32 %s4770_s21, 12  ;;  %s6000_s6 = sld [smem:[#allocation58_spill]] }
  0xd4   : > { %s629_s24 = scalar_lea.vmem [#allocation3], %s3516_s22  ;;  %s626_s15 = scalar_lea.sflag [#allocation4], %s5028_s30 }
  0xd5   : > { %s636_s16 = sshll.u32 %s629_s24, 4  ;;  %p6001_p12 = scmp.ne.s32.totalorder %s5990_s2, 0  ;;  %s5190_s16 = int_to_ptr.vmem [resolvable:$true] %s636_s16 }
  0xd9   : > { %s5186_s7 = scalar_lea.hbm %s6000_s6, %s3684_s19  ;;  %s4487_s23 = scalar_lea.hbm %s6000_s6, 8192 }
  0xda   : > { %s4482_s3 = scalar_lea.hbm %s5186_s7, 4096  ;;  %p4488_p4 = scmp.lt.u32.totalorder %s5186_s7, %s6000_s6 }
  0xdb   : > { %p4483_p8 = scmp.ne.s32.totalorder %s5186_s7, %s4482_s3  ;;  %p4489_p1 = scmp.lt.u32.totalorder %s4487_s23, %s4482_s3 }
  0xdc   : > { %p4491_p9 = scmp.lt.u32.totalorder %s4482_s3, %s5186_s7 }
  0xdd   : > { %p4485_p10 = pnand %p4483_p8, %p6001_p12  ;;  %p4490_p5 = por %p4489_p1, %p4488_p4 }
  0xdf   : > { %p4486_p11 = pneg %p4485_p10  ;;  %p4492_p2 = por %p4491_p9, %p4490_p5 }
  0xe1   : > { %p4493_p3 = pnand %p4492_p2, %p4486_p11 }
  0xe3   : > { %4496 = shalt.err (!%p4493_p3)
}
  0xe4   : > { %s4497_s27 = scalar_lea.vmem %s5190_s16, 4096  ;;  %s4785_s24 = smov [#allocation3]  }
  0xe5   : > { %p4498_p13 = scmp.ne.s32.totalorder %s5190_s16, %s4497_s27  ;;  %s4502_s5 = sshll.u32 %s4785_s24, 4  ;;  %s4503_s5 = int_to_ptr.vmem [resolvable:$false] %s4502_s5 }
  0xe6   : > { %s4504_s18 = scalar_lea.vmem %s4503_s5, 8192  ;;  %p4505_p7 = scmp.lt.s32.totalorder %s5190_s16, %s4503_s5 }
  0xe7   : > { %p4500_p6 = pnand %p4498_p13, %p6001_p12  ;;  %p4506_p8 = scmp.lt.s32.totalorder %s4504_s18, %s4497_s27 }
  0xe9   : > { %p4501_p0 = pneg %p4500_p6  ;;  %p4507_p10 = por %p4506_p8, %p4505_p7 }
  0xeb   : > { %p4508_p4 = pnand %p4507_p10, %p4501_p0 }
  0xed   : > { %4511 = shalt.err (!%p4508_p4)
}
  0xee   : > { %s4786_s3 = smov 256   ;;  %s4787_s23 = smov 16  }
  0xef   : > { %p6002_p11 = scmp.ne.s32.totalorder %s5979_s26, 0  ;;  %s6003_s8 = sld [smem:[#allocation60_spill]] }
  0xf0   : > { %s669_s24 = scalar_lea.vmem [#allocation8], %s3516_s22  ;;  %s3528_s18 = sshll.u32 %s5028_s30, 7 }
  0xf1   : > { %4053 = dma.hbm_to_vmem [thread:$0]  (!%p6002_p11), %s5186_s7, 4096, %s5190_s16, %s626_s15, %s4786_s3, %s4786_s3, %s4787_s23  }
  0xf2   : > { %s676_s5 = sshll.u32 %s669_s24, 4  ;;  %s5228_s5 = int_to_ptr.vmem [resolvable:$true] %s676_s5 }
  0xf5   : > { %s5224_s27 = scalar_lea.hbm %s6003_s8, %s3684_s19  ;;  %s4517_s19 = scalar_lea.hbm %s6003_s8, 8192 }
  0xf6   : > { %s4512_s28 = scalar_lea.hbm %s5224_s27, 4096  ;;  %p4518_p2 = scmp.lt.u32.totalorder %s5224_s27, %s6003_s8 }
  0xf7   : > { %p4513_p1 = scmp.ne.s32.totalorder %s5224_s27, %s4512_s28  ;;  %p4519_p3 = scmp.lt.u32.totalorder %s4517_s19, %s4512_s28 }
  0xf8   : > { %p4521_p6 = scmp.lt.u32.totalorder %s4512_s28, %s5224_s27 }
  0xf9   : > { %p4515_p5 = pnand %p4513_p1, %p6001_p12  ;;  %p4520_p13 = por %p4519_p3, %p4518_p2 }
  0xfb   : > { %p4516_p9 = pneg %p4515_p5  ;;  %p4522_p0 = por %p4521_p6, %p4520_p13 }
  0xfd   : > { %p4523_p7 = pnand %p4522_p0, %p4516_p9 }
  0xff   : > { %4526 = shalt.err (!%p4523_p7)
}
 0x100   : > { %s4527_s22 = scalar_lea.vmem %s5228_s5, 4096  ;;  %s4788_s1 = smov [#allocation8]  }
 0x101   : > { %p4528_p8 = scmp.ne.s32.totalorder %s5228_s5, %s4527_s22  ;;  %s4532_s24 = sshll.u32 %s4788_s1, 4  ;;  %s4533_s24 = int_to_ptr.vmem [resolvable:$false] %s4532_s24 }
 0x102   : > { %s4534_s7 = scalar_lea.vmem %s4533_s24, 8192  ;;  %p4535_p1 = scmp.lt.s32.totalorder %s5228_s5, %s4533_s24 }
 0x103   : > { %p4530_p10 = pnand %p4528_p8, %p6001_p12  ;;  %p4536_p5 = scmp.lt.s32.totalorder %s4534_s7, %s4527_s22 }
 0x105   : > { %p4531_p4 = pneg %p4530_p10  ;;  %p4537_p2 = por %p4536_p5, %p4535_p1 }
 0x107   : > { %p4538_p3 = pnand %p4537_p2, %p4531_p4 }
 0x109   : > { %4541 = shalt.err (!%p4538_p3)
}
 0x10a   : > { %s6004_s28 = scalar_lea.sflag [#allocation7], %s5031_s14  ;;  %s3688_s16 = sshll.u32 %s4770_s21, 11 }
 0x10b   : > { %4059 = dma.hbm_to_vmem [thread:$0]  (!%p6002_p11), %s5224_s27, 4096, %s5228_s5, %s6004_s28, %s4786_s3, %s4786_s3, %s4787_s23  }
 0x10c   : > { %s6005_s10 = sld [smem:[#allocation62_spill]]  ;;  %s709_s22 = scalar_lea.vmem [#allocation11], %s3528_s18 }
 0x10d   : > { %s716_s1 = sshll.u32 %s709_s22, 4  ;;  %s5267_s1 = int_to_ptr.vmem [resolvable:$true] %s716_s1 }
 0x112   : > { %s5263_s20 = scalar_lea.hbm %s6005_s10, %s3688_s16  ;;  %s4547_s27 = scalar_lea.hbm %s6005_s10, 4096 }
 0x113   : > { %s4542_s24 = scalar_lea.hbm %s5263_s20, 2048  ;;  %p4548_p0 = scmp.lt.u32.totalorder %s5263_s20, %s6005_s10 }
 0x114   : > { %p4543_p9 = scmp.ne.s32.totalorder %s5263_s20, %s4542_s24  ;;  %p4549_p7 = scmp.lt.u32.totalorder %s4547_s27, %s4542_s24 }
 0x115   : > { %p4551_p10 = scmp.lt.u32.totalorder %s4542_s24, %s5263_s20 }
 0x116   : > { %p4545_p13 = pnand %p4543_p9, %p6001_p12  ;;  %p4550_p8 = por %p4549_p7, %p4548_p0 }
 0x118   : > { %p4546_p6 = pneg %p4545_p13  ;;  %p4552_p4 = por %p4551_p10, %p4550_p8 }
 0x11a   : > { %p4553_p1 = pnand %p4552_p4, %p4546_p6 }
 0x11c   : > { %4556 = shalt.err (!%p4553_p1)
}
 0x11d   : > { %s4557_s28 = scalar_lea.vmem %s5267_s1, 2048  ;;  %s4789_s19 = smov [#allocation11]  }
 0x11e   : > { %p4558_p5 = scmp.ne.s32.totalorder %s5267_s1, %s4557_s28  ;;  %s4562_s15 = sshll.u32 %s4789_s19, 4  ;;  %s4563_s15 = int_to_ptr.vmem [resolvable:$false] %s4562_s15 }
 0x11f   : > { %s4564_s22 = scalar_lea.vmem %s4563_s15, 4096  ;;  %p4565_p9 = scmp.lt.s32.totalorder %s5267_s1, %s4563_s15 }
 0x120   : > { %p4560_p2 = pnand %p4558_p5, %p6001_p12  ;;  %p4566_p13 = scmp.lt.s32.totalorder %s4564_s22, %s4557_s28 }
 0x122   : > { %p4561_p3 = pneg %p4560_p2  ;;  %p4567_p0 = por %p4566_p13, %p4565_p9 }
 0x124   : > { %p4568_p7 = pnand %p4567_p0, %p4561_p3 }
 0x126   : > { %4571 = shalt.err (!%p4568_p7)
}
 0x127   : > { %s4790_s24 = smov 128   ;;  %s4791_s3 = smov 8  }
 0x128   : > { %s6006_s23 = scalar_lea.sflag [#allocation10], %s5031_s14  ;;  %s6007_s12 = sld [smem:[#allocation64_spill]] }
 0x129   : > { %4065 = dma.hbm_to_vmem [thread:$0]  (!%p6002_p11), %s5263_s20, 2048, %s5267_s1, %s6006_s23, %s4790_s24, %s4790_s24, %s4791_s3  }
 0x12a   : > { %s749_s28 = scalar_lea.vmem [#allocation14], %s3528_s18 }
 0x12b   : > { %s756_s19 = sshll.u32 %s749_s28, 4  ;;  %s5301_s19 = int_to_ptr.vmem [resolvable:$true] %s756_s19 }
 0x12e   : > { %s5297_s7 = scalar_lea.hbm %s6007_s12, %s3688_s16  ;;  %s4577_s22 = scalar_lea.hbm %s6007_s12, 4096 }
 0x12f   : > { %s4572_s15 = scalar_lea.hbm %s5297_s7, 2048  ;;  %p4578_p4 = scmp.lt.u32.totalorder %s5297_s7, %s6007_s12 }
 0x130   : > { %p4573_p6 = scmp.ne.s32.totalorder %s5297_s7, %s4572_s15  ;;  %p4579_p1 = scmp.lt.u32.totalorder %s4577_s22, %s4572_s15 }
 0x131   : > { %p4581_p2 = scmp.lt.u32.totalorder %s4572_s15, %s5297_s7 }
 0x132   : > { %p4575_p8 = pnand %p4573_p6, %p6001_p12  ;;  %p4580_p5 = por %p4579_p1, %p4578_p4 }
 0x134   : > { %p4576_p10 = pneg %p4575_p8  ;;  %p4582_p3 = por %p4581_p2, %p4580_p5 }
 0x136   : > { %p4583_p9 = pnand %p4582_p3, %p4576_p10 }
 0x138   : > { %4586 = shalt.err (!%p4583_p9)
}
 0x139   : > { %s4587_s18 = scalar_lea.vmem %s5301_s19, 2048  ;;  %s4792_s3 = smov [#allocation14]  }
 0x13a   : > { %p4588_p13 = scmp.ne.s32.totalorder %s5301_s19, %s4587_s18  ;;  %s4592_s23 = sshll.u32 %s4792_s3, 4  ;;  %s4593_s23 = int_to_ptr.vmem [resolvable:$false] %s4592_s23 }
 0x13b   : > { %s4594_s27 = scalar_lea.vmem %s4593_s23, 4096  ;;  %p4595_p6 = scmp.lt.s32.totalorder %s5301_s19, %s4593_s23 }
 0x13c   : > { %p4590_p0 = pnand %p4588_p13, %p6001_p12  ;;  %p4596_p8 = scmp.lt.s32.totalorder %s4594_s27, %s4587_s18 }
 0x13e   : > { %p4591_p7 = pneg %p4590_p0  ;;  %p4597_p4 = por %p4596_p8, %p4595_p6 }
 0x140   : > { %p4598_p1 = pnand %p4597_p4, %p4591_p7 }
 0x142   : > { %4601 = shalt.err (!%p4598_p1)
}
 0x143   : > { %s4793_s5 = smov 64   ;;  %s4794_s28 = smov 4  }
 0x144   : > { %s6008_s15 = scalar_lea.sflag [#allocation13], %s5031_s14  ;;  %s3537_s20 = sshll.u32 %s4770_s21, 4 }
 0x145   : > { %4071 = dma.hbm_to_vmem [thread:$0]  (!%p6002_p11), %s5297_s7, 2048, %s5301_s19, %s6008_s15, %s4793_s5, %s4793_s5, %s4794_s28  }
 0x146   : > { %s6009_s13 = sld [smem:[#allocation65_spill]]  ;;  %s769_s24 = scalar_lea.vmem [#allocation15], %s5028_s30 }
 0x147   : > { %s776_s18 = sshll.u32 %s769_s24, 4  ;;  %s767_s3 = scalar_lea.sflag [#allocation16], %s5031_s14  ;;  %s777_s18 = int_to_ptr.vmem [resolvable:$true] %s776_s18 }
 0x14c   : > { %s5330_s16 = scalar_lea.hbm %s6009_s13, %s3537_s20  ;;  %s4607_s27 = scalar_lea.hbm %s6009_s13, 32 }
 0x14d   : > { %s4602_s23 = scalar_lea.hbm %s5330_s16, 16  ;;  %p4608_p3 = scmp.lt.u32.totalorder %s5330_s16, %s6009_s13 }
 0x14e   : > { %p4603_p10 = scmp.ne.s32.totalorder %s5330_s16, %s4602_s23  ;;  %p4609_p9 = scmp.lt.u32.totalorder %s4607_s27, %s4602_s23 }
 0x14f   : > { %p4611_p0 = scmp.lt.u32.totalorder %s4602_s23, %s5330_s16 }
 0x150   : > { %p4605_p5 = pnand %p4603_p10, %p6001_p12  ;;  %p4610_p13 = por %p4609_p9, %p4608_p3 }
 0x152   : > { %p4606_p2 = pneg %p4605_p5  ;;  %p4612_p7 = por %p4611_p0, %p4610_p13 }
 0x154   : > { %p4613_p6 = pnand %p4612_p7, %p4606_p2 }
 0x156   : > { %4616 = shalt.err (!%p4613_p6)
}
 0x157   : > { %s4617_s30 = scalar_lea.vmem %s777_s18, 16  ;;  %s4795_s14 = smov [#allocation15]  }
 0x158   : > { %p4618_p8 = scmp.ne.s32.totalorder %s777_s18, %s4617_s30  ;;  %s4622_s15 = sshll.u32 %s4795_s14, 4  ;;  %s4623_s15 = int_to_ptr.vmem [resolvable:$false] %s4622_s15 }
 0x159   : > { %s4624_s20 = scalar_lea.vmem %s4623_s15, 32  ;;  %p4625_p10 = scmp.lt.s32.totalorder %s777_s18, %s4623_s15 }
 0x15a   : > { %p4620_p4 = pnand %p4618_p8, %p6001_p12  ;;  %p4626_p5 = scmp.lt.s32.totalorder %s4624_s20, %s4617_s30 }
 0x15c   : > { %p4621_p1 = pneg %p4620_p4  ;;  %p4627_p11 = por %p4626_p5, %p4625_p10 }
 0x15e   : > { %p4628_p3 = pnand %p4627_p11, %p4621_p1 }
 0x160   : > { %4631 = shalt.err (!%p4628_p3)
}
 0x161   : > { %p6010_p9 = scmp.ne.s32.totalorder %s5979_s26, 0  ;;  %p6011_p2 = scmp.ne.s32.totalorder %s5977_s25, 0 }
 0x163   : > { %4074 = dma.hbm_to_vmem [thread:$0]  (!%p6010_p9), %s5330_s16, 16, %s777_s18, %s767_s3  }
 0x164   : > { %799 = sbr.rel (%p6011_p2) target bundleno = 5131 (0x140b), region = 92 }
 0x16b   : > { %s6012_s2 = sld [smem:[#allocation40_spill]]  ;;  %s5354_s1 = sand.u32 1, %s4754_s0  }
 0x16c   : > { %6013 = sst [smem:[#allocation47_spill]] %s5354_s1  ;;  %s3539_s22 = sshll.u32 %s5354_s1, 8 }
 0x16d   : > { %s802_s24 = scalar_lea.sflag [#allocation4], %s5354_s1  ;;  %s5358_s23 = scalar_lea.vmem [#allocation3], %s3539_s22 }
 0x171   : > { %p6014_p12 = scmp.ne.s32.totalorder %s6012_s2, 0 }
 0x173   : > { %4705 = dma.done.wait (%p6014_p12), %s802_s24, 4096  }
 0x174   : > { %4707 = vsyncadd (%p6014_p12), %s802_s24, 4294963200  ;;  %s6015_s26 = sld [smem:[#allocation39_spill]]  ;;  %s3540_s16 = sshll.u32 %s5354_s1, 2 }
 0x175   : > { %s5366_s3 = scalar_lea.vmem [#allocation6], %s3540_s16 }
 0x17a   : > { %s810_s25 = sand.u32 1, %s6015_s26  }
 0x17b   : > { %s811_s18 = scalar_lea.sflag [#allocation7], %s810_s25 }
 0x17c   : > { %4709 = dma.done.wait (%p6014_p12), %s811_s18, 4160  }
 0x17d   : > { %4711 = vsyncadd (%p6014_p12), %s811_s18, 4294963136  ;;  %s5372_s7 = scalar_lea.vmem [#allocation8], %s3539_s22  ;;  %s829_s19 = scalar_lea.sflag [#allocation10], %s810_s25 }
 0x17e   : > { %s5374_s27 = scalar_lea.vmem [#allocation9], %s3540_s16 }
 0x17f   : > { %6016 = sst [smem:[#allocation48_spill]] %s5374_s27 }
 0x180   : > { %4713 = dma.done.wait (%p6014_p12), %s829_s19, 2112  }
 0x181   : > { %4715 = vsyncadd (%p6014_p12), %s829_s19, 4294965184  ;;  %s3543_s5 = sshll.u32 %s5354_s1, 7  ;;  %s3544_s28 = sshll.u32 %s5354_s1, 1 }
 0x182   : > { %s5382_s30 = scalar_lea.vmem [#allocation11], %s3543_s5  ;;  %s847_s14 = scalar_lea.sflag [#allocation13], %s810_s25 }
 0x183   : > { %6017 = sst [smem:[#allocation49_spill]] %s5382_s30  ;;  %s5384_s15 = scalar_lea.vmem [#allocation12], %s3544_s28 }
 0x184   : > { %6018 = sst [smem:[#allocation50_spill]] %s5384_s15 }
 0x185   : > { %4717 = dma.done.wait (%p6014_p12), %s847_s14, 2080  }
 0x186   : > { %4719 = vsyncadd (%p6014_p12), %s847_s14, 4294965216  ;;  %s5390_s20 = scalar_lea.vmem [#allocation14], %s3543_s5  ;;  %s865_s22 = scalar_lea.sflag [#allocation16], %s810_s25 }
 0x187   : > { %6019 = sst [smem:[#allocation51_spill]] %s5390_s20 }
 0x188   : > { %4721 = dma.done.wait (%p6014_p12), %s865_s22, 16  }
 0x189   : > { %4723 = vsyncadd (%p6014_p12), %s865_s22, 4294967280  ;;  %p6020_p11 = scmp.eq.s32.totalorder %s6015_s26, 0 }
 0x18b   : > { %4725 = dma.done.wait (%p6020_p11), [#allocation16], 16   ;;  %p6021_p13 = pmov %p6020_p11 }
 0x18c   : > { %p6022_p0 = pmov %p6020_p11 }
 0x18d   : > { %4727 = vsyncadd (%p6021_p13), [#allocation16], 4294967280 }
 0x18e   : > { %4729 = dma.done.wait (%p6022_p0), [#allocation19], 16   ;;  %p6023_p7 = pmov %p6022_p0 }
 0x18f   : > { %s6024_s16 = sld [smem:[#allocation30_spill]]  ;;  %s6025_s25 = sld [smem:[#allocation35_spill]] }
 0x190   : > { %4731 = vsyncadd (%p6023_p7), [#allocation19], 4294967280  ;;  %s6026_s18 = sld [smem:[#allocation34_spill]]  ;;  %s6027_s24 = sld [smem:[#allocation52_spill]] }
 0x191   : > { %s6029_s12 = sld [smem:[#allocation54_spill]]  ;;  %s6030_s0 = sld [smem:[#allocation55_spill]] }
 0x192   : > { %s6031_s15 = sld [smem:[#allocation56_spill]]  ;;  %s6032_s20 = sld [smem:[#allocation57_spill]] }
 0x193   : > { %s6033_s27 = sld [smem:[#allocation66_spill]] }
 0x195   : > { %s5932_s2 = sand.u32 1, %s6024_s16   ;;  %p994_p6 = scmp.lt.s32.totalorder %s6025_s25, 1 }
 0x196   : > { %s5409_s19 = sshll.u32 %s5932_s2, 3  ;;  %p1018_p8 = scmp.lt.s32.totalorder %s6026_s18, 1 }
 0x197   : > { %s6071_s25 = smov (!%p994_p6, %s6025_s25), 1  ;;  %s6028_s16 = sld [smem:[#allocation53_spill]] }
 0x198   : > { %s1019_s26 = scalar_select %p1018_p8, %s6026_s18, 1 }
 0x199   : > { %s3549_s5 = sshll.u32 %s6071_s25, 3  ;;  %s3691_s28 = sshll.u32 %s6071_s25, 4 }
 0x19a   : > { %s997_s6 = scalar_lea.vmem %s6027_s24, %s3549_s5  ;;  %s5429_s13 = scalar_lea.vmem %s6029_s12, %s3549_s5 }
 0x19b   : > { %s5434_s4 = scalar_lea.vmem %s6030_s0, %s3691_s28  ;;  %s1014_s14 = scalar_lea.vmem %s6031_s15, %s6071_s25 }
 0x19c   : > { %s1017_s8 = scalar_lea.vmem %s6032_s20, %s6071_s25  ;;  %s3555_s9 = sshll.u32 %s1019_s26, 2 }
 0x19d   : > { %s5424_s2 = scalar_lea.vmem %s6028_s16, %s3691_s28  ;;  %s5447_s10 = scalar_lea.vmem %s6033_s27, %s3555_s9 }
 0x19e   : > { %s6034_s5 = sld [smem:[#allocation67_spill]]  ;;  %s993_s0 = scalar_lea.vmem [#allocation20], %s5409_s19 }
 0x19f   : > { %p3557_p4 = scmp.ne.s32.totalorder %s6026_s18, 0 }
 0x1a0   : > { %v1031_v0 = vld [vmem:[%s997_s6] sm:$0xff] (!%p3557_p4) }
 0x1a1   : > { %1030 = sbr.rel (%p3557_p4) target bundleno = 424 (0x1a8), region = 136  ;;  %1032 = vst [vmem:[#allocation2] sm:$0xff] (!%p3557_p4), %v1031_v0 }
 0x1a4   : > { %s5452_s17 = scalar_lea.vmem %s6034_s5, %s3555_s9 }
 0x1a8 PF: > { %v4184_v1 = vld [vmem:[%s5358_s23 + $0x4] ss:$16 sps:$4 sm:$0xff]   ;;  %v4186_v2 = vld [vmem:[%s5358_s23] ss:$16 sps:$4 sm:$0xff]   ;;  %v4796_v3 = vmov 0   ;;  %v4797_v4 = vmov 0.0   ;;  %v1040_v32 = vlaneseq }
 0x1a9   : > { %1196 = vmatprep.mubr.bf16.mxu0 %v4796_v3  ;;  %3801 = vmatprep.subr.bf16.mxu1 %v4797_v4  ;;  %v4187_v5 = vld [vmem:[%s5358_s23 + $0x24] ss:$16 sps:$4 sm:$0xff]   ;;  %v4189_v6 = vld [vmem:[%s5358_s23 + $0x20] ss:$16 sps:$4 sm:$0xff]   ;;  %v4208_v12 = vld [vmem:[%s5358_s23 + $0x8] ss:$16 sps:$4 sm:$0xff]  }
 0x1aa   : > { %1164 = vmatprep.subr.bf16.mxu0 %v4184_v1  ;;  %v4190_v7 = vld [vmem:[%s5358_s23 + $0x44] ss:$16 sps:$4 sm:$0xff]   ;;  %v4192_v8 = vld [vmem:[%s5358_s23 + $0x40] ss:$16 sps:$4 sm:$0xff]   ;;  %3802 = vmatpush3.bf16.msra.mxu1 %v4208_v12  ;;  %v4209_v13 = vld [vmem:[%s5358_s23 + $0x28] ss:$16 sps:$4 sm:$0xff]  }
 0x1ab   : > { %1165 = vmatpush1.bf16.msra.mxu0 %v4186_v2  ;;  %v4193_v9 = vld [vmem:[%s5358_s23 + $0x64] ss:$16 sps:$4 sm:$0xff]   ;;  %v4195_v10 = vld [vmem:[%s5358_s23 + $0x60] ss:$16 sps:$4 sm:$0xff]   ;;  %3803 = vmatprep.subr.bf16.mxu1 %v4797_v4  ;;  %v4210_v16 = vld [vmem:[%s5358_s23 + $0x48] ss:$16 sps:$4 sm:$0xff]  }
 0x1ac   : > { %1166 = vmatprep.subr.bf16.mxu0 %v4187_v5  ;;  %v4196_v11 = vld [vmem:[%s5358_s23 + $0x84] ss:$16 sps:$4 sm:$0xff]   ;;  %v4198_v14 = vld [vmem:[%s5358_s23 + $0x80] ss:$16 sps:$4 sm:$0xff]   ;;  %v4211_v19 = vld [vmem:[%s5358_s23 + $0x68] ss:$16 sps:$4 sm:$0xff]  }
 0x1ad   : > { %v4199_v15 = vld [vmem:[%s5358_s23 + $0xa4] ss:$16 sps:$4 sm:$0xff]   ;;  %v4201_v17 = vld [vmem:[%s5358_s23 + $0xa0] ss:$16 sps:$4 sm:$0xff]   ;;  %v5478_v21 = vld [vmem:[#allocation2] sm:$0xff]  ;;  %vm4798_vm0 = vmmov 0  }
 0x1ae   : > { %3804 = vmatpush3.bf16.msra.mxu1 %v4209_v13  ;;  %v4202_v18 = vld [vmem:[%s5358_s23 + $0xc4] ss:$16 sps:$4 sm:$0xff]   ;;  %v4204_v20 = vld [vmem:[%s5358_s23 + $0xc0] ss:$16 sps:$4 sm:$0xff]   ;;  %v5481_v22 = vld [vmem:[%s5429_s13] sm:$0xff]  ;;  %v1221_v31 = vpack.c.bf16 %v5478_v21, %v5478_v21  ;;  %3817 = vmatprep.mubr.msk.bf16.mxu1 %vm4798_vm0, %v4797_v4  ;;  %v5506_v33 = vshrl.u32 %v1040_v32, 7 }
 0x1af   : > { %1167 = vmatpush1.bf16.msra.mxu0 %v4189_v6  ;;  %3805 = vmatprep.subr.bf16.mxu1 %v4797_v4  ;;  %v4205_v23 = vld [vmem:[%s5358_s23 + $0xe4] ss:$16 sps:$4 sm:$0xff]   ;;  %v4212_v24 = vld [vmem:[%s5358_s23 + $0x88] ss:$16 sps:$4 sm:$0xff]   ;;  %v4207_v25 = vld [vmem:[%s5358_s23 + $0xe0] ss:$16 sps:$4 sm:$0xff]   ;;  %v1054_v26 = vadd.f32 %v5481_v22, %v5478_v21 }
 0x1b0   : > { %1168 = vmatprep.subr.bf16.mxu0 %v4190_v7  ;;  %v4213_v27 = vld [vmem:[%s5358_s23 + $0xa8] ss:$16 sps:$4 sm:$0xff]   ;;  %v5508_v34 = vand.u32 127, %v1040_v32  ;;  %v1080_v35 = vsub.s32 1, %v5506_v33  ;;  %v1072_v36 = vld [vmem:[%s5366_s3] sm:$0x3] }
 0x1b1   : > { %v1071_v28 = vpack.c.bf16 %v1054_v26, %v1054_v26  ;;  %v4214_v29 = vld [vmem:[%s5358_s23 + $0xc8] ss:$16 sps:$4 sm:$0xff]   ;;  %v1076_v37 = vsub.s32 0, %v5506_v33  ;;  %v3575_v56 = vld [vmem:[%s5366_s3 + $0x2] ss:$0 sm:$0xff]  ;;  %vm1383_vm6 = vcmask 1043456  }
 0x1b2   : > { %3806 = vmatpush3.bf16.msra.mxu1 %v4210_v16  ;;  %v4215_v30 = vld [vmem:[%s5358_s23 + $0xe8] ss:$16 sps:$4 sm:$0xff]   ;;  %v1081_v38 = vrot.slane %v1072_v36, %v1080_v35  ;;  %vm1534_vm1 = vcmp.ge.s32.totalorder %v5508_v34, 64  ;;  %vm1535_vm2 = vcmp.lt.s32.totalorder %v5508_v34, 96  ;;  %vm1320_vm3 = vcmp.lt.s32.totalorder %v5508_v34, 32  ;;  %s6036_s21 = sld [smem:[#allocation48_spill]] }
 0x1b3   : > { %1169 = vmatpush1.bf16.msra.mxu0 %v4192_v8  ;;  %3807 = vmatprep.subr.bf16.mxu1 %v4797_v4  ;;  %v1077_v39 = vrot.slane %v1072_v36, %v1076_v37  ;;  %vm1536_vm4 = vmand %vm1534_vm1, %vm1535_vm2  ;;  %v5525_v47 = vsel %vm1320_vm3, 1.0, %v4797_v4  ;;  %vm1639_vm5 = vcmp.ge.s32.totalorder %v5508_v34, 96  ;;  %vm1044_vm7 = vcmp.gt.s32.totalorder %v5508_v34, %v5506_v33  ;;  %v3558_v0 = vld [vmem:[%s1014_s14] ss:$0 sm:$0xff]  ;;  %s6040_s27 = sld [smem:[#allocation50_spill]]  ;;  %s6041_s30 = sld [smem:[#allocation47_spill]] }
 0x1b4   : > { %1170 = vmatprep.subr.bf16.mxu0 %v4193_v9  ;;  %v5528_v48 = vsel %vm1536_vm4, 1.0, %v4797_v4  ;;  %v5540_v53 = vsel %vm1639_vm5, 1.0, %v4797_v4  ;;  %v1045_v1 = vsel %vm1044_vm7, -1e+09, %v4797_v4  ;;  %vm1367_vm8 = vcmask 64512   ;;  %s6043_s20 = sld [smem:[#allocation34_spill]] }
 0x1b5   : > { %v1052_v2 = vadd.f32 %v3558_v0, %v1045_v1  ;;  %vm1429_vm9 = vcmp.ge.s32.totalorder %v5508_v34, 32  ;;  %vm1430_vm10 = vcmp.lt.s32.totalorder %v5508_v34, 64  ;;  %vm2274_vm12 = vcmask 130048  }
 0x1b6   : > { %3808 = vmatpush3.bf16.msra.mxu1 %v4211_v19  ;;  %vm1431_vm11 = vmand %vm1429_vm9, %vm1430_vm10 }
 0x1b7   : > { %1171 = vmatpush1.bf16.msra.mxu0 %v4195_v10  ;;  %3809 = vmatprep.subr.bf16.mxu1 %v4797_v4 }
 0x1b8   : > { %1172 = vmatprep.subr.bf16.mxu0 %v4196_v11 }
 0x1b9   : > { %s6042_s15 = scalar_lea.vmem [#allocation15], %s6041_s30 }
 0x1ba   : > { %3810 = vmatpush3.bf16.msra.mxu1 %v4212_v24  ;;  %p3677_p1 = scmp.ne.s32.totalorder %s6043_s20, 1 }
 0x1bb   : > { %1173 = vmatpush1.bf16.msra.mxu0 %v4198_v14  ;;  %3811 = vmatprep.subr.bf16.mxu1 %v4797_v4 }
 0x1bc   : > { %1174 = vmatprep.subr.bf16.mxu0 %v4199_v15 }
 0x1be   : > { %3812 = vmatpush3.bf16.msra.mxu1 %v4213_v27 }
 0x1bf   : > { %1175 = vmatpush1.bf16.msra.mxu0 %v4201_v17  ;;  %3813 = vmatprep.subr.bf16.mxu1 %v4797_v4 }
 0x1c0   : > { %1176 = vmatprep.subr.bf16.mxu0 %v4202_v18 }
 0x1c2   : > { %3814 = vmatpush3.bf16.msra.mxu1 %v4214_v29 }
 0x1c3   : > { %1177 = vmatpush1.bf16.msra.mxu0 %v4204_v20  ;;  %3815 = vmatprep.subr.bf16.mxu1 %v4797_v4 }
 0x1c4   : > { %1178 = vmatprep.subr.bf16.mxu0 %v4205_v23 }
 0x1c6   : > { %3816 = vmatpush3.bf16.msra.mxu1 %v4215_v30 }
 0x1c7   : > { %1179 = vmatpush1.bf16.msra.mxu0 %v4207_v25  ;;  %3821 = vmatprep.subr.bf16.mxu1 %v4797_v4 }
 0x1c8   : > { %3845 = vmatprep.subr.bf16.mxu0 %v4797_v4 }
 0x1c9   : > { %3818 = vmatmul.mubr.bf16.vlgmr.msra.gmra.mrb[0].mxu1 %v1221_v31 }
 0x1ca   : > { %1197 = vmatmul.mubr.bf16.vlgmr.msra.gmra.mrb[0].mxu0 %v1071_v28  ;;  %3823 = vmatprep.mubr.msk.bf16.mxu1 %vm4798_vm0, %v4797_v4 }
 0x1cb   : > { %3847 = vmatprep.mubr.msk.bf16.mxu0 %vm4798_vm0, %v4797_v4 }
 0x29c   : > { %v1311_v57 = vpop.f32.mrb[0].mxu1 }
 0x29d   : > { %v1198_v40 = vpop.f32.mrb[0].mxu0  ;;  %v1312_v58 = vadd.f32 %v3575_v56, %v1311_v57  ;;  %v3819_v59 = vpop.f32.mrb[1].mxu1 }
 0x29e   : > { %v1200_v41 = vpop.f32.mrb[1].mxu0  ;;  %v5520_v44 = vadd.f32 %v1198_v40, %v1077_v39  ;;  %v1314_v60 = vpop.f32.mrb[2].mxu1 }
 0x29f   : > { %v1201_v42 = vadd.f32 %v1200_v41, %v1081_v38  ;;  %v1202_v43 = vpop.f32.mrb[2].mxu0  ;;  %v1318_v61 = vpack.c.bf16 %v1312_v58, %v1312_v58  ;;  %v3820_v62 = vpop.f32.mrb[3].mxu1  ;;  %v5571_v38 = vsel %vm1431_vm11, 1.0, %v4797_v4 }
 0x2a0   : > { %v1203_v45 = vpop.f32.mrb[3].mxu0  ;;  %v1323_v49 = vmul.f32 %v5525_v47, %v5520_v44  ;;  %v1538_v50 = vmul.f32 %v5528_v48, %v5520_v44  ;;  %v1643_v54 = vmul.f32 %v5540_v53, %v5520_v44  ;;  %v1433_v39 = vmul.f32 %v5571_v38, %v5520_v44 }
 0x2a1   : > { %v5522_v46 = vpack.c.bf16 %v1201_v42, %v1201_v42  ;;  %v5553_v63 = vsel %vm1383_vm6, %v1318_v61, 0 }
 0x2a2   : > { %v1324_v51 = vpack.c.bf16 %v1323_v49, %v1323_v49  ;;  %v1539_v52 = vpack.c.bf16 %v1538_v50, %v1538_v50  ;;  %v1644_v55 = vpack.c.bf16 %v1643_v54, %v1643_v54  ;;  %v1434_v34 = vpack.c.bf16 %v1433_v39, %v1433_v39 }
 0x2a3   : > { %3822 = vmatpush3.bf16.xpose.msra.mxu1 %v5522_v46  ;;  %3846 = vmatpush3.bf16.xpose.msra.mxu0 %v5522_v46 }
 0x2a4   : > { %3857 = vmatprep.subr.bf16.mxu0 %v4797_v4  ;;  %3827 = vmatprep.subr.bf16.mxu1 %v4797_v4 }
 0x2aa   : > { %3824 = vmatmul.mubr.bf16.vlgmr.msra.gmra.mrb[4].mxu1 %v1324_v51  ;;  %3848 = vmatmul.mubr.bf16.vlgmr.msra.gmra.mrb[4].mxu0 %v1539_v52 }
 0x2ab   : > { %3858 = vmatpush3.bf16.xpose.msra.mxu0 %v5522_v46  ;;  %3859 = vmatprep.mubr.msk.bf16.mxu0 %vm4798_vm0, %v4797_v4 }
 0x2ac   : > { %3829 = vmatprep.mubr.msk.bf16.mxu1 %vm4798_vm0, %v4797_v4  ;;  %3869 = vmatprep.subr.bf16.mxu0 %v4797_v4 }
 0x2ad   : > { %3828 = vmatpush3.bf16.msra.mxu1 %v5553_v63 }
 0x2ae   : > { %3833 = vmatprep.subr.bf16.mxu1 %v4797_v4 }
 0x2b2   : > { %3860 = vmatmul.mubr.bf16.vlgmr.msra.gmra.mrb[8].mxu0 %v1644_v55 }
 0x2b3   : > { %3885 = vmatprep.mubr.msk.bf16.mxu0 %vm4798_vm0, %v4797_v4 }
 0x37d   : > { %v1359_v5 = vpop.f32.mrb[4].mxu1  ;;  %v1574_v6 = vpop.f32.mrb[4].mxu0 }
 0x37e   : > { %v1365_v7 = vmul.f32 0.17677669, %v1359_v5  ;;  %v3825_v8 = vpop.f32.mrb[5].mxu1  ;;  %v3849_v9 = vpop.f32.mrb[5].mxu0 }
 0x37f   : > { %v1362_v10 = vpop.f32.mrb[6].mxu1  ;;  %v1577_v11 = vpop.f32.mrb[6].mxu0 }
 0x380   : > { %v3826_v12 = vpop.f32.mrb[7].mxu1  ;;  %v3850_v13 = vpop.f32.mrb[7].mxu0  ;;  %v1366_v14 = vadd.f32 %v1365_v7, %v1052_v2  ;;  %v4216_v11 = vld [vmem:[%s5358_s23 + $0xc] ss:$16 sps:$4 sm:$0xff]  }
 0x381   : > { %3870 = vmatpush3.bf16.msra.mxu0 %v4216_v11  ;;  %v4217_v12 = vld [vmem:[%s5358_s23 + $0x2c] ss:$16 sps:$4 sm:$0xff]  }
 0x382   : > { %v1368_v15 = vsel %vm1367_vm8, %v1366_v14, -inf  ;;  %3871 = vmatprep.subr.bf16.mxu0 %v4797_v4 }
 0x383   : > { %1369 = vmax.xlane.f32.xlu0 %v1368_v15 }
 0x385   : > { %v1679_v16 = vpop.f32.mrb[8].mxu0  ;;  %3872 = vmatpush3.bf16.msra.mxu0 %v4217_v12 }
 0x386   : > { %v3861_v17 = vpop.f32.mrb[9].mxu0  ;;  %v1685_v25 = vmul.f32 0.17677669, %v1679_v16  ;;  %3873 = vmatprep.subr.bf16.mxu0 %v4797_v4 }
 0x387   : > { %v1682_v18 = vpop.f32.mrb[10].mxu0 }
 0x388   : > { %v3862_v19 = vpop.f32.mrb[11].mxu0  ;;  %v1686_v28 = vadd.f32 %v1685_v25, %v1052_v2 }
 0x38a   : > { %v1687_v29 = vsel %vm1367_vm8, %v1686_v28, -inf }
 0x410   : > { %v1370_v20 = vpop.xlane.xlu0 %1369 }
 0x411   : > { %v1371_v23 = vsub.f32 %v1366_v14, %v1370_v20 }
 0x413   : > { %v1372_v24 = vmul.f32 1.442695, %v1371_v23 }
 0x415   : > { %4296 = vpow2.f32 %v1372_v24 }
 0x41f   : > { %v4297_v26 = vpop.eup %4296 }
 0x420   : > { %v1374_v27 = vsel %vm1367_vm8, %v4297_v26, 0.0 }
 0x421   : > { %1375 = vadd.xlane.f32.xlu0 %v1374_v27  ;;  %v4218_v27 = vld [vmem:[%s5358_s23 + $0x4c] ss:$16 sps:$4 sm:$0xff]  }
 0x422   : > { %3874 = vmatpush3.bf16.msra.mxu0 %v4218_v27  ;;  %v4237_v27 = vld [vmem:[%s5372_s7 + $0xa0] ss:$16 sps:$4 sm:$0xff]  }
 0x423   : > { %3875 = vmatprep.subr.bf16.mxu0 %v4797_v4 }
 0x425   : > { %1688 = vmax.xlane.f32.xlu0 %v1687_v29  ;;  %v4221_v29 = vld [vmem:[%s5358_s23 + $0xac] ss:$16 sps:$4 sm:$0xff]  }
 0x4ae   : > { %v1376_v30 = vpop.xlane.xlu0 %1375 }
 0x4af   : > { %4298 = vrcp.f32 %v1376_v30  ;;  %v4222_v30 = vld [vmem:[%s5358_s23 + $0xcc] ss:$16 sps:$4 sm:$0xff]  }
 0x4b2   : > { %v1689_v57 = vpop.xlane.xlu0 %1688 }
 0x4b3   : > { %v1690_v58 = vsub.f32 %v1686_v28, %v1689_v57  ;;  %v4220_v28 = vld [vmem:[%s5358_s23 + $0x8c] ss:$16 sps:$4 sm:$0xff]  }
 0x4b5   : > { %v1691_v61 = vmul.f32 1.442695, %v1690_v58 }
 0x4b9   : > { %v4299_v31 = vpop.eup %4298 }
 0x4ba   : > { %v1378_v32 = vmul.f32 %v4299_v31, %v4297_v26  ;;  %v4223_v31 = vld [vmem:[%s5358_s23 + $0xec] ss:$16 sps:$4 sm:$0xff]  }
 0x4bc   : > { %v1379_v36 = vpack.c.bf16 %v1378_v32, %v1378_v32 }
 0x4be   : > { %3830 = vmatmul.mubr.msk.bf16.vlgmr.msra.gmra.mrb[8].mxu1 %vm1367_vm8, %v1379_v36 }
 0x4bf   : > { %3834 = vmatpush3.bf16.xpose.msra.mxu1 %v5522_v46  ;;  %3835 = vmatprep.mubr.msk.bf16.mxu1 %vm4798_vm0, %v4797_v4  ;;  %v1580_v46 = vmul.f32 0.17677669, %v1574_v6 }
 0x4c0   : > { %3839 = vmatprep.subr.bf16.mxu1 %v4797_v4 }
 0x4c1   : > { %v1581_v55 = vadd.f32 %v1580_v46, %v1052_v2 }
 0x4c3   : > { %v1582_v56 = vsel %vm1367_vm8, %v1581_v55, -inf }
 0x4c6   : > { %3836 = vmatmul.mubr.bf16.vlgmr.msra.gmra.mrb[12].mxu1 %v1434_v34 }
 0x4c7   : > { %3840 = vmatpush3.bf16.msra.mxu1 %v5553_v63  ;;  %3841 = vmatprep.mubr.msk.bf16.mxu1 %vm4798_vm0, %v4797_v4 }
 0x4c8   : > { %3851 = vmatprep.subr.bf16.mxu1 %v4797_v4 }
 0x591   : > { %v5584_v40 = vpop.f32.mrb[8].mxu1 }
 0x592   : > { %v3831_v41 = vpop.f32.mrb[9].mxu1  ;;  %v1427_v36 = vmul.f32 %v5584_v40, %v5525_v47 }
 0x593   : > { %v1424_v42 = vpop.f32.mrb[10].mxu1 }
 0x594   : > { %v3832_v43 = vpop.f32.mrb[11].mxu1 }
 0x599   : > { %v1469_v45 = vpop.f32.mrb[12].mxu1 }
 0x59a   : > { %v1475_v49 = vmul.f32 0.17677669, %v1469_v45  ;;  %v3837_v50 = vpop.f32.mrb[13].mxu1 }
 0x59b   : > { %v1472_v51 = vpop.f32.mrb[14].mxu1 }
 0x59c   : > { %v3838_v44 = vpop.f32.mrb[15].mxu1  ;;  %v1476_v52 = vadd.f32 %v1475_v49, %v1052_v2 }
 0x59e   : > { %v1477_v54 = vsel %vm1367_vm8, %v1476_v52, -inf }
 0x59f   : > { %1478 = vmax.xlane.f32.xlu1 %v1477_v54 }
 0x5a3   : > { %1583 = vmax.xlane.f32.xlu1 %v1582_v56 }
 0x62c   : > { %v1479_v59 = vpop.xlane.xlu1 %1478 }
 0x62d   : > { %v1480_v60 = vsub.f32 %v1476_v52, %v1479_v59  ;;  %v3588_v59 = vld [vmem:[%s5366_s3 + $0x3] ss:$0 sm:$0xff]  ;;  %s6038_s3 = sld [smem:[#allocation49_spill]] }
 0x62f   : > { %v1481_v62 = vmul.f32 1.442695, %v1480_v60 }
 0x630   : > { %v1584_v0 = vpop.xlane.xlu1 %1583 }
 0x631   : > { %4300 = vpow2.f32 %v1481_v62  ;;  %v1585_v1 = vsub.f32 %v1581_v55, %v1584_v0 }
 0x632   : > { %4302 = vpow2.f32 %v1691_v61 }
 0x633   : > { %v1586_v5 = vmul.f32 1.442695, %v1585_v1 }
 0x635   : > { %4304 = vpow2.f32 %v1586_v5 }
 0x63b   : > { %v4301_v6 = vpop.eup %4300 }
 0x63c   : > { %v1483_v2 = vsel %vm1367_vm8, %v4301_v6, 0.0  ;;  %v4303_v7 = vpop.eup %4302 }
 0x63d   : > { %1484 = vadd.xlane.f32.xlu1 %v1483_v2  ;;  %v1693_v9 = vsel %vm1367_vm8, %v4303_v7, 0.0  ;;  %v4227_v2 = vld [vmem:[%s5372_s7] ss:$16 sps:$4 sm:$0xff]  }
 0x63f   : > { %v4305_v8 = vpop.eup %4304 }
 0x640   : > { %v1588_v10 = vsel %vm1367_vm8, %v4305_v8, 0.0 }
 0x641   : > { %1694 = vadd.xlane.f32.xlu1 %v1693_v9  ;;  %1589 = vadd.xlane.f32.xlu0 %v1588_v10  ;;  %v4226_v9 = vld [vmem:[%s5372_s7 + $0x44] ss:$16 sps:$4 sm:$0xff]  }
 0x6ca   : > { %v1485_v13 = vpop.xlane.xlu1 %1484 }
 0x6cb   : > { %4306 = vrcp.f32 %v1485_v13 }
 0x6ce   : > { %v1590_v14 = vpop.xlane.xlu0 %1589  ;;  %v1695_v15 = vpop.xlane.xlu1 %1694 }
 0x6cf   : > { %4308 = vrcp.f32 %v1590_v14  ;;  %v4230_v14 = vld [vmem:[%s5372_s7 + $0x84] ss:$16 sps:$4 sm:$0xff]  }
 0x6d0   : > { %4310 = vrcp.f32 %v1695_v15  ;;  %v4231_v15 = vld [vmem:[%s5372_s7 + $0x40] ss:$16 sps:$4 sm:$0xff]  }
 0x6d5   : > { %v4307_v16 = vpop.eup %4306 }
 0x6d6   : > { %v1487_v17 = vmul.f32 %v4307_v16, %v4301_v6  ;;  %v4224_v6 = vld [vmem:[%s5372_s7 + $0x4] ss:$16 sps:$4 sm:$0xff]  }
 0x6d7   : > { %v4232_v16 = vld [vmem:[%s5372_s7 + $0xa4] ss:$16 sps:$4 sm:$0xff]  }
 0x6d8   : > { %v1488_v18 = vpack.c.bf16 %v1487_v17, %v1487_v17  ;;  %v4233_v17 = vld [vmem:[%s5372_s7 + $0x60] ss:$16 sps:$4 sm:$0xff]  }
 0x6d9   : > { %v4309_v19 = vpop.eup %4308 }
 0x6da   : > { %3842 = vmatmul.mubr.msk.bf16.vlgmr.msra.gmra.mrb[16].mxu1 %vm1367_vm8, %v1488_v18  ;;  %v1592_v20 = vmul.f32 %v4309_v19, %v4305_v8  ;;  %v4311_v24 = vpop.eup %4310  ;;  %v4229_v8 = vld [vmem:[%s5372_s7 + $0x20] ss:$16 sps:$4 sm:$0xff]   ;;  %v4234_v18 = vld [vmem:[%s5372_s7 + $0xc4] ss:$16 sps:$4 sm:$0xff]  }
 0x6db   : > { %3852 = vmatpush3.bf16.msra.mxu1 %v5553_v63  ;;  %3853 = vmatprep.mubr.msk.bf16.mxu1 %vm4798_vm0, %v4797_v4  ;;  %v1697_v25 = vmul.f32 %v4311_v24, %v4303_v7  ;;  %v4225_v7 = vld [vmem:[%s5372_s7 + $0x24] ss:$16 sps:$4 sm:$0xff]   ;;  %v4235_v19 = vld [vmem:[%s5372_s7 + $0x80] ss:$16 sps:$4 sm:$0xff]   ;;  %v5657_v24 = vld [vmem:[%s5424_s2 + $0x8] sm:$0xff] }
 0x6dc   : > { %3863 = vmatprep.subr.bf16.mxu1 %v4797_v4  ;;  %v1593_v23 = vpack.c.bf16 %v1592_v20, %v1592_v20  ;;  %v4236_v20 = vld [vmem:[%s5372_s7 + $0xe4] ss:$16 sps:$4 sm:$0xff]  }
 0x6dd   : > { %v1698_v26 = vpack.c.bf16 %v1697_v25, %v1697_v25  ;;  %v1037_v25 = vld [vmem:[%s5434_s4] sm:$0xff] }
 0x6e2   : > { %3854 = vmatmul.mubr.msk.bf16.vlgmr.msra.gmra.mrb[20].mxu1 %vm1367_vm8, %v1593_v23  ;;  %v5654_v23 = vld [vmem:[%s5424_s2] sm:$0xff] }
 0x6e3   : > { %3864 = vmatpush3.bf16.msra.mxu1 %v5553_v63  ;;  %3865 = vmatprep.mubr.msk.bf16.mxu1 %vm4798_vm0, %v4797_v4  ;;  %v4219_v63 = vld [vmem:[%s5358_s23 + $0x6c] ss:$16 sps:$4 sm:$0xff]  }
 0x6e4   : > { %3889 = vmatprep.subr.bf16.mxu1 %v4797_v4  ;;  %3876 = vmatpush3.bf16.msra.mxu0 %v4219_v63  ;;  %v1882_v63 = vadd.f32 %v1037_v25, %v5654_v23 }
 0x6e5   : > { %3877 = vmatprep.subr.bf16.mxu0 %v4797_v4 }
 0x6e8   : > { %3878 = vmatpush3.bf16.msra.mxu0 %v4220_v28 }
 0x6e9   : > { %3879 = vmatprep.subr.bf16.mxu0 %v4797_v4 }
 0x6ea   : > { %3866 = vmatmul.mubr.msk.bf16.vlgmr.msra.gmra.mrb[24].mxu1 %vm1367_vm8, %v1698_v26  ;;  %v1038_v26 = vld [vmem:[%s5434_s4 + $0x8] sm:$0xff] }
 0x6eb   : > { %3905 = vmatprep.mubr.msk.bf16.mxu1 %vm4798_vm0, %v4797_v4  ;;  %3890 = vmatpush3.bf16.msra.mxu1 %v4227_v2  ;;  %v1883_v28 = vadd.f32 %v1038_v26, %v5657_v24 }
 0x6ec   : > { %3880 = vmatpush3.bf16.msra.mxu0 %v4221_v29  ;;  %3891 = vmatprep.subr.bf16.mxu1 %v4797_v4 }
 0x6ed   : > { %3881 = vmatprep.subr.bf16.mxu0 %v4797_v4  ;;  %v2012_v29 = vpack.c.bf16 %v1883_v28, %v1882_v63 }
 0x6ef   : > { %3892 = vmatpush3.bf16.msra.mxu1 %v4229_v8 }
 0x6f0   : > { %3882 = vmatpush3.bf16.msra.mxu0 %v4222_v30  ;;  %3893 = vmatprep.subr.bf16.mxu1 %v4797_v4  ;;  %v4238_v30 = vld [vmem:[%s5372_s7 + $0xc0] ss:$16 sps:$4 sm:$0xff]  }
 0x6f1   : > { %3883 = vmatprep.subr.bf16.mxu0 %v4797_v4 }
 0x6f3   : > { %3894 = vmatpush3.bf16.msra.mxu1 %v4231_v15  ;;  %v4246_v15 = vld [vmem:[%s5372_s7 + $0xc8] ss:$16 sps:$4 sm:$0xff]  }
 0x6f4   : > { %3884 = vmatpush3.bf16.msra.mxu0 %v4223_v31  ;;  %3895 = vmatprep.subr.bf16.mxu1 %v4797_v4  ;;  %v4239_v31 = vld [vmem:[%s5372_s7 + $0xe0] ss:$16 sps:$4 sm:$0xff]  }
 0x6f5   : > { %3909 = vmatprep.subr.bf16.mxu0 %v4797_v4 }
 0x6f7   : > { %3896 = vmatpush3.bf16.msra.mxu1 %v4233_v17  ;;  %v2125_v17 = vpack.c.bf16 %v5657_v24, %v5654_v23 }
 0x6f8   : > { %3897 = vmatprep.subr.bf16.mxu1 %v4797_v4 }
 0x6fb   : > { %3898 = vmatpush3.bf16.msra.mxu1 %v4235_v19  ;;  %v3626_v19 = vld [vmem:[%s1017_s8] ss:$0 sm:$0xff] }
 0x6fc   : > { %3899 = vmatprep.subr.bf16.mxu1 %v4797_v4 }
 0x6ff   : > { %3900 = vmatpush3.bf16.msra.mxu1 %v4237_v27 }
 0x700   : > { %3901 = vmatprep.subr.bf16.mxu1 %v4797_v4 }
 0x703   : > { %3902 = vmatpush3.bf16.msra.mxu1 %v4238_v30 }
 0x704   : > { %3903 = vmatprep.subr.bf16.mxu1 %v4797_v4 }
 0x707   : > { %3904 = vmatpush3.bf16.msra.mxu1 %v4239_v31 }
 0x708   : > { %3929 = vmatprep.subr.bf16.mxu1 %v4797_v4 }
 0x7ad   : > { %v1526_v32 = vpop.f32.mrb[16].mxu1 }
 0x7ae   : > { %v1532_v39 = vmul.f32 %v1526_v32, %v5571_v38  ;;  %v3843_v34 = vpop.f32.mrb[17].mxu1 }
 0x7af   : > { %v1529_v41 = vpop.f32.mrb[18].mxu1 }
 0x7b0   : > { %v1533_v42 = vadd.f32 %v1532_v39, %v1427_v36  ;;  %v3844_v43 = vpop.f32.mrb[19].mxu1  ;;  %v3597_v41 = vld [vmem:[%s5447_s10] ss:$0 sm:$0xff] }
 0x7b1   : > { %v3598_v43 = vld [vmem:[%s5452_s17] ss:$0 sm:$0xff] }
 0x7b5   : > { %v1631_v45 = vpop.f32.mrb[20].mxu1 }
 0x7b6   : > { %v1637_v46 = vmul.f32 %v1631_v45, %v5528_v48  ;;  %v3855_v49 = vpop.f32.mrb[21].mxu1 }
 0x7b7   : > { %v1634_v50 = vpop.f32.mrb[22].mxu1 }
 0x7b8   : > { %v1638_v51 = vadd.f32 %v1637_v46, %v1533_v42  ;;  %v3856_v44 = vpop.f32.mrb[23].mxu1 }
 0x7bd   : > { %v1736_v52 = vpop.f32.mrb[24].mxu1 }
 0x7be   : > { %v1742_v54 = vmul.f32 %v1736_v52, %v5540_v53  ;;  %v3867_v55 = vpop.f32.mrb[25].mxu1 }
 0x7bf   : > { %v1739_v40 = vpop.f32.mrb[26].mxu1 }
 0x7c0   : > { %v1743_v56 = vadd.f32 %v1742_v54, %v1638_v51  ;;  %v3868_v57 = vpop.f32.mrb[27].mxu1  ;;  %v3608_v51 = vld [vmem:[%s6036_s21 + $0x1] ss:$0 sm:$0xff] }
 0x7c2   : > { %v1760_v58 = vpack.c.bf16 %v1743_v56, %v1743_v56 }
 0x7c4   : > { %3886 = vmatmul.mubr.bf16.vlgmr.msra.gmra.mrb[12].mxu0 %v1760_v58  ;;  %v3599_v58 = vld [vmem:[%s6036_s21] ss:$0 sm:$0xff] }
 0x7c5   : > { %3925 = vmatprep.mubr.msk.bf16.mxu0 %vm4798_vm0, %v4797_v4  ;;  %3910 = vmatpush3.bf16.msra.mxu0 %v4224_v6 }
 0x7c6   : > { %3911 = vmatprep.subr.bf16.mxu0 %v4797_v4 }
 0x7c9   : > { %3912 = vmatpush3.bf16.msra.mxu0 %v4225_v7 }
 0x7ca   : > { %3913 = vmatprep.subr.bf16.mxu0 %v4797_v4 }
 0x7cd   : > { %3914 = vmatpush3.bf16.msra.mxu0 %v4226_v9 }
 0x7ce   : > { %3915 = vmatprep.subr.bf16.mxu0 %v4797_v4 }
 0x897   : > { %v1850_v60 = vpop.f32.mrb[12].mxu0 }
 0x898   : > { %v1851_v61 = vadd.f32 %v3588_v59, %v1850_v60  ;;  %v3887_v62 = vpop.f32.mrb[13].mxu0 }
 0x899   : > { %v1853_v0 = vpop.f32.mrb[14].mxu0 }
 0x89a   : > { %v3888_v1 = vpop.f32.mrb[15].mxu0  ;;  %v1856_v5 = vadd.f32 %v1851_v61, %v5478_v21  ;;  %v4228_v21 = vld [vmem:[%s5372_s7 + $0x64] ss:$16 sps:$4 sm:$0xff]  }
 0x89b   : > { %3916 = vmatpush3.bf16.msra.mxu0 %v4228_v21  ;;  %v4240_v21 = vld [vmem:[%s5372_s7 + $0x8] ss:$16 sps:$4 sm:$0xff]  }
 0x89c   : > { %1859 = vadd.xlane.f32.xlu0 %v1856_v5  ;;  %3917 = vmatprep.subr.bf16.mxu0 %v4797_v4 }
 0x89f   : > { %3918 = vmatpush3.bf16.msra.mxu0 %v4230_v14  ;;  %v4245_v14 = vld [vmem:[%s5372_s7 + $0xa8] ss:$16 sps:$4 sm:$0xff]  }
 0x8a0   : > { %3919 = vmatprep.subr.bf16.mxu0 %v4797_v4 }
 0x8a3   : > { %3920 = vmatpush3.bf16.msra.mxu0 %v4232_v16  ;;  %v4247_v16 = vld [vmem:[%s5372_s7 + $0xe8] ss:$16 sps:$4 sm:$0xff]  }
 0x8a4   : > { %3921 = vmatprep.subr.bf16.mxu0 %v4797_v4 }
 0x8a7   : > { %3922 = vmatpush3.bf16.msra.mxu0 %v4234_v18 }
 0x8a8   : > { %3923 = vmatprep.subr.bf16.mxu0 %v4797_v4 }
 0x8ab   : > { %3924 = vmatpush3.bf16.msra.mxu0 %v4236_v20 }
 0x8ac   : > { %3949 = vmatprep.subr.bf16.mxu0 %v4797_v4 }
 0x8ae   : > { %3926 = vmatmul.mubr.bf16.vlgmr.msra.gmra.mrb[16].mxu0 %v2012_v29 }
 0x8af   : > { %3951 = vmatprep.mubr.msk.bf16.mxu0 %vm4798_vm0, %v4797_v4 }
 0x929   : > { %v1860_v10 = vpop.xlane.xlu0 %1859 }
 0x92a   : > { %v1862_v11 = vmul.f32 0.0078125, %v1860_v10  ;;  %v4241_v10 = vld [vmem:[%s5372_s7 + $0x28] ss:$16 sps:$4 sm:$0xff]  }
 0x92c   : > { %v1863_v12 = vsub.f32 %v1856_v5, %v1862_v11  ;;  %v4242_v11 = vld [vmem:[%s5372_s7 + $0x48] ss:$16 sps:$4 sm:$0xff]  }
 0x92e   : > { %v1864_v13 = vmul.f32 %v1863_v12, %v1863_v12 }
 0x930   : > { %1865 = vadd.xlane.f32.xlu1 %v1864_v13  ;;  %v4244_v13 = vld [vmem:[%s5372_s7 + $0x88] ss:$16 sps:$4 sm:$0xff]  }
 0x981   : > { %v2102_v44 = vpop.f32.mrb[16].mxu0 }
 0x982   : > { %v2103_v52 = vadd.f32 %v3608_v51, %v2102_v44  ;;  %v3927_v54 = vpop.f32.mrb[17].mxu0 }
 0x983   : > { %v2105_v55 = vpop.f32.mrb[18].mxu0 }
 0x984   : > { %v2106_v40 = vadd.f32 %v3608_v51, %v2105_v55  ;;  %v3928_v56 = vpop.f32.mrb[19].mxu0 }
 0x986   : > { %v2222_v57 = vpack.c.bf16 %v2106_v40, %v2103_v52 }
 0x988   : > { %3950 = vmatpush3.bf16.xpose.msra.mxu0 %v2222_v57 }
 0x989   : > { %3961 = vmatprep.subr.bf16.mxu0 %v4797_v4 }
 0x9bd   : > { %v1866_v32 = vpop.xlane.xlu1 %1865 }
 0x9be   : > { %v1867_v36 = vmul.f32 0.0078125, %v1866_v32 }
 0x9c0   : > { %v1868_v39 = vadd.f32 1e-05, %v1867_v36 }
 0x9c2   : > { %4312 = vrsqrt.f32 %v1868_v39 }
 0x9cc   : > { %v4313_v34 = vpop.eup %4312 }
 0x9cd   : > { %v1870_v42 = vmul.f32 %v4313_v34, %v1863_v12  ;;  %v4243_v12 = vld [vmem:[%s5372_s7 + $0x68] ss:$16 sps:$4 sm:$0xff]  }
 0x9cf   : > { %v1875_v45 = vmul.f32 %v3597_v41, %v1870_v42 }
 0x9d1   : > { %v5675_v46 = vadd.f32 %v3598_v43, %v1875_v45 }
 0x9d3   : > { %v1881_v49 = vadd.f32 %v5675_v46, %v5481_v22 }
 0x9d5   : > { %v1900_v50 = vpack.c.bf16 %v1881_v49, %v1881_v49 }
 0x9d7   : > { %3906 = vmatmul.mubr.bf16.vlgmr.msra.gmra.mrb[28].mxu1 %v1900_v50 }
 0x9d8   : > { %3945 = vmatprep.mubr.msk.bf16.mxu1 %vm4798_vm0, %v4797_v4  ;;  %3930 = vmatpush3.bf16.msra.mxu1 %v4240_v21 }
 0x9d9   : > { %3931 = vmatprep.subr.bf16.mxu1 %v4797_v4 }
 0x9dc   : > { %3932 = vmatpush3.bf16.msra.mxu1 %v4241_v10 }
 0x9dd   : > { %3933 = vmatprep.subr.bf16.mxu1 %v4797_v4 }
 0x9e0   : > { %3934 = vmatpush3.bf16.msra.mxu1 %v4242_v11 }
 0x9e1   : > { %3935 = vmatprep.subr.bf16.mxu1 %v4797_v4 }
 0x9e4   : > { %3936 = vmatpush3.bf16.msra.mxu1 %v4243_v12 }
 0x9e5   : > { %3937 = vmatprep.subr.bf16.mxu1 %v4797_v4 }
 0x9e8   : > { %3938 = vmatpush3.bf16.msra.mxu1 %v4244_v13  ;;  %v3617_v13 = vld [vmem:[%s6036_s21 + $0x2] ss:$0 sm:$0xff] }
 0x9e9   : > { %3939 = vmatprep.subr.bf16.mxu1 %v4797_v4 }
 0x9ec   : > { %3940 = vmatpush3.bf16.msra.mxu1 %v4245_v14 }
 0x9ed   : > { %3941 = vmatprep.subr.bf16.mxu1 %v4797_v4 }
 0x9f0   : > { %3942 = vmatpush3.bf16.msra.mxu1 %v4246_v15 }
 0x9f1   : > { %3943 = vmatprep.subr.bf16.mxu1 %v4797_v4 }
 0x9f4   : > { %3944 = vmatpush3.bf16.msra.mxu1 %v4247_v16 }
 0x9f5   : > { %3955 = vmatprep.subr.bf16.mxu1 %v4797_v4 }
 0x9f7   : > { %3946 = vmatmul.mubr.bf16.vlgmr.msra.gmra.mrb[32].mxu1 %v2125_v17 }
 0x9f8   : > { %3957 = vmatprep.mubr.msk.bf16.mxu1 %vm4798_vm0, %v4797_v4 }
 0xaaa   : > { %v1990_v59 = vpop.f32.mrb[28].mxu1 }
 0xaab   : > { %v1991_v60 = vadd.f32 %v3599_v58, %v1990_v59  ;;  %v3907_v22 = vpop.f32.mrb[29].mxu1 }
 0xaac   : > { %v1993_v61 = vpop.f32.mrb[30].mxu1 }
 0xaad   : > { %v3908_v62 = vpop.f32.mrb[31].mxu1  ;;  %v2224_v0 = vmul.f32 %v1991_v60, %v5525_v47  ;;  %v2332_v5 = vmul.f32 %v1991_v60, %v5571_v38  ;;  %v2433_v2 = vmul.f32 %v1991_v60, %v5528_v48  ;;  %v2534_v8 = vmul.f32 %v1991_v60, %v5540_v53 }
 0xaaf   : > { %v2225_v1 = vpack.c.bf16 %v2224_v0, %v2224_v0  ;;  %v2333_v6 = vpack.c.bf16 %v2332_v5, %v2332_v5  ;;  %v2434_v7 = vpack.c.bf16 %v2433_v2, %v2433_v2  ;;  %v2535_v9 = vpack.c.bf16 %v2534_v8, %v2534_v8 }
 0xab1   : > { %3952 = vmatmul.mubr.bf16.vlgmr.msra.gmra.mrb[20].mxu0 %v2225_v1 }
 0xab2   : > { %3962 = vmatpush3.bf16.xpose.msra.mxu0 %v2222_v57  ;;  %3963 = vmatprep.mubr.msk.bf16.mxu0 %vm4798_vm0, %v4797_v4 }
 0xab3   : > { %3973 = vmatprep.subr.bf16.mxu0 %v4797_v4 }
 0xab9   : > { %3964 = vmatmul.mubr.bf16.vlgmr.msra.gmra.mrb[24].mxu0 %v2333_v6 }
 0xaba   : > { %3974 = vmatpush3.bf16.xpose.msra.mxu0 %v2222_v57  ;;  %3975 = vmatprep.mubr.msk.bf16.mxu0 %vm4798_vm0, %v4797_v4 }
 0xabb   : > { %3985 = vmatprep.subr.bf16.mxu0 %v4797_v4 }
 0xac1   : > { %3976 = vmatmul.mubr.bf16.vlgmr.msra.gmra.mrb[28].mxu0 %v2434_v7 }
 0xac2   : > { %3986 = vmatpush3.bf16.xpose.msra.mxu0 %v2222_v57  ;;  %3987 = vmatprep.mubr.msk.bf16.mxu0 %vm4798_vm0, %v4797_v4 }
 0xac3   : > { %3997 = vmatprep.subr.bf16.mxu0 %v4797_v4 }
 0xac9   : > { %3988 = vmatmul.mubr.bf16.vlgmr.msra.gmra.mrb[32].mxu0 %v2535_v9 }
 0xaca   : > { %4013 = vmatprep.mubr.msk.bf16.mxu0 %vm4798_vm0, %v4797_v4  ;;  %v2215_v56 = vpop.f32.mrb[32].mxu1 }
 0xacb   : > { %v3947_v58 = vpop.f32.mrb[33].mxu1  ;;  %v2216_v14 = vadd.f32 %v3617_v13, %v2215_v56 }
 0xacc   : > { %v2218_v15 = vpop.f32.mrb[34].mxu1 }
 0xacd   : > { %v3948_v16 = vpop.f32.mrb[35].mxu1  ;;  %v2219_v17 = vadd.f32 %v3617_v13, %v2218_v15 }
 0xb84   : > { %v2260_v18 = vpop.f32.mrb[20].mxu0 }
 0xb85   : > { %v2266_v20 = vmul.f32 0.17677669, %v2260_v18  ;;  %v3953_v25 = vpop.f32.mrb[21].mxu0 }
 0xb86   : > { %v2263_v26 = vpop.f32.mrb[22].mxu0 }
 0xb87   : > { %v3954_v27 = vpop.f32.mrb[23].mxu0  ;;  %v2273_v63 = vadd.f32 %v3626_v19, %v2266_v20  ;;  %v2223_v20 = vpack.c.bf16 %v2219_v17, %v2216_v14  ;;  %v4258_v17 = vld [vmem:[%s6038_s3 + $0x4] ss:$8 sps:$4 sm:$0xff]  }
 0xb89   : > { %v2275_v23 = vsel %vm2274_vm12, %v2273_v63, -inf  ;;  %3956 = vmatpush3.bf16.msra.mxu1 %v2223_v20 }
 0xb8a   : > { %2276 = vmax.xlane.f32.xlu0 %v2275_v23  ;;  %3967 = vmatprep.subr.bf16.mxu1 %v4797_v4 }
 0xb8c   : > { %v2368_v24 = vpop.f32.mrb[24].mxu0 }
 0xb8d   : > { %v2374_v28 = vmul.f32 0.17677669, %v2368_v24  ;;  %v3965_v29 = vpop.f32.mrb[25].mxu0 }
 0xb8e   : > { %v2371_v30 = vpop.f32.mrb[26].mxu0 }
 0xb8f   : > { %v3966_v31 = vpop.f32.mrb[27].mxu0  ;;  %v2375_v32 = vadd.f32 %v3626_v19, %v2374_v28 }
 0xb91   : > { %v2376_v36 = vsel %vm2274_vm12, %v2375_v32, -inf }
 0xb92   : > { %2377 = vmax.xlane.f32.xlu1 %v2376_v36 }
 0xb94   : > { %v2469_v39 = vpop.f32.mrb[28].mxu0 }
 0xb95   : > { %v2475_v34 = vmul.f32 0.17677669, %v2469_v39  ;;  %v3977_v41 = vpop.f32.mrb[29].mxu0 }
 0xb96   : > { %v2472_v42 = vpop.f32.mrb[30].mxu0 }
 0xb97   : > { %v3978_v43 = vpop.f32.mrb[31].mxu0  ;;  %v2476_v45 = vadd.f32 %v3626_v19, %v2475_v34 }
 0xb98   : > { %v4248_v43 = vld [vmem:[%s5372_s7 + $0xc] ss:$16 sps:$4 sm:$0xff]  }
 0xb99   : > { %v2477_v49 = vsel %vm2274_vm12, %v2476_v45, -inf  ;;  %3998 = vmatpush3.bf16.msra.mxu0 %v4248_v43 }
 0xb9a   : > { %2478 = vmax.xlane.f32.xlu0 %v2477_v49  ;;  %3999 = vmatprep.subr.bf16.mxu0 %v4797_v4  ;;  %v4250_v49 = vld [vmem:[%s5372_s7 + $0x4c] ss:$16 sps:$4 sm:$0xff]  }
 0xb9c   : > { %v2570_v50 = vpop.f32.mrb[32].mxu0 }
 0xb9d   : > { %v2576_v51 = vmul.f32 0.17677669, %v2570_v50  ;;  %v3989_v44 = vpop.f32.mrb[33].mxu0  ;;  %v4251_v50 = vld [vmem:[%s5372_s7 + $0x6c] ss:$16 sps:$4 sm:$0xff]  }
 0xb9e   : > { %v2573_v52 = vpop.f32.mrb[34].mxu0  ;;  %v4254_v44 = vld [vmem:[%s5372_s7 + $0xcc] ss:$16 sps:$4 sm:$0xff]  }
 0xb9f   : > { %v3990_v54 = vpop.f32.mrb[35].mxu0  ;;  %v2577_v55 = vadd.f32 %v3626_v19, %v2576_v51  ;;  %v4253_v51 = vld [vmem:[%s5372_s7 + $0xac] ss:$16 sps:$4 sm:$0xff]  }
 0xba0   : > { %v4255_v52 = vld [vmem:[%s5372_s7 + $0xec] ss:$16 sps:$4 sm:$0xff]  }
 0xba1   : > { %v2578_v40 = vsel %vm2274_vm12, %v2577_v55, -inf }
 0xba2   : > { %2579 = vmax.xlane.f32.xlu1 %v2578_v40 }
 0xc17   : > { %v2277_v57 = vpop.xlane.xlu0 %2276 }
 0xc18   : > { %v2278_v59 = vsub.f32 %v2273_v63, %v2277_v57 }
 0xc1a   : > { %v2279_v60 = vmul.f32 1.442695, %v2278_v59 }
 0xc1c   : > { %4314 = vpow2.f32 %v2279_v60 }
 0xc1f   : > { %v2378_v22 = vpop.xlane.xlu1 %2377 }
 0xc20   : > { %v2379_v61 = vsub.f32 %v2375_v32, %v2378_v22 }
 0xc22   : > { %v2380_v62 = vmul.f32 1.442695, %v2379_v61 }
 0xc24   : > { %4316 = vpow2.f32 %v2380_v62 }
 0xc26   : > { %v4315_v0 = vpop.eup %4314 }
 0xc27   : > { %v2479_v1 = vpop.xlane.xlu0 %2478  ;;  %v2281_v5 = vsel %vm2274_vm12, %v4315_v0, 0.0 }
 0xc28   : > { %v2480_v6 = vsub.f32 %v2476_v45, %v2479_v1  ;;  %2282 = vadd.xlane.f32.xlu0 %v2281_v5  ;;  %v4249_v45 = vld [vmem:[%s5372_s7 + $0x2c] ss:$16 sps:$4 sm:$0xff]  }
 0xc29   : > { %4000 = vmatpush3.bf16.msra.mxu0 %v4249_v45 }
 0xc2a   : > { %v2481_v2 = vmul.f32 1.442695, %v2480_v6  ;;  %4001 = vmatprep.subr.bf16.mxu0 %v4797_v4 }
 0xc2c   : > { %4318 = vpow2.f32 %v2481_v2 }
 0xc2d   : > { %4002 = vmatpush3.bf16.msra.mxu0 %v4250_v49 }
 0xc2e   : > { %v4317_v7 = vpop.eup %4316  ;;  %4003 = vmatprep.subr.bf16.mxu0 %v4797_v4 }
 0xc2f   : > { %v2580_v8 = vpop.xlane.xlu1 %2579  ;;  %v2382_v9 = vsel %vm2274_vm12, %v4317_v7, 0.0 }
 0xc30   : > { %v2581_v21 = vsub.f32 %v2577_v55, %v2580_v8  ;;  %2383 = vadd.xlane.f32.xlu1 %v2382_v9 }
 0xc31   : > { %4004 = vmatpush3.bf16.msra.mxu0 %v4251_v50 }
 0xc32   : > { %v2582_v10 = vmul.f32 1.442695, %v2581_v21  ;;  %4005 = vmatprep.subr.bf16.mxu0 %v4797_v4 }
 0xc34   : > { %4320 = vpow2.f32 %v2582_v10 }
 0xc36   : > { %v4319_v11 = vpop.eup %4318 }
 0xc37   : > { %v2483_v12 = vsel %vm2274_vm12, %v4319_v11, 0.0 }
 0xc38   : > { %2484 = vadd.xlane.f32.xlu0 %v2483_v12 }
 0xc3e   : > { %v4321_v18 = vpop.eup %4320 }
 0xc3f   : > { %v2584_v19 = vsel %vm2274_vm12, %v4321_v18, 0.0 }
 0xc40   : > { %2585 = vadd.xlane.f32.xlu1 %v2584_v19  ;;  %v4259_v19 = vld [vmem:[%s6038_s3 + $0x10] ss:$8 sps:$4 sm:$0xff]  }
 0xcb5   : > { %v2283_v25 = vpop.xlane.xlu0 %2282 }
 0xcb6   : > { %4322 = vrcp.f32 %v2283_v25  ;;  %v4262_v25 = vld [vmem:[%s6038_s3 + $0x20] ss:$8 sps:$4 sm:$0xff]  }
 0xcbd   : > { %v2384_v26 = vpop.xlane.xlu1 %2383 }
 0xcbe   : > { %4324 = vrcp.f32 %v2384_v26 }
 0xcc0   : > { %v4323_v27 = vpop.eup %4322 }
 0xcc1   : > { %v2285_v63 = vmul.f32 %v4323_v27, %v4315_v0 }
 0xcc3   : > { %v2286_v23 = vpack.c.bf16 %v2285_v63, %v2285_v63 }
 0xcc5   : > { %v2485_v24 = vpop.xlane.xlu0 %2484  ;;  %3958 = vmatmul.mubr.msk.bf16.vlgmr.msra.gmra.mrb[36].mxu1 %vm2274_vm12, %v2286_v23  ;;  %v4267_v23 = vld [vmem:[%s6038_s3 + $0x34] ss:$8 sps:$4 sm:$0xff]  }
 0xcc6   : > { %4326 = vrcp.f32 %v2485_v24  ;;  %3968 = vmatpush3.bf16.msra.mxu1 %v2223_v20  ;;  %3969 = vmatprep.mubr.msk.bf16.mxu1 %vm4798_vm0, %v4797_v4  ;;  %v4265_v24 = vld [vmem:[%s6038_s3 + $0x30] ss:$8 sps:$4 sm:$0xff]  }
 0xcc7   : > { %3979 = vmatprep.subr.bf16.mxu1 %v4797_v4 }
 0xcc8   : > { %v4325_v28 = vpop.eup %4324 }
 0xcc9   : > { %v2386_v29 = vmul.f32 %v4325_v28, %v4317_v7  ;;  %v4270_v28 = vld [vmem:[%s6038_s3 + $0x44] ss:$8 sps:$4 sm:$0xff]  }
 0xccb   : > { %v2387_v30 = vpack.c.bf16 %v2386_v29, %v2386_v29  ;;  %v4268_v29 = vld [vmem:[%s6038_s3 + $0x40] ss:$8 sps:$4 sm:$0xff]  }
 0xccd   : > { %v2586_v31 = vpop.xlane.xlu1 %2585  ;;  %3970 = vmatmul.mubr.msk.bf16.vlgmr.msra.gmra.mrb[40].mxu1 %vm2274_vm12, %v2387_v30  ;;  %v4273_v30 = vld [vmem:[%s6038_s3 + $0x54] ss:$8 sps:$4 sm:$0xff]  }
 0xcce   : > { %4328 = vrcp.f32 %v2586_v31  ;;  %3980 = vmatpush3.bf16.msra.mxu1 %v2223_v20  ;;  %3981 = vmatprep.mubr.msk.bf16.mxu1 %vm4798_vm0, %v4797_v4  ;;  %v4271_v31 = vld [vmem:[%s6038_s3 + $0x50] ss:$8 sps:$4 sm:$0xff]  }
 0xccf   : > { %3991 = vmatprep.subr.bf16.mxu1 %v4797_v4 }
 0xcd0   : > { %v4327_v32 = vpop.eup %4326 }
 0xcd1   : > { %v2487_v36 = vmul.f32 %v4327_v32, %v4319_v11  ;;  %v3631_v11 = vld [vmem:[%s6036_s21 + $0x3] ss:$0 sm:$0xff]  ;;  %v4276_v32 = vld [vmem:[%s6038_s3 + $0x64] ss:$8 sps:$4 sm:$0xff]  }
 0xcd3   : > { %v2488_v39 = vpack.c.bf16 %v2487_v36, %v2487_v36  ;;  %v4274_v36 = vld [vmem:[%s6038_s3 + $0x60] ss:$8 sps:$4 sm:$0xff]  }
 0xcd5   : > { %3982 = vmatmul.mubr.msk.bf16.vlgmr.msra.gmra.mrb[44].mxu1 %vm2274_vm12, %v2488_v39  ;;  %v4279_v39 = vld [vmem:[%s6038_s3 + $0x74] ss:$8 sps:$4 sm:$0xff]  }
 0xcd6   : > { %3992 = vmatpush3.bf16.msra.mxu1 %v2223_v20  ;;  %3993 = vmatprep.mubr.msk.bf16.mxu1 %vm4798_vm0, %v4797_v4  ;;  %v4264_v20 = vld [vmem:[%s6038_s3 + $0x24] ss:$8 sps:$4 sm:$0xff]  }
 0xcd7   : > { %2880 = vmatprep.subr.bf16.mxu1 %v4258_v17 }
 0xcd8   : > { %v4329_v34 = vpop.eup %4328 }
 0xcd9   : > { %v2588_v41 = vmul.f32 %v4329_v34, %v4321_v18  ;;  %v4261_v18 = vld [vmem:[%s6038_s3 + $0x14] ss:$8 sps:$4 sm:$0xff]   ;;  %v4277_v34 = vld [vmem:[%s6038_s3 + $0x70] ss:$8 sps:$4 sm:$0xff]  }
 0xcdb   : > { %v2589_v42 = vpack.c.bf16 %v2588_v41, %v2588_v41 }
 0xcdd   : > { %3994 = vmatmul.mubr.msk.bf16.vlgmr.msra.gmra.mrb[48].mxu1 %vm2274_vm12, %v2589_v42 }
 0xcde   : > { %2912 = vmatprep.mubr.bf16.mxu1 %v4796_v3  ;;  %v4252_v3 = vld [vmem:[%s5372_s7 + $0x8c] ss:$16 sps:$4 sm:$0xff]   ;;  %s6039_s7 = sld [smem:[#allocation51_spill]] }
 0xcdf   : > { %4006 = vmatpush3.bf16.msra.mxu0 %v4252_v3 }
 0xce0   : > { %4007 = vmatprep.subr.bf16.mxu0 %v4797_v4 }
 0xce3   : > { %4008 = vmatpush3.bf16.msra.mxu0 %v4253_v51 }
 0xce4   : > { %4009 = vmatprep.subr.bf16.mxu0 %v4797_v4  ;;  %v4280_v41 = vld [vmem:[%s6039_s7 + $0x40] sm:$0xff]   ;;  %v4282_v43 = vld [vmem:[%s6039_s7 + $0x48] sm:$0xff]   ;;  %v4284_v49 = vld [vmem:[%s6039_s7 + $0x50] sm:$0xff]  }
 0xce5   : > { %v4281_v42 = vld [vmem:[%s6039_s7] sm:$0xff]   ;;  %v4283_v45 = vld [vmem:[%s6039_s7 + $0x8] sm:$0xff]   ;;  %v4285_v50 = vld [vmem:[%s6039_s7 + $0x10] sm:$0xff]  }
 0xce6   : > { %v4286_v3 = vld [vmem:[%s6039_s7 + $0x58] sm:$0xff]  }
 0xce7   : > { %4010 = vmatpush3.bf16.msra.mxu0 %v4254_v44  ;;  %v4287_v51 = vld [vmem:[%s6039_s7 + $0x18] sm:$0xff]   ;;  %v4288_v44 = vld [vmem:[%s6039_s7 + $0x60] sm:$0xff]  }
 0xce8   : > { %4011 = vmatprep.subr.bf16.mxu0 %v4797_v4 }
 0xceb   : > { %4012 = vmatpush3.bf16.msra.mxu0 %v4255_v52  ;;  %v4289_v52 = vld [vmem:[%s6039_s7 + $0x20] sm:$0xff]  }
 0xcec   : > { %3779 = vmatprep.subr.bf16.mxu0 %v4280_v41 }
 0xd98   : > { %v2324_v54 = vpop.f32.mrb[36].mxu1 }
 0xd99   : > { %v3959_v55 = vpop.f32.mrb[37].mxu1  ;;  %v2330_v58 = vmul.f32 %v2324_v54, %v5525_v47  ;;  %v4290_v54 = vld [vmem:[%s6039_s7 + $0x68] sm:$0xff]  }
 0xd9a   : > { %v2327_v40 = vpop.f32.mrb[38].mxu1  ;;  %v4291_v55 = vld [vmem:[%s6039_s7 + $0x28] sm:$0xff]  }
 0xd9b   : > { %v3960_v56 = vpop.f32.mrb[39].mxu1 }
 0xda0   : > { %v2425_v57 = vpop.f32.mrb[40].mxu1 }
 0xda1   : > { %v2431_v59 = vmul.f32 %v2425_v57, %v5571_v38  ;;  %v3971_v60 = vpop.f32.mrb[41].mxu1 }
 0xda2   : > { %v2428_v22 = vpop.f32.mrb[42].mxu1 }
 0xda3   : > { %v2432_v61 = vadd.f32 %v2431_v59, %v2330_v58  ;;  %v3972_v62 = vpop.f32.mrb[43].mxu1  ;;  %v3640_v59 = vld [vmem:[%s5447_s10 + $0x1] ss:$0 sm:$0xff] }
 0xda4   : > { %v3641_v22 = vld [vmem:[%s5452_s17 + $0x1] ss:$0 sm:$0xff] }
 0xda8   : > { %v2526_v0 = vpop.f32.mrb[44].mxu1 }
 0xda9   : > { %v2532_v1 = vmul.f32 %v2526_v0, %v5528_v48  ;;  %v3983_v4 = vpop.f32.mrb[45].mxu1 }
 0xdaa   : > { %v2529_v5 = vpop.f32.mrb[46].mxu1  ;;  %v4293_v4 = vld [vmem:[%s6039_s7 + $0x30] sm:$0xff]  }
 0xdab   : > { %v2533_v6 = vadd.f32 %v2532_v1, %v2432_v61  ;;  %v3984_v2 = vpop.f32.mrb[47].mxu1  ;;  %v4292_v1 = vld [vmem:[%s6039_s7 + $0x70] sm:$0xff]   ;;  %v4294_v5 = vld [vmem:[%s6039_s7 + $0x78] sm:$0xff]  }
 0xdac   : > { %v2788_v2 = vld [vmem:[%s6040_s27] sm:$0x3] }
 0xdb0   : > { %v2627_v7 = vpop.f32.mrb[48].mxu1 }
 0xdb1   : > { %v2633_v8 = vmul.f32 %v2627_v7, %v5540_v53  ;;  %v3995_v47 = vpop.f32.mrb[49].mxu1  ;;  %v4256_v53 = vld [vmem:[%s6038_s3] ss:$8 sps:$4 sm:$0xff]   ;;  %v2793_v7 = vrot.slane %v2788_v2, %v1076_v37 }
 0xdb2   : > { %v2630_v38 = vpop.f32.mrb[50].mxu1  ;;  %2881 = vmatpush1.bf16.msra.mxu1 %v4256_v53 }
 0xdb3   : > { %v2634_v9 = vadd.f32 %v2633_v8, %v2533_v6  ;;  %v3996_v21 = vpop.f32.mrb[51].mxu1  ;;  %2882 = vmatprep.subr.bf16.mxu1 %v4261_v18  ;;  %v4295_v6 = vld [vmem:[%s6039_s7 + $0x38] sm:$0xff]   ;;  %v2797_v8 = vrot.slane %v2788_v2, %v1080_v35 }
 0xdb5   : > { %v2651_v10 = vpack.c.bf16 %v2634_v9, %v2634_v9 }
 0xdb6   : > { %2883 = vmatpush1.bf16.msra.mxu1 %v4259_v19 }
 0xdb7   : > { %4014 = vmatmul.mubr.bf16.vlgmr.msra.gmra.mrb[36].mxu0 %v2651_v10  ;;  %2884 = vmatprep.subr.bf16.mxu1 %v4264_v20 }
 0xdb8   : > { %3780 = vmatpush3.bf16.msra.mxu0 %v4281_v42 }
 0xdb9   : > { %3781 = vmatprep.subr.bf16.mxu0 %v4282_v43 }
 0xdba   : > { %2885 = vmatpush1.bf16.msra.mxu1 %v4262_v25 }
 0xdbb   : > { %2886 = vmatprep.subr.bf16.mxu1 %v4267_v23 }
 0xdbc   : > { %3782 = vmatpush3.bf16.msra.mxu0 %v4283_v45 }
 0xdbd   : > { %3783 = vmatprep.subr.bf16.mxu0 %v4284_v49  ;;  %v3678_v49 = vld [vmem:[#allocation17] ss:$0 sm:$0xff] (!%p3677_p1) }
 0xdbe   : > { %2887 = vmatpush1.bf16.msra.mxu1 %v4265_v24  ;;  %v3675_v24 = vld [vmem:[%s5447_s10 + $0x2] ss:$0 sm:$0xff] }
 0xdbf   : > { %2888 = vmatprep.subr.bf16.mxu1 %v4270_v28 }
 0xdc0   : > { %3784 = vmatpush3.bf16.msra.mxu0 %v4285_v50 }
 0xdc1   : > { %3785 = vmatprep.subr.bf16.mxu0 %v4286_v3  ;;  %v3679_v3 = vld [vmem:[#allocation18] ss:$0 sm:$0xff] (!%p3677_p1) }
 0xdc2   : > { %2889 = vmatpush1.bf16.msra.mxu1 %v4268_v29  ;;  %v3676_v29 = vld [vmem:[%s5452_s17 + $0x2] ss:$0 sm:$0xff] }
 0xdc3   : > { %2890 = vmatprep.subr.bf16.mxu1 %v4273_v30 }
 0xdc4   : > { %3786 = vmatpush3.bf16.msra.mxu0 %v4287_v51 }
 0xdc5   : > { %3787 = vmatprep.subr.bf16.mxu0 %v4288_v44 }
 0xdc6   : > { %2891 = vmatpush1.bf16.msra.mxu1 %v4271_v31 }
 0xdc7   : > { %2892 = vmatprep.subr.bf16.mxu1 %v4276_v32 }
 0xdc8   : > { %3788 = vmatpush3.bf16.msra.mxu0 %v4289_v52 }
 0xdc9   : > { %3789 = vmatprep.subr.bf16.mxu0 %v4290_v54 }
 0xdca   : > { %2893 = vmatpush1.bf16.msra.mxu1 %v4274_v36 }
 0xdcb   : > { %2894 = vmatprep.subr.bf16.mxu1 %v4279_v39 }
 0xdcc   : > { %3790 = vmatpush3.bf16.msra.mxu0 %v4291_v55 }
 0xdcd   : > { %3791 = vmatprep.subr.bf16.mxu0 %v4292_v1 }
 0xdce   : > { %2895 = vmatpush1.bf16.msra.mxu1 %v4277_v34 }
 0xdd0   : > { %3792 = vmatpush3.bf16.msra.mxu0 %v4293_v4 }
 0xdd1   : > { %3793 = vmatprep.subr.bf16.mxu0 %v4294_v5 }
 0xdd4   : > { %3794 = vmatpush3.bf16.msra.mxu0 %v4295_v6 }
 0xe8a   : > { %v2741_v48 = vpop.f32.mrb[36].mxu0 }
 0xe8b   : > { %v2742_v12 = vadd.f32 %v3631_v11, %v2741_v48  ;;  %v4015_v13 = vpop.f32.mrb[37].mxu0 }
 0xe8c   : > { %v2744_v14 = vpop.f32.mrb[38].mxu0 }
 0xe8d   : > { %v4016_v15 = vpop.f32.mrb[39].mxu0  ;;  %v2747_v16 = vadd.f32 %v2742_v12, %v5675_v46 }
 0xe8f   : > { %2750 = vadd.xlane.f32.xlu0 %v2747_v16 }
 0xf1c   : > { %v2751_v46 = vpop.xlane.xlu0 %2750 }
 0xf1d   : > { %v2752_v26 = vmul.f32 0.0078125, %v2751_v46 }
 0xf1f   : > { %v2753_v27 = vsub.f32 %v2747_v16, %v2752_v26  ;;  %v3658_v16 = vld [vmem:[%s6042_s15] ss:$0 sm:$0xff] }
 0xf21   : > { %v2754_v63 = vmul.f32 %v2753_v27, %v2753_v27 }
 0xf23   : > { %2755 = vadd.xlane.f32.xlu1 %v2754_v63 }
 0xfb0   : > { %v2756_v40 = vpop.xlane.xlu1 %2755 }
 0xfb1   : > { %v2757_v56 = vmul.f32 0.0078125, %v2756_v40 }
 0xfb3   : > { %v2758_v57 = vadd.f32 1e-05, %v2757_v56 }
 0xfb5   : > { %4330 = vrsqrt.f32 %v2758_v57 }
 0xfbf   : > { %v4331_v58 = vpop.eup %4330 }
 0xfc0   : > { %v2760_v60 = vmul.f32 %v4331_v58, %v2753_v27 }
 0xfc2   : > { %v2765_v61 = vmul.f32 %v3640_v59, %v2760_v60 }
 0xfc4   : > { %v2770_v62 = vadd.f32 %v3641_v22, %v2765_v61 }
 0xfc6   : > { %v2771_v0 = vpack.c.bf16 %v2770_v62, %v2770_v62 }
 0xfc8   : > { %2913 = vmatmul.mubr.bf16.vlgmr.msra.gmra.mrb[52].mxu1 %v2771_v0 }
0x109b   : > { %v2914_v47 = vpop.f32.mrb[52].mxu1 }
0x109c   : > { %v2915_v38 = vadd.f32 %v2914_v47, %v2793_v7  ;;  %v2916_v9 = vpop.f32.mrb[53].mxu1 }
0x109d   : > { %v2917_v21 = vadd.f32 %v2916_v9, %v2797_v8  ;;  %v2918_v10 = vpop.f32.mrb[54].mxu1 }
0x109e   : > { %v2921_v11 = vmax.f32 %v2915_v38, 0.0  ;;  %v2919_v48 = vpop.f32.mrb[55].mxu1 }
0x109f   : > { %v2922_v12 = vmax.f32 %v2917_v21, 0.0 }
0x10a0   : > { %v2923_v14 = vpack.c.bf16 %v2921_v11, %v2921_v11 }
0x10a1   : > { %v2924_v13 = vpack.c.bf16 %v2922_v12, %v2922_v12 }
0x10a3   : > { %3092 = vmatprep.mubr.bf16.mxu0 %v2924_v13 }
0x10a4   : > { %3093 = vmatmul.mubr.bf16.vlgmr.msra.gmra.mrb[40].mxu0 %v2923_v14 }
0x1177   : > { %v3795_v15 = vpop.f32.mrb[40].mxu0 }
0x1178   : > { %v3796_v53 = vpop.f32.mrb[41].mxu0 }
0x1179   : > { %v3797_v37 = vadd.f32 %v3796_v53, %v3795_v15  ;;  %v3798_v33 = vpop.f32.mrb[42].mxu0 }
0x117a   : > { %v3799_v35 = vpop.f32.mrb[43].mxu0 }
0x117b   : > { %v3095_v17 = vadd.f32 %v3797_v37, %v3658_v16 }
0x117d   : > { %v3100_v18 = vadd.f32 %v3095_v17, %v2770_v62 }
0x117f   : > { %3103 = vadd.xlane.f32.xlu0 %v3100_v18 }
0x120c   : > { %v3104_v19 = vpop.xlane.xlu0 %3103 }
0x120d   : > { %v3105_v20 = vmul.f32 0.0078125, %v3104_v19 }
0x120f   : > { %v3106_v25 = vsub.f32 %v3100_v18, %v3105_v20 }
0x1211   : > { %v3107_v46 = vmul.f32 %v3106_v25, %v3106_v25 }
0x1213   : > { %3108 = vadd.xlane.f32.xlu1 %v3107_v46 }
0x12a0   : > { %v3109_v26 = vpop.xlane.xlu1 %3108 }
0x12a1   : > { %v3110_v27 = vmul.f32 0.0078125, %v3109_v26 }
0x12a3   : > { %v3111_v63 = vadd.f32 1e-05, %v3110_v27 }
0x12a5   : > { %4332 = vrsqrt.f32 %v3111_v63 }
0x12af   : > { %v4333_v23 = vpop.eup %4332 }
0x12b0   : > { %v3113_v28 = vmul.f32 %v4333_v23, %v3106_v25  ;;  %3128 = sbr.rel (%p3677_p1) target bundleno = 5102 (0x13ee), region = 140 }
0x12b2   : > { %v3118_v30 = vmul.f32 %v3675_v24, %v3113_v28 }
0x12b4   : > { %v3123_v31 = vadd.f32 %v3676_v29, %v3118_v30 }
0x12b6   : > { %3124 = vst [vmem:[#allocation2] sm:$0xff] %v3123_v31  ;;  %3131 = vadd.xlane.f32.xlu0 (!%p3677_p1), %v3123_v31 }
0x1343   : > { %v3132_v32 = vpop.xlane.xlu0 %3131 }
0x1344   : > { %v3133_v36 = vmul.f32 0.0078125, %v3132_v32 }
0x1346   : > { %v3134_v39 = vsub.f32 %v3123_v31, %v3133_v36 }
0x1348   : > { %v3135_v34 = vmul.f32 %v3134_v39, %v3134_v39 }
0x134a   : > { %3136 = vadd.xlane.f32.xlu0 %v3135_v34 }
0x13d7   : > { %v3137_v41 = vpop.xlane.xlu0 %3136 }
0x13d8   : > { %v3138_v42 = vmul.f32 0.0078125, %v3137_v41 }
0x13da   : > { %v3139_v43 = vadd.f32 1e-05, %v3138_v42 }
0x13dc   : > { %4334 = vrsqrt.f32 %v3139_v43 }
0x13e6   : > { %v4335_v45 = vpop.eup %4334 }
0x13e7   : > { %v3141_v50 = vmul.f32 %v4335_v45, %v3134_v39 }
0x13e9   : > { %v3148_v51 = vmul.f32 %v3678_v49, %v3141_v50 }
0x13eb   : > { %v3155_v44 = vadd.f32 %v3679_v3, %v3148_v51 }
0x13ed   : > { %3156 = vst [vmem:[%s993_s0] sm:$0xff] %v3155_v44 }
0x13ee PF: > { %s6044_s25 = sld [smem:[#allocation35_spill]]  ;;  %s6045_s18 = sld [smem:[#allocation30_spill]] }
0x13ef   : > { %s6046_s2 = sld [smem:[#allocation41_spill]]  ;;  %s6047_s24 = sld [smem:[#allocation70_spill]] }
0x13f0   : > { %s3171_s8 = sshll.u32 %s993_s0, 4  ;;  %s4799_s11 = smov [#allocation20]   ;;  %s3172_s8 = int_to_ptr.vmem [resolvable:$true] %s3171_s8 }
0x13f1   : > { %s4632_s10 = scalar_lea.vmem %s3172_s8, 128  ;;  %s4636_s12 = sshll.u32 %s4799_s11, 4  ;;  %s4637_s12 = int_to_ptr.vmem [resolvable:$false] %s4636_s12 }
0x13f2   : > { %p4633_p10 = scmp.ne.s32.totalorder %s3172_s8, %s4632_s10  ;;  %s4638_s5 = scalar_lea.vmem %s4637_s12, 256 }
0x13f3   : > { %p4639_p2 = scmp.lt.s32.totalorder %s3172_s8, %s4637_s12  ;;  %p4640_p12 = scmp.lt.s32.totalorder %s4638_s5, %s4632_s10 }
0x13f4   : > { %s3681_s26 = sshll.u32 %s6044_s25, 7  ;;  %s6048_s9 = sand.u32 1, %s6045_s18  }
0x13f5   : > { %s5818_s22 = scalar_lea.hbm %s6047_s24, %s3681_s26  ;;  %s3158_s16 = scalar_lea.sflag [#allocation5], %s6048_s9 }
0x13f6   : > { %p6049_p5 = scmp.ne.s32.totalorder %s6046_s2, 0  ;;  %p4641_p11 = por %p4640_p12, %p4639_p2 }
0x13f8   : > { %p4634_p3 = pnand %p4633_p10, %p6049_p5 }
0x13fa   : > { %p4635_p9 = pneg %p4634_p3 }
0x13fc   : > { %p4642_p13 = pnand %p4641_p11, %p4635_p9 }
0x13fe   : > { %4645 = shalt.err (!%p4642_p13)
}
0x13ff   : > { %s4646_s19 = scalar_lea.hbm %s5818_s22, 128  ;;  %s4650_s6 = scalar_lea.hbm %s6047_s24, 256 }
0x1400   : > { %p4647_p0 = scmp.ne.s32.totalorder %s5818_s22, %s4646_s19  ;;  %p4651_p8 = scmp.lt.u32.totalorder %s5818_s22, %s6047_s24 }
0x1401   : > { %p4652_p4 = scmp.lt.u32.totalorder %s4650_s6, %s4646_s19  ;;  %p4654_p10 = scmp.lt.u32.totalorder %s4646_s19, %s5818_s22 }
0x1402   : > { %p4648_p7 = pnand %p4647_p0, %p6049_p5 }
0x1403   : > { %p4653_p1 = por %p4652_p4, %p4651_p8 }
0x1404   : > { %p4649_p6 = pneg %p4648_p7 }
0x1405   : > { %p4655_p3 = por %p4654_p10, %p4653_p1 }
0x1407   : > { %p4656_p9 = pnand %p4655_p3, %p4649_p6 }
0x1409   : > { %4659 = shalt.err (!%p4656_p9)
}
0x140a   : > { %4041 = dma.vmem_to_hbm [thread:$0]  (%p6049_p5), %s3172_s8, 128, %s5818_s22, %s3158_s16  }
0x140b PF: > { %s6050_s21 = sld [smem:[#allocation38_spill]]  ;;  %s6051_s4 = sld [smem:[#allocation29_spill]] }
0x140c   : > { %s6052_s1 = sld [smem:[#allocation42_spill]] }
0x1411   : > { %p4084_p2 = scmp.ge.s32.totalorder %s6050_s21, 2  ;;  %s3183_s23 = sand.u32 1, %s6051_s4  }
0x1412   : > { %p6053_p12 = scmp.ne.s32.totalorder %s6052_s1, 0  ;;  %s3184_s3 = scalar_lea.sflag [#allocation5], %s3183_s23 }
0x1414   : > { %p4076_p11 = pnand %p4084_p2, %p6053_p12 }
0x1416   : > { %4733 = dma.done.wait (!%p4076_p11), %s3184_s3, 128  }
0x1417   : > { %4735 = vsyncadd (!%p4076_p11), %s3184_s3, 4294967168  ;;  %s47_s2 = sadd.s32 1, %s6050_s21   ;;  %s6054_s27 = sld [smem:[#allocation30_spill]] }
0x1418   : > { %p44_p13 = scmp.ge.s32.totalorder %s47_s2, 6   ;;  %s6055_s28 = sld [smem:[#allocation31_spill]] }
0x1419   : > { %s6056_s29 = sld [smem:[#allocation46_spill]]  ;;  %s6057_s30 = sld [smem:[#allocation32_spill]] }
0x141a   : > { %s6058_s0 = sld [smem:[#allocation33_spill]]  ;;  %s6059_s19 = sld [smem:[#allocation45_spill]] }
0x141b   : > { %s6060_s1 = sld [smem:[#allocation36_spill]]  ;;  %s6061_s20 = sld [smem:[#allocation37_spill]] }
0x141c   : > { %s6062_s21 = sld [smem:[#allocation43_spill]]  ;;  %s6063_s22 = sld [smem:[#allocation44_spill]] }
0x141d   :  { %46 = sbr.rel (!%p44_p13) target bundleno = 38 (0x26), region = 262 }
0x1424   :  { %3189 = vsyncpa [#allocation4], 1 }
0x1425   :  { %3191 = vsyncpa [#allocation4 + $0x1], 1 }
0x1426   :  { %3192 = vsyncpa [#allocation7], 1 }
0x1427   :  { %3194 = vsyncpa [#allocation7 + $0x1], 1 }
0x1428   :  { %3195 = vsyncpa [#allocation10], 1 }
0x1429   :  { %3197 = vsyncpa [#allocation10 + $0x1], 1 }
0x142a   :  { %3198 = vsyncpa [#allocation13], 1 }
0x142b   :  { %3200 = vsyncpa [#allocation13 + $0x1], 1 }
0x142c   :  { %3201 = vsyncpa [#allocation16], 1 }
0x142d   :  { %3203 = vsyncpa [#allocation16 + $0x1], 1 }
0x142e   :  { %3204 = vsyncpa [#allocation19], 1 }
0x142f   :  { %3205 = vsyncpa [#allocation5], 1 }
0x1430   :  { %3207 = vsyncpa [#allocation5 + $0x1], 1 }

</bundles_post_ra>
